<compile_context>
chip_gen: v6e
topology: v6e:2x2x1
jax: 0.10.0
libtpu: 0.0.40
codegen_flags: <defaults>
</compile_context>

<pallas_src>
import jax
import jax.numpy as jnp
from jax.experimental import pallas as pl
from jax.experimental.pallas import tpu as pltpu


# ------------------------------ fused Pallas kernel ------------------------

def _make_fused_kernel(cout: int, emit_enhanced: bool):
    def kernel(patches_ref, wc_ref, bc_ref, wf_ref, bf_ref, *out_refs):
        if emit_enhanced:
            logits_ref, enh_ref = out_refs
        else:
            (logits_ref,) = out_refs

        # --- enhancer: conv-as-matmul on the MXU, f32 accumulate, bias + ReLU ---
        t = jnp.dot(patches_ref[0], wc_ref[...],
                    preferred_element_type=jnp.float32)          # [P, Cout] f32
        t = jnp.maximum(t + bc_ref[...], 0.0)

        if emit_enhanced:
            enh_ref[0] = t.astype(enh_ref.dtype)

        # --- classifier: Linear as VPU broadcast-multiply + sublane reduction ---
        # logits = bf + sum_{p,c} t[p,c] * wf[c,p,:]   (wf rows pre-permuted)
        acc = bf_ref[...]                                        # [1, J] f32
        for c in range(cout):                                    # unrolled (Cout=8)
            acc = acc + jnp.sum(t[:, c:c + 1] * wf_ref[c],
                                axis=0, keepdims=True)           # [1, J]
        logits_ref[0] = acc.astype(logits_ref.dtype)

    return kernel


def fused_forward(patches, wc, bc, wf, bf, *, emit_enhanced):
    """patches: [N, P, K1] bf16; wc: [K1, Cout] bf16; bc: [1, Cout] f32;
    wf: [Cout, P, J] f32; bf: [1, J] f32.  Returns (logits [N,1,J], [enhanced])."""
    n, p, k1 = patches.shape
    cout = wc.shape[1]
    j = wf.shape[2]

    out_shapes = [jax.ShapeDtypeStruct((n, 1, j), jnp.float32)]
    out_specs = [pl.BlockSpec((1, 1, j), lambda i: (i, 0, 0))]
    if emit_enhanced:
        out_shapes.append(jax.ShapeDtypeStruct((n, p, cout), jnp.float32))
        out_specs.append(pl.BlockSpec((1, p, cout), lambda i: (i, 0, 0)))

    return pl.pallas_call(
        _make_fused_kernel(cout, emit_enhanced),
        out_shape=tuple(out_shapes),
        grid_spec=pltpu.PrefetchScalarGridSpec(
            num_scalar_prefetch=0,
            grid=(n,),                                            # one step per sample
            in_specs=[
                pl.BlockSpec((1, p, k1), lambda i: (i, 0, 0)),    # per-sample patches
                pl.BlockSpec((k1, cout), lambda i: (0, 0)),       # conv weight (invariant)
                pl.BlockSpec((1, cout), lambda i: (0, 0)),        # conv bias
                pl.BlockSpec((cout, p, j), lambda i: (0, 0, 0)),  # permuted FC weight
                pl.BlockSpec((1, j), lambda i: (0, 0)),           # FC bias
            ],
            out_specs=tuple(out_specs),
        ),
        compiler_params=pltpu.CompilerParams(
            dimension_semantics=("parallel",)),
    )(patches, wc, bc, wf, bf)


# ------------------------------ glue (plain JAX, fused by XLA) -------------

# TODO(synk): 3x3 patch extraction stays as fused XLA glue (pad + slices); building
# the taps inside the kernel from a padded VMEM copy would need 4-D shifted slices.
def im2col_3x3_pad1(x_nchw):
    """NCHW -> [N, H*W, C*9] patch tensor (feature order: C-major, then kh*kw)."""
    n, c, h, w = x_nchw.shape
    xp = jnp.pad(x_nchw, ((0, 0), (0, 0), (1, 1), (1, 1)))
    cols = [xp[:, :, i:i + h, j:j + w] for i in range(3) for j in range(3)]
    patches = jnp.stack(cols, axis=2)               # [N, C, 9, H, W]
    patches = patches.transpose(0, 3, 4, 1, 2)      # [N, H, W, C, 9]
    return patches.reshape(n, h * w, c * 9)


def enhanced_classifier_forward(x_nchw, prepared, *, return_input=False):
    """Mirrors EnhancedClassifier.forward (enhancer and classifier both present)."""
    n, _, h, w = x_nchw.shape
    cout = prepared["conv_b"].shape[1]

    patches = im2col_3x3_pad1(x_nchw).astype(jnp.bfloat16)       # [N, H*W, C*9]
    outs = fused_forward(patches,
                         prepared["conv_w_mat"], prepared["conv_b"],
                         prepared["fc_w_perm"], prepared["fc_b"],
                         emit_enhanced=return_input)

    logits = outs[0].reshape(n, -1)                              # [N, num_classes]
    if return_input:
        enhanced = outs[1].reshape(n, h, w, cout).transpose(0, 3, 1, 2)  # NCHW
        return logits, enhanced
    return logits


# ------------------------------ parameter init / one-time prep -------------

def init_params(key, cin=4, cout=8, h=16, w=16, num_classes=10):
    k1, k2, k3, k4 = jax.random.split(key, 4)
    conv_w = jax.random.normal(k1, (cout, cin, 3, 3), jnp.float32) * 0.1
    conv_b = jax.random.normal(k2, (cout,), jnp.float32) * 0.1
    fc_w = jax.random.normal(k3, (cout * h * w, num_classes), jnp.float32) * 0.02
    fc_b = jax.random.normal(k4, (num_classes,), jnp.float32) * 0.02
    return {"conv_w": conv_w, "conv_b": conv_b, "fc_w": fc_w, "fc_b": fc_b}


def prepare_params(params, *, h, w):
    """One-time weight prep: conv weight -> [Cin*9, Cout] bf16 matmul operand;
    FC weight re-grouped to [Cout, H*W, J] to match the fused kernel's row order
    (equivalent to PyTorch flatten of the NCHW activation)."""
    cout, cin = params["conv_w"].shape[:2]
    j = params["fc_w"].shape[1]
    return {
        "conv_w_mat": params["conv_w"].reshape(cout, cin * 9).T.astype(jnp.bfloat16),
        "conv_b": params["conv_b"].reshape(1, cout).astype(jnp.float32),
        "fc_w_perm": params["fc_w"].reshape(cout, h * w, j).astype(jnp.float32),
        "fc_b": params["fc_b"].reshape(1, j).astype(jnp.float32),
    }


if __name__ == "__main__":
    key = jax.random.PRNGKey(0)
    x = jax.random.normal(key, (2, 4, 16, 16), jnp.float32)      # NCHW, like PyTorch
    params = init_params(jax.random.PRNGKey(42))
    prepared = prepare_params(params, h=16, w=16)

    fwd = jax.jit(enhanced_classifier_forward, static_argnames=("return_input",))

    logits = jax.block_until_ready(fwd(x, prepared, return_input=False))
    assert logits.shape == (2, 10) and logits.dtype == jnp.float32

    # also exercise the return_input=True branch of the wrapper
    logits2, enhanced = fwd(x, prepared, return_input=True)
    jax.block_until_ready(enhanced)
    assert enhanced.shape == (2, 8, 16, 16)
    assert logits2.shape == (2, 10)

    print("KERNEL_OK")
</pallas_src>

<mosaic_0001>
module attributes {stable_mosaic.version = 11 : i64} {
  func.func @kernel(%arg0: i32, %arg1: memref<1x256x36xbf16, #tpu.memory_space<vmem>>, %arg2: memref<36x8xbf16, #tpu.memory_space<vmem>>, %arg3: memref<1x8xf32, #tpu.memory_space<vmem>>, %arg4: memref<8x256x10xf32, #tpu.memory_space<vmem>>, %arg5: memref<1x10xf32, #tpu.memory_space<vmem>>, %arg6: memref<1x1x10xf32, #tpu.memory_space<vmem>>) attributes {dimension_semantics = [#tpu.dimension_semantics<parallel>], iteration_bounds = array<i64: 2>, scalar_prefetch = 0 : i64, scratch_operands = 0 : i64, tpu.core_type = #tpu.core_type<tc>, window_params = [{transform_indices = @transform_0, window_bounds = array<i64: 1, 256, 36>}, {pipeline_mode = #tpu.pipeline_mode<synchronous>, transform_indices = @transform_1, window_bounds = array<i64: 36, 8>}, {pipeline_mode = #tpu.pipeline_mode<synchronous>, transform_indices = @transform_2, window_bounds = array<i64: 1, 8>}, {pipeline_mode = #tpu.pipeline_mode<synchronous>, transform_indices = @transform_3, window_bounds = array<i64: 8, 256, 10>}, {pipeline_mode = #tpu.pipeline_mode<synchronous>, transform_indices = @transform_4, window_bounds = array<i64: 1, 10>}, {transform_indices = @transform_5, window_bounds = array<i64: 1, 1, 10>}]} {
    %c0 = arith.constant 0 : index
    %c0_0 = arith.constant 0 : index
    %c0_1 = arith.constant 0 : index
    %0 = vector.load %arg1[%c0, %c0_0, %c0_1] : memref<1x256x36xbf16, #tpu.memory_space<vmem>>, vector<1x256x36xbf16>
    %1 = vector.shape_cast %0 : vector<1x256x36xbf16> to vector<256x36xbf16>
    %c0_2 = arith.constant 0 : index
    %c0_3 = arith.constant 0 : index
    %2 = vector.load %arg2[%c0_2, %c0_3] : memref<36x8xbf16, #tpu.memory_space<vmem>>, vector<36x8xbf16>
    %cst = arith.constant dense<0.000000e+00> : vector<256x8xf32>
    %3 = tpu.matmul %1, %2, %cst {dimension_numbers = #tpu.dot_dimension_numbers<[1], [0], [0], [1], [0, 0, 1, 1], [], []>} : vector<256x36xbf16>, vector<36x8xbf16>, vector<256x8xf32> -> vector<256x8xf32>
    %c0_4 = arith.constant 0 : index
    %c0_5 = arith.constant 0 : index
    %4 = vector.load %arg3[%c0_4, %c0_5] : memref<1x8xf32, #tpu.memory_space<vmem>>, vector<1x8xf32>
    %5 = vector.broadcast %4 : vector<1x8xf32> to vector<256x8xf32>
    %6 = arith.addf %3, %5 : vector<256x8xf32>
    %cst_6 = arith.constant 0.000000e+00 : f32
    %7 = vector.broadcast %cst_6 : f32 to vector<256x8xf32>
    %8 = arith.maximumf %6, %7 : vector<256x8xf32>
    %c0_7 = arith.constant 0 : index
    %c0_8 = arith.constant 0 : index
    %9 = vector.load %arg5[%c0_7, %c0_8] : memref<1x10xf32, #tpu.memory_space<vmem>>, vector<1x10xf32>
    %10 = vector.extract_strided_slice %8 {offsets = [0, 0], sizes = [256, 1], strides = [1, 1]} : vector<256x8xf32> to vector<256x1xf32>
    %c0_9 = arith.constant 0 : index
    %c0_10 = arith.constant 0 : index
    %c0_11 = arith.constant 0 : index
    %11 = vector.load %arg4[%c0_9, %c0_10, %c0_11] : memref<8x256x10xf32, #tpu.memory_space<vmem>>, vector<1x256x10xf32>
    %12 = vector.shape_cast %11 : vector<1x256x10xf32> to vector<256x10xf32>
    %13 = vector.broadcast %10 : vector<256x1xf32> to vector<256x10xf32>
    %14 = arith.mulf %13, %12 : vector<256x10xf32>
    %cst_12 = arith.constant dense<0.000000e+00> : vector<10xf32>
    %15 = vector.multi_reduction <add>, %14, %cst_12 [0] : vector<256x10xf32> to vector<10xf32>
    %16 = vector.shape_cast %15 : vector<10xf32> to vector<1x10xf32>
    %17 = arith.addf %9, %16 : vector<1x10xf32>
    %18 = vector.extract_strided_slice %8 {offsets = [0, 1], sizes = [256, 1], strides = [1, 1]} : vector<256x8xf32> to vector<256x1xf32>
    %c1 = arith.constant 1 : index
    %c0_13 = arith.constant 0 : index
    %c0_14 = arith.constant 0 : index
    %19 = vector.load %arg4[%c1, %c0_13, %c0_14] : memref<8x256x10xf32, #tpu.memory_space<vmem>>, vector<1x256x10xf32>
    %20 = vector.shape_cast %19 : vector<1x256x10xf32> to vector<256x10xf32>
    %21 = vector.broadcast %18 : vector<256x1xf32> to vector<256x10xf32>
    %22 = arith.mulf %21, %20 : vector<256x10xf32>
    %cst_15 = arith.constant dense<0.000000e+00> : vector<10xf32>
    %23 = vector.multi_reduction <add>, %22, %cst_15 [0] : vector<256x10xf32> to vector<10xf32>
    %24 = vector.shape_cast %23 : vector<10xf32> to vector<1x10xf32>
    %25 = arith.addf %17, %24 : vector<1x10xf32>
    %26 = vector.extract_strided_slice %8 {offsets = [0, 2], sizes = [256, 1], strides = [1, 1]} : vector<256x8xf32> to vector<256x1xf32>
    %c2 = arith.constant 2 : index
    %c0_16 = arith.constant 0 : index
    %c0_17 = arith.constant 0 : index
    %27 = vector.load %arg4[%c2, %c0_16, %c0_17] : memref<8x256x10xf32, #tpu.memory_space<vmem>>, vector<1x256x10xf32>
    %28 = vector.shape_cast %27 : vector<1x256x10xf32> to vector<256x10xf32>
    %29 = vector.broadcast %26 : vector<256x1xf32> to vector<256x10xf32>
    %30 = arith.mulf %29, %28 : vector<256x10xf32>
    %cst_18 = arith.constant dense<0.000000e+00> : vector<10xf32>
    %31 = vector.multi_reduction <add>, %30, %cst_18 [0] : vector<256x10xf32> to vector<10xf32>
    %32 = vector.shape_cast %31 : vector<10xf32> to vector<1x10xf32>
    %33 = arith.addf %25, %32 : vector<1x10xf32>
    %34 = vector.extract_strided_slice %8 {offsets = [0, 3], sizes = [256, 1], strides = [1, 1]} : vector<256x8xf32> to vector<256x1xf32>
    %c3 = arith.constant 3 : index
    %c0_19 = arith.constant 0 : index
    %c0_20 = arith.constant 0 : index
    %35 = vector.load %arg4[%c3, %c0_19, %c0_20] : memref<8x256x10xf32, #tpu.memory_space<vmem>>, vector<1x256x10xf32>
    %36 = vector.shape_cast %35 : vector<1x256x10xf32> to vector<256x10xf32>
    %37 = vector.broadcast %34 : vector<256x1xf32> to vector<256x10xf32>
    %38 = arith.mulf %37, %36 : vector<256x10xf32>
    %cst_21 = arith.constant dense<0.000000e+00> : vector<10xf32>
    %39 = vector.multi_reduction <add>, %38, %cst_21 [0] : vector<256x10xf32> to vector<10xf32>
    %40 = vector.shape_cast %39 : vector<10xf32> to vector<1x10xf32>
    %41 = arith.addf %33, %40 : vector<1x10xf32>
    %42 = vector.extract_strided_slice %8 {offsets = [0, 4], sizes = [256, 1], strides = [1, 1]} : vector<256x8xf32> to vector<256x1xf32>
    %c4 = arith.constant 4 : index
    %c0_22 = arith.constant 0 : index
    %c0_23 = arith.constant 0 : index
    %43 = vector.load %arg4[%c4, %c0_22, %c0_23] : memref<8x256x10xf32, #tpu.memory_space<vmem>>, vector<1x256x10xf32>
    %44 = vector.shape_cast %43 : vector<1x256x10xf32> to vector<256x10xf32>
    %45 = vector.broadcast %42 : vector<256x1xf32> to vector<256x10xf32>
    %46 = arith.mulf %45, %44 : vector<256x10xf32>
    %cst_24 = arith.constant dense<0.000000e+00> : vector<10xf32>
    %47 = vector.multi_reduction <add>, %46, %cst_24 [0] : vector<256x10xf32> to vector<10xf32>
    %48 = vector.shape_cast %47 : vector<10xf32> to vector<1x10xf32>
    %49 = arith.addf %41, %48 : vector<1x10xf32>
    %50 = vector.extract_strided_slice %8 {offsets = [0, 5], sizes = [256, 1], strides = [1, 1]} : vector<256x8xf32> to vector<256x1xf32>
    %c5 = arith.constant 5 : index
    %c0_25 = arith.constant 0 : index
    %c0_26 = arith.constant 0 : index
    %51 = vector.load %arg4[%c5, %c0_25, %c0_26] : memref<8x256x10xf32, #tpu.memory_space<vmem>>, vector<1x256x10xf32>
    %52 = vector.shape_cast %51 : vector<1x256x10xf32> to vector<256x10xf32>
    %53 = vector.broadcast %50 : vector<256x1xf32> to vector<256x10xf32>
    %54 = arith.mulf %53, %52 : vector<256x10xf32>
    %cst_27 = arith.constant dense<0.000000e+00> : vector<10xf32>
    %55 = vector.multi_reduction <add>, %54, %cst_27 [0] : vector<256x10xf32> to vector<10xf32>
    %56 = vector.shape_cast %55 : vector<10xf32> to vector<1x10xf32>
    %57 = arith.addf %49, %56 : vector<1x10xf32>
    %58 = vector.extract_strided_slice %8 {offsets = [0, 6], sizes = [256, 1], strides = [1, 1]} : vector<256x8xf32> to vector<256x1xf32>
    %c6 = arith.constant 6 : index
    %c0_28 = arith.constant 0 : index
    %c0_29 = arith.constant 0 : index
    %59 = vector.load %arg4[%c6, %c0_28, %c0_29] : memref<8x256x10xf32, #tpu.memory_space<vmem>>, vector<1x256x10xf32>
    %60 = vector.shape_cast %59 : vector<1x256x10xf32> to vector<256x10xf32>
    %61 = vector.broadcast %58 : vector<256x1xf32> to vector<256x10xf32>
    %62 = arith.mulf %61, %60 : vector<256x10xf32>
    %cst_30 = arith.constant dense<0.000000e+00> : vector<10xf32>
    %63 = vector.multi_reduction <add>, %62, %cst_30 [0] : vector<256x10xf32> to vector<10xf32>
    %64 = vector.shape_cast %63 : vector<10xf32> to vector<1x10xf32>
    %65 = arith.addf %57, %64 : vector<1x10xf32>
    %66 = vector.extract_strided_slice %8 {offsets = [0, 7], sizes = [256, 1], strides = [1, 1]} : vector<256x8xf32> to vector<256x1xf32>
    %c7 = arith.constant 7 : index
    %c0_31 = arith.constant 0 : index
    %c0_32 = arith.constant 0 : index
    %67 = vector.load %arg4[%c7, %c0_31, %c0_32] : memref<8x256x10xf32, #tpu.memory_space<vmem>>, vector<1x256x10xf32>
    %68 = vector.shape_cast %67 : vector<1x256x10xf32> to vector<256x10xf32>
    %69 = vector.broadcast %66 : vector<256x1xf32> to vector<256x10xf32>
    %70 = arith.mulf %69, %68 : vector<256x10xf32>
    %cst_33 = arith.constant dense<0.000000e+00> : vector<10xf32>
    %71 = vector.multi_reduction <add>, %70, %cst_33 [0] : vector<256x10xf32> to vector<10xf32>
    %72 = vector.shape_cast %71 : vector<10xf32> to vector<1x10xf32>
    %73 = arith.addf %65, %72 : vector<1x10xf32>
    %c0_34 = arith.constant 0 : index
    %c0_35 = arith.constant 0 : index
    %c0_36 = arith.constant 0 : index
    %74 = vector.load %arg6[%c0_34, %c0_35, %c0_36] : memref<1x1x10xf32, #tpu.memory_space<vmem>>, vector<1x1x10xf32>
    %75 = vector.shape_cast %74 : vector<1x1x10xf32> to vector<1x10xf32>
    %76 = vector.shape_cast %73 : vector<1x10xf32> to vector<1x1x10xf32>
    tpu.vector_store %arg6[%c0_34, %c0_35, %c0_36], %76 {strides = array<i32>} : memref<1x1x10xf32, #tpu.memory_space<vmem>>, vector<1x1x10xf32>,
    return
  }
  func.func @transform_0(%arg0: i32) -> (i32, i32, i32) {
    %c0_i32 = arith.constant 0 : i32
    %c0_i32_0 = arith.constant 0 : i32
    %c0_i32_1 = arith.constant 0 : i32
    return %arg0, %c0_i32, %c0_i32_0 : i32, i32, i32
  }
  func.func @transform_1(%arg0: i32) -> (i32, i32) {
    %c0_i32 = arith.constant 0 : i32
    %c0_i32_0 = arith.constant 0 : i32
    %c0_i32_1 = arith.constant 0 : i32
    return %c0_i32, %c0_i32_0 : i32, i32
  }
  func.func @transform_2(%arg0: i32) -> (i32, i32) {
    %c0_i32 = arith.constant 0 : i32
    %c0_i32_0 = arith.constant 0 : i32
    %c0_i32_1 = arith.constant 0 : i32
    return %c0_i32, %c0_i32_0 : i32, i32
  }
  func.func @transform_3(%arg0: i32) -> (i32, i32, i32) {
    %c0_i32 = arith.constant 0 : i32
    %c0_i32_0 = arith.constant 0 : i32
    %c0_i32_1 = arith.constant 0 : i32
    %c0_i32_2 = arith.constant 0 : i32
    return %c0_i32, %c0_i32_0, %c0_i32_1 : i32, i32, i32
  }
  func.func @transform_4(%arg0: i32) -> (i32, i32) {
    %c0_i32 = arith.constant 0 : i32
    %c0_i32_0 = arith.constant 0 : i32
    %c0_i32_1 = arith.constant 0 : i32
    return %c0_i32, %c0_i32_0 : i32, i32
  }
  func.func @transform_5(%arg0: i32) -> (i32, i32, i32) {
    %c0_i32 = arith.constant 0 : i32
    %c0_i32_0 = arith.constant 0 : i32
    %c0_i32_1 = arith.constant 0 : i32
    return %arg0, %c0_i32, %c0_i32_0 : i32, i32, i32
  }
}

</mosaic_0001>

<bundles_post_ra>
// kernel: enhanced_classifier_forward.1
= control target key start
LH: loop header
LB: loop body
LE: loop exit
PB: predicated region body
PF: predicated region fallthrough
CT: control target
= control target key end

     0   :  { %10 = vsyncpa [#allocation3], 0  ;;  %s5648_s0 = inlined_call_operand.vmem [shape: bf16[2,256,36], index: 0, kind: input, shape index: {}]   ;;  %s5649_s1 = inlined_call_operand.vmem [shape: bf16[36,8], index: 1, kind: input, shape index: {}]   ;;  %s5650_s2 = inlined_call_operand.vmem [shape: f32[1,8], index: 2, kind: input, shape index: {}]   ;;  %s5651_s3 = inlined_call_operand.vmem [shape: f32[8,256,10], index: 3, kind: input, shape index: {}]   ;;  %s5652_s4 = inlined_call_operand.vmem [shape: f32[1,10], index: 4, kind: input, shape index: {}]   ;;  %s5653_s5 = inlined_call_operand.hbm [shape: f32[2,1,10], index: 5, kind: output, shape index: {}]  }
   0x1   :  { %12 = vsyncpa [#allocation3 + $0x1], 0  ;;  %s3402_s18 = smov 0   ;;  %s3404_s19 = smov 0  }
   0x2   :  { %s3406_s20 = smov 0   ;;  %s3408_s21 = smov 0  }
   0x3 LB: > { %s3423_s22 = sadd.s32 4294967295, %s3361_s21   ;;  %s2815_s23 = sadd.s32 4294967294, %s3361_s21   ;;  %s3361_s21 = sphi %s3408_s21, %s5948_s21   ;;  %s3357_s20 = sphi %s3406_s20, %s5947_s20   ;;  %s3353_s19 = sphi %s3404_s19, %s5946_s19   ;;  %s3349_s18 = sphi %s3402_s18, %s5945_s18  }
   0x4   : > { %s3427_s24 = sadd.s32 1, %s3361_s21   ;;  %s135_s25 = sadd.s32 1, %s3357_s20 }
   0x5   : > { %s132_s26 = ssub.s32 %s3361_s21, %s3427_s24  ;;  %p145_p0 = scmp.ne.s32.totalorder %s3357_s20, %s3353_s19 }
   0x6   : > { %p133_p1 = scmp.eq.s32.totalorder %s132_s26, 0  ;;  %p146_p2 = scmp.eq.s32.totalorder %s3423_s22, 1 }
   0x7   : > { %p151_p3 = scmp.ne.s32.totalorder %s3353_s19, %s3349_s18  ;;  %p152_p4 = scmp.eq.s32.totalorder %s2815_s23, 1 }
   0x8   : > { %s3438_s27 = scalar_select %p133_p1, %s3357_s20, %s135_s25  }
   0x9   : > { %p3440_p5 = por %p146_p2, %p145_p0  ;;  %p3444_p6 = por %p152_p4, %p151_p3 }
   0xa   : > { %p2818_p7 = scmp.ge.s32.totalorder %s3361_s21, 1  ;;  %p190_p8 = scmp.lt.s32.totalorder %s3361_s21, 3 }
   0xc   : > { %p191_p9 = pnand %p2818_p7, %p190_p8 }
   0xe   : > { %194 = sbr.rel (%p191_p9) target bundleno = 955 (0x3bb), region = 40 }
  0x13   : > { %v3282_v0 = vld [vmem:[%s5649_s1 + $0x10] ss:$0 sps:$4 sm:$0x33]   ;;  %vm411_vm0 = vcmask 1041408   ;;  %v3283_v1 = vld [vmem:[%s5649_s1 + $0x8] sm:$0xff]   ;;  %p217_p10 = scmp.lt.s32.totalorder %s3423_s22, 1 }
  0x14   : > { %3148 = vmatprep.subr.msk.bf16.mxu0 %vm411_vm0, %v3282_v0  ;;  %3149 = vmatprep.subr.msk.bf16.mxu1 %vm411_vm0, %v3282_v0  ;;  %v413_v2 = vsel %vm411_vm0, %v3282_v0, 0  ;;  %v3284_v3 = vld [vmem:[%s5649_s1] sm:$0xff]   ;;  %vm362_vm1 = vcmask 293888   ;;  %v5660_v16 = vmov 0   ;;  %v5656_v30 = vmov 2   ;;  %s215_s26 = sand.u32 1, %s3353_s19  }
  0x15   : > { %3105 = vmatpush3.bf16.msra.mxu0 %v413_v2  ;;  %3145 = vmatpush3.bf16.msra.mxu1 %v413_v2  ;;  %s218_s9 = scalar_select %p217_p10, %s3423_s22, 1  ;;  %v3503_v21 = vld [vmem:[%s5650_s2] ss:$0 sm:$0xff]  ;;  %v5654_v31 = vmov 1   ;;  %v5658_v36 = vmov 3   ;;  %vm833_vm2 = vcmask 80896  }
  0x16   : > { %3106 = vmatprep.subr.bf16.mxu0 %v3283_v1  ;;  %3143 = vmatprep.subr.bf16.mxu1 %v3283_v1  ;;  %s3081_s30 = sshll.u32 %s3423_s22, 4  ;;  %s216_s6 = scalar_lea.vmem [#allocation2], %s215_s26  ;;  %vm2745_vm3 = vcmask 73728  }
  0x17   : > { %s3084_s12 = sshll.u32 %s218_s9, 7  ;;  %3198 = vset.pattern.permute.xlu0 %v5660_v16  ;;  %3197 = vset.pattern.permute.xlu1 %v5660_v16  ;;  %s2760_s7 = sshll.u32 %s216_s6, 4  ;;  %s2761_s7 = int_to_ptr.vmem [resolvable:$true] %s2760_s7 }
  0x18   : > { %s3464_s15 = scalar_lea.vmem %s5648_s0, %s3084_s12  ;;  %s2758_s10 = scalar_lea.hbm %s5653_s5, %s3081_s30 }
  0x19   : > { %3107 = vmatpush3.bf16.msra.mxu0 %v3283_v1  ;;  %3146 = vmatpush3.bf16.msra.mxu1 %v3283_v1  ;;  %v3285_v4 = vld [vmem:[%s3464_s15] sm:$0xff]   ;;  %v3287_v6 = vld [vmem:[%s3464_s15 + $0x8] sm:$0xff]   ;;  %v3289_v8 = vld [vmem:[%s3464_s15 + $0x10] sm:$0xff]   ;;  %s2748_s11 = scalar_lea.sflag [#allocation3], %s215_s26  ;;  %s3301_s12 = scalar_lea.vmem %s2761_s7, 16 }
  0x1a   : > { %3108 = vmatprep.subr.bf16.mxu0 %v3284_v3  ;;  %3144 = vmatprep.subr.bf16.mxu1 %v3284_v3  ;;  %v3286_v5 = vld [vmem:[%s3464_s15 + $0x40] sm:$0xff]   ;;  %v3288_v7 = vld [vmem:[%s3464_s15 + $0x48] sm:$0xff]   ;;  %v3291_v9 = vld [vmem:[%s3464_s15 + $0x50] sm:$0xff]   ;;  %p3302_p11 = scmp.ne.s32.totalorder %s2761_s7, %s3301_s12  ;;  %s3371_s13 = smov [#allocation2]  }
  0x1b   : > { %3110 = vmatprep.mubr.msk.bf16.mxu0 %vm362_vm1, %v3285_v4  ;;  %3126 = vmatprep.mubr.msk.bf16.mxu1 %vm362_vm1, %v3286_v5  ;;  %v3290_v10 = vld [vmem:[%s3464_s15 + $0x18] sm:$0xff]   ;;  %v3293_v12 = vld [vmem:[%s3464_s15 + $0x20] sm:$0xff]   ;;  %v3294_v14 = vld [vmem:[%s3464_s15 + $0x28] sm:$0xff]   ;;  %s3305_s14 = sshll.u32 %s3371_s13, 4  ;;  %s3306_s14 = int_to_ptr.vmem [resolvable:$false] %s3305_s14 }
  0x1c   : > { %v3292_v11 = vld [vmem:[%s3464_s15 + $0x58] sm:$0xff]   ;;  %v3295_v13 = vld [vmem:[%s3464_s15 + $0x60] sm:$0xff]   ;;  %v3296_v15 = vld [vmem:[%s3464_s15 + $0x68] sm:$0xff]   ;;  %p3303_p12 = pnand %p3302_p11, %p3440_p5  ;;  %s3307_s22 = scalar_lea.vmem %s3306_s14, 32 }
  0x1d   : > { %3109 = vmatpush3.bf16.msra.mxu0 %v3284_v3  ;;  %3147 = vmatpush3.bf16.msra.mxu1 %v3284_v3  ;;  %v3297_v17 = vld [vmem:[%s3464_s15 + $0x30] sm:$0xff]   ;;  %v3298_v18 = vld [vmem:[%s3464_s15 + $0x38] sm:$0xff]   ;;  %p3308_p0 = scmp.lt.s32.totalorder %s2761_s7, %s3306_s14  ;;  %p3309_p1 = scmp.lt.s32.totalorder %s3307_s22, %s3301_s12 }
  0x1e   : > { %v3299_v19 = vld [vmem:[%s3464_s15 + $0x70] sm:$0xff]   ;;  %v3300_v20 = vld [vmem:[%s3464_s15 + $0x78] sm:$0xff]   ;;  %p3304_p13 = pneg %p3303_p12 }
  0x1f   : > { %p3310_p2 = por %p3309_p1, %p3308_p0 }
  0x20   : > { %3111 = vmatmul.mubr.msk.bf16.vlgmr.msra.gmra.mxu0 %vm362_vm1, %v3287_v6  ;;  %3127 = vmatmul.mubr.msk.bf16.vlgmr.msra.gmra.mxu1 %vm362_vm1, %v3288_v7 }
  0x21   : > { %3114 = vmatprep.mubr.msk.bf16.mxu0 %vm362_vm1, %v3289_v8  ;;  %3130 = vmatprep.mubr.msk.bf16.mxu1 %vm362_vm1, %v3291_v9  ;;  %p3311_p3 = pnand %p3310_p2, %p3304_p13 }
  0x28   : > { %3115 = vmatmul.mubr.msk.bf16.gmra.mxu0 %vm362_vm1, %v3290_v10  ;;  %3131 = vmatmul.mubr.msk.bf16.gmra.mxu1 %vm362_vm1, %v3292_v11 }
  0x29   : > { %3118 = vmatprep.mubr.msk.bf16.mxu0 %vm362_vm1, %v3293_v12  ;;  %3134 = vmatprep.mubr.msk.bf16.mxu1 %vm362_vm1, %v3295_v13 }
  0x30   : > { %3119 = vmatmul.mubr.msk.bf16.gmra.mxu0 %vm362_vm1, %v3294_v14  ;;  %3135 = vmatmul.mubr.msk.bf16.gmra.mxu1 %vm362_vm1, %v3296_v15 }
  0x31   : > { %3122 = vmatprep.mubr.msk.bf16.mxu0 %vm362_vm1, %v3297_v17  ;;  %3138 = vmatprep.mubr.msk.bf16.mxu1 %vm362_vm1, %v3299_v19 }
  0x38   : > { %3123 = vmatmul.mubr.msk.bf16.gmra.mxu0 %vm362_vm1, %v3298_v18  ;;  %3139 = vmatmul.mubr.msk.bf16.gmra.mxu1 %vm362_vm1, %v3300_v20 }
  0xe0   : > { %v3112_v22 = vpop.f32.mrf.mxu0  ;;  %v3128_v23 = vpop.f32.mrf.mxu1 }
  0xe1   : > { %v458_v24 = vadd.f32 %v3112_v22, %v3503_v21  ;;  %v522_v25 = vadd.f32 %v3128_v23, %v3503_v21 }
  0xe2   : > { %v449_v28 = vpop.f32.mrf.mxu0  ;;  %v513_v32 = vpop.f32.mrf.mxu1 }
  0xe3   : > { %v3507_v26 = vmax.f32 %v458_v24, 0.0  ;;  %v3509_v27 = vmax.f32 %v522_v25, 0.0  ;;  %v450_v29 = vadd.f32 %v3503_v21, %v449_v28  ;;  %v514_v34 = vadd.f32 %v3503_v21, %v513_v32 }
  0xe4   : > { %v3113_v37 = vpop.f32.mrf.mxu0  ;;  %v3129_v39 = vpop.f32.mrf.mxu1 }
  0xe5   : > { %733 = vperm.xlu0 %3198, %v3509_v27   ;;  %653 = vperm.xlu1 %3197, %v3507_v26   ;;  %v3518_v33 = vmax.f32 %v450_v29, 0.0  ;;  %v3524_v35 = vmax.f32 %v514_v34, 0.0  ;;  %v461_v38 = vadd.f32 %v3113_v37, %v3503_v21  ;;  %v525_v41 = vadd.f32 %v3129_v39, %v3503_v21 }
  0xe6   : > { %v452_v43 = vpop.f32.mrf.mxu0  ;;  %v516_v45 = vpop.f32.mrf.mxu1 }
  0xe7   : > { %v3541_v40 = vmax.f32 %v461_v38, 0.0  ;;  %v3548_v42 = vmax.f32 %v525_v41, 0.0  ;;  %v453_v44 = vadd.f32 %v3503_v21, %v452_v43  ;;  %v517_v47 = vadd.f32 %v3503_v21, %v516_v45 }
  0xe8   : > { %v3116_v49 = vpop.f32.mrf.mxu0  ;;  %v3132_v51 = vpop.f32.mrf.mxu1 }
  0xe9   : > { %3201 = vset.pattern.permute.xlu0 %v5656_v30  ;;  %3199 = vset.pattern.permute.xlu1 %v5654_v31  ;;  %5696 = vst [vmem:[#allocation5_spill] sm:$0xff] %v3541_v40  ;;  %5697 = vst [vmem:[#allocation6_spill] sm:$0xff] %v3548_v42  ;;  %v3560_v46 = vmax.f32 %v453_v44, 0.0  ;;  %v3567_v48 = vmax.f32 %v517_v47, 0.0  ;;  %v474_v50 = vadd.f32 %v3116_v49, %v3503_v21 }
  0xea   : > { %1273 = vperm.xlu0 %3201, %v3509_v27   ;;  %946 = vperm.xlu1 %3199, %v3507_v26   ;;  %v538_v53 = vadd.f32 %v3132_v51, %v3503_v21  ;;  %v465_v55 = vpop.f32.mrf.mxu0  ;;  %v529_v57 = vpop.f32.mrf.mxu1 }
  0xeb   : > { %5698 = vst [vmem:[#allocation7_spill] sm:$0xff] %v3567_v48  ;;  %v3581_v52 = vmax.f32 %v474_v50, 0.0  ;;  %v466_v56 = vadd.f32 %v3503_v21, %v465_v55  ;;  %v530_v59 = vadd.f32 %v3503_v21, %v529_v57 }
  0xec   : > { %v3587_v54 = vmax.f32 %v538_v53, 0.0  ;;  %v3117_v61 = vpop.f32.mrf.mxu0  ;;  %v3133_v63 = vpop.f32.mrf.mxu1 }
  0xed   : > { %v3600_v58 = vmax.f32 %v466_v56, 0.0  ;;  %v3607_v60 = vmax.f32 %v530_v59, 0.0  ;;  %v477_v62 = vadd.f32 %v3117_v61, %v3503_v21  ;;  %v541_v1 = vadd.f32 %v3133_v63, %v3503_v21 }
  0xee   : > { %3203 = vset.pattern.permute.xlu0 %v5660_v16  ;;  %1010 = vperm.xlu1 %3199, %v3509_v27   ;;  %v468_v3 = vpop.f32.mrf.mxu0  ;;  %v532_v5 = vpop.f32.mrf.mxu1 }
  0xef   : > { %643 = vperm.xlu0 %3203, %v3518_v33   ;;  %v3618_v0 = vmax.f32 %v477_v62, 0.0  ;;  %v3625_v2 = vmax.f32 %v541_v1, 0.0  ;;  %v469_v4 = vadd.f32 %v3503_v21, %v468_v3  ;;  %v533_v7 = vadd.f32 %v3503_v21, %v532_v5 }
  0xf0   : > { %v3120_v13 = vpop.f32.mrf.mxu0  ;;  %v3136_v18 = vpop.f32.mrf.mxu1 }
  0xf1   : > { %5699 = vst [vmem:[#allocation8_spill] sm:$0xff] %v3625_v2  ;;  %v3634_v6 = vmax.f32 %v469_v4, 0.0  ;;  %v3644_v10 = vmax.f32 %v533_v7, 0.0  ;;  %v490_v15 = vadd.f32 %v3120_v13, %v3503_v21  ;;  %v554_v20 = vadd.f32 %v3136_v18, %v3503_v21 }
  0xf2   : > { %3200 = vset.pattern.permute.xlu1 %v5656_v30  ;;  %v481_v34 = vpop.f32.mrf.mxu0  ;;  %v545_v41 = vpop.f32.mrf.mxu1 }
  0xf3   : > { %1209 = vperm.xlu1 %3200, %v3507_v26   ;;  %723 = vperm.xlu0 %3203, %v3524_v35   ;;  %5700 = vst [vmem:[#allocation9_spill] sm:$0xff] %v3644_v10  ;;  %v3664_v19 = vmax.f32 %v490_v15, 0.0  ;;  %v3673_v24 = vmax.f32 %v554_v20, 0.0  ;;  %v482_v38 = vadd.f32 %v3503_v21, %v481_v34  ;;  %v546_v44 = vadd.f32 %v3503_v21, %v545_v41 }
  0xf4   : > { %v3121_v56 = vpop.f32.mrf.mxu0  ;;  %v3137_v62 = vpop.f32.mrf.mxu1 }
  0xf5   : > { %v3698_v43 = vmax.f32 %v482_v38, 0.0  ;;  %v3708_v49 = vmax.f32 %v546_v44, 0.0  ;;  %v493_v57 = vadd.f32 %v3121_v56, %v3503_v21  ;;  %v557_v1 = vadd.f32 %v3137_v62, %v3503_v21 }
  0xf6   : > { %v484_v15 = vpop.f32.mrf.mxu0  ;;  %v548_v34 = vpop.f32.mrf.mxu1 }
  0xf7   : > { %3202 = vset.pattern.permute.xlu1 %v5658_v36  ;;  %3204 = vset.pattern.permute.xlu0 %v5654_v31  ;;  %v3732_v63 = vmax.f32 %v493_v57, 0.0  ;;  %v3743_v5 = vmax.f32 %v557_v1, 0.0  ;;  %v485_v18 = vadd.f32 %v3503_v21, %v484_v15  ;;  %v549_v44 = vadd.f32 %v3503_v21, %v548_v34 }
  0xf8   : > { %1472 = vperm.xlu1 %3202, %v3507_v26   ;;  %938 = vperm.xlu0 %3204, %v3518_v33   ;;  %v3124_v1 = vpop.f32.mrf.mxu0 }
  0xf9   : > { %5706 = vst [vmem:[#allocation15_spill] sm:$0xff] %v3732_v63  ;;  %5708 = vst [vmem:[#allocation17_spill] sm:$0xff] %v3743_v5  ;;  %v3760_v41 = vmax.f32 %v485_v18, 0.0  ;;  %v3771_v62 = vmax.f32 %v549_v44, 0.0  ;;  %v506_v34 = vadd.f32 %v3124_v1, %v3503_v21 }
  0xfb   : > { %5713 = vst [vmem:[#allocation22_spill] sm:$0xff] %v3771_v62 }
  0xfc   : > { %1536 = vperm.xlu1 %3202, %v3509_v27   ;;  %3207 = vset.pattern.permute.xlu0 %v5656_v30 }
  0xfd   : > { %1265 = vperm.xlu0 %3207, %v3524_v35  }
 0x100   : > { %3205 = vset.pattern.permute.xlu1 %v5654_v31 }
 0x101   : > { %1002 = vperm.xlu1 %3205, %v3524_v35   ;;  %3208 = vset.pattern.permute.xlu0 %v5658_v36 }
 0x102   : > { %1464 = vperm.xlu0 %3208, %v3518_v33  }
 0x105   : > { %3206 = vset.pattern.permute.xlu1 %v5656_v30 }
 0x106   : > { %1201 = vperm.xlu1 %3206, %v3518_v33   ;;  %3211 = vset.pattern.permute.xlu0 %v5654_v31 }
 0x107   : > { %950 = vperm.xlu0 %3211, %v3541_v40  }
 0x10a   : > { %3209 = vset.pattern.permute.xlu1 %v5658_v36 }
 0x10b   : > { %1528 = vperm.xlu1 %3209, %v3524_v35   ;;  %1014 = vperm.xlu0 %3211, %v3548_v42  }
 0x10f   : > { %3210 = vset.pattern.permute.xlu1 %v5660_v16  ;;  %3213 = vset.pattern.permute.xlu0 %v5658_v36 }
 0x110   : > { %658 = vperm.xlu1 %3210, %v3541_v40   ;;  %1476 = vperm.xlu0 %3213, %v3541_v40  }
 0x114   : > { %738 = vperm.xlu1 %3210, %v3548_v42   ;;  %1540 = vperm.xlu0 %3213, %v3548_v42  }
 0x118   : > { %3212 = vset.pattern.permute.xlu1 %v5656_v30  ;;  %3214 = vset.pattern.permute.xlu0 %v5660_v16 }
 0x119   : > { %1213 = vperm.xlu1 %3212, %v3541_v40   ;;  %648 = vperm.xlu0 %3214, %v3560_v46  }
 0x11d   : > { %1277 = vperm.xlu1 %3212, %v3548_v42   ;;  %3217 = vset.pattern.permute.xlu0 %v5654_v31 }
 0x11e   : > { %1006 = vperm.xlu0 %3217, %v3567_v48  }
 0x121   : > { %3215 = vset.pattern.permute.xlu1 %v5660_v16 }
 0x122   : > { %728 = vperm.xlu1 %3215, %v3567_v48   ;;  %3218 = vset.pattern.permute.xlu0 %v5656_v30 }
 0x123   : > { %1205 = vperm.xlu0 %3218, %v3560_v46  }
 0x126   : > { %3216 = vset.pattern.permute.xlu1 %v5654_v31 }
 0x127   : > { %942 = vperm.xlu1 %3216, %v3560_v46   ;;  %3221 = vset.pattern.permute.xlu0 %v5658_v36 }
 0x128   : > { %1532 = vperm.xlu0 %3221, %v3567_v48  }
 0x12b   : > { %3219 = vset.pattern.permute.xlu1 %v5656_v30 }
 0x12c   : > { %1269 = vperm.xlu1 %3219, %v3567_v48   ;;  %3222 = vset.pattern.permute.xlu0 %v5660_v16 }
 0x12d   : > { %673 = vperm.xlu0 %3222, %v3581_v52  }
 0x130   : > { %3220 = vset.pattern.permute.xlu1 %v5658_v36 }
 0x131   : > { %1468 = vperm.xlu1 %3220, %v3560_v46   ;;  %753 = vperm.xlu0 %3222, %v3587_v54  }
 0x135   : > { %3223 = vset.pattern.permute.xlu1 %v5654_v31  ;;  %3224 = vset.pattern.permute.xlu0 %v5656_v30 }
 0x136   : > { %962 = vperm.xlu1 %3223, %v3581_v52   ;;  %1225 = vperm.xlu0 %3224, %v3581_v52  }
 0x13a   : > { %1026 = vperm.xlu1 %3223, %v3587_v54   ;;  %1289 = vperm.xlu0 %3224, %v3587_v54  }
 0x13e   : > { %3225 = vset.pattern.permute.xlu1 %v5658_v36  ;;  %3226 = vset.pattern.permute.xlu0 %v5660_v16 }
 0x13f   : > { %1488 = vperm.xlu1 %3225, %v3581_v52   ;;  %663 = vperm.xlu0 %3226, %v3600_v58  }
 0x143   : > { %1552 = vperm.xlu1 %3225, %v3587_v54   ;;  %743 = vperm.xlu0 %3226, %v3607_v60  }
 0x147   : > { %3227 = vset.pattern.permute.xlu1 %v5654_v31  ;;  %3228 = vset.pattern.permute.xlu0 %v5656_v30 }
 0x148   : > { %954 = vperm.xlu1 %3227, %v3600_v58   ;;  %1217 = vperm.xlu0 %3228, %v3600_v58  }
 0x14c   : > { %1018 = vperm.xlu1 %3227, %v3607_v60   ;;  %1281 = vperm.xlu0 %3228, %v3607_v60  }
 0x150   : > { %3229 = vset.pattern.permute.xlu1 %v5658_v36  ;;  %3231 = vset.pattern.permute.xlu0 %v5654_v31 }
 0x151   : > { %1480 = vperm.xlu1 %3229, %v3600_v58   ;;  %966 = vperm.xlu0 %3231, %v3618_v0  }
 0x155   : > { %1544 = vperm.xlu1 %3229, %v3607_v60   ;;  %1030 = vperm.xlu0 %3231, %v3625_v2  }
 0x159   : > { %3230 = vset.pattern.permute.xlu1 %v5660_v16  ;;  %3233 = vset.pattern.permute.xlu0 %v5658_v36 }
 0x15a   : > { %678 = vperm.xlu1 %3230, %v3618_v0   ;;  %1492 = vperm.xlu0 %3233, %v3618_v0  }
 0x15e   : > { %758 = vperm.xlu1 %3230, %v3625_v2   ;;  %3235 = vset.pattern.permute.xlu0 %v5654_v31 }
 0x15f   : > { %958 = vperm.xlu0 %3235, %v3634_v6  }
 0x160   : > { %v3640_v8 = vpop.permute.xlu1 %653  ;;  %v3642_v9 = vpop.permute.xlu0 %733 }
 0x162   : > { %3232 = vset.pattern.permute.xlu1 %v5656_v30 }
 0x163   : > { %1229 = vperm.xlu1 %3232, %v3618_v0   ;;  %1022 = vperm.xlu0 %3235, %v3644_v10  }
 0x165   : > { %v3649_v11 = vpop.permute.xlu1 %946  ;;  %v3651_v12 = vpop.permute.xlu0 %1273 }
 0x167   : > { %1293 = vperm.xlu1 %3232, %v3625_v2   ;;  %3237 = vset.pattern.permute.xlu0 %v5658_v36 }
 0x168   : > { %1484 = vperm.xlu0 %3237, %v3634_v6  }
 0x169   : > { %v3656_v14 = vpop.permute.xlu1 %1010 }
 0x16a   : > { %v3659_v17 = vpop.permute.xlu0 %643 }
 0x16b   : > { %3234 = vset.pattern.permute.xlu1 %v5660_v16 }
 0x16c   : > { %668 = vperm.xlu1 %3234, %v3634_v6   ;;  %1548 = vperm.xlu0 %3237, %v3644_v10  }
 0x16e   : > { %v3667_v22 = vpop.permute.xlu1 %1209  ;;  %v3669_v23 = vpop.permute.xlu0 %723 }
 0x170   : > { %748 = vperm.xlu1 %3234, %v3644_v10   ;;  %3238 = vset.pattern.permute.xlu0 %v5660_v16 }
 0x171   : > { %693 = vperm.xlu0 %3238, %v3664_v19  }
 0x173   : > { %v3676_v25 = vpop.permute.xlu1 %1472  ;;  %v3678_v28 = vpop.permute.xlu0 %938 }
 0x174   : > { %3236 = vset.pattern.permute.xlu1 %v5656_v30 }
 0x175   : > { %1221 = vperm.xlu1 %3236, %v3634_v6   ;;  %773 = vperm.xlu0 %3238, %v3673_v24  }
 0x177   : > { %v3683_v29 = vpop.permute.xlu1 %1536 }
 0x178   : > { %v3685_v32 = vpop.permute.xlu0 %1265 }
 0x179   : > { %1285 = vperm.xlu1 %3236, %v3644_v10   ;;  %3240 = vset.pattern.permute.xlu0 %v5656_v30 }
 0x17a   : > { %1241 = vperm.xlu0 %3240, %v3664_v19  }
 0x17c   : > { %v3690_v37 = vpop.permute.xlu1 %1002 }
 0x17d   : > { %3239 = vset.pattern.permute.xlu1 %v5654_v31  ;;  %v3694_v39 = vpop.permute.xlu0 %1464 }
 0x17e   : > { %978 = vperm.xlu1 %3239, %v3664_v19   ;;  %1305 = vperm.xlu0 %3240, %v3673_v24  }
 0x181   : > { %v3701_v45 = vpop.permute.xlu1 %1201 }
 0x182   : > { %1042 = vperm.xlu1 %3239, %v3673_v24   ;;  %3242 = vset.pattern.permute.xlu0 %v5660_v16  ;;  %v3705_v47 = vpop.permute.xlu0 %950 }
 0x183   : > { %683 = vperm.xlu0 %3242, %v3698_v43  }
 0x186   : > { %3241 = vset.pattern.permute.xlu1 %v5658_v36  ;;  %v3711_v50 = vpop.permute.xlu1 %1528  ;;  %v3713_v51 = vpop.permute.xlu0 %1014 }
 0x187   : > { %5701 = vst [vmem:[#allocation10_spill] sm:$0xff] %v3713_v51  ;;  %1504 = vperm.xlu1 %3241, %v3664_v19   ;;  %763 = vperm.xlu0 %3242, %v3708_v49  }
 0x18b   : > { %3243 = vset.pattern.permute.xlu1 %v5654_v31  ;;  %v3718_v53 = vpop.permute.xlu1 %658  ;;  %3244 = vset.pattern.permute.xlu0 %v5656_v30  ;;  %v3721_v55 = vpop.permute.xlu0 %1476 }
 0x18c   : > { %5702 = vst [vmem:[#allocation11_spill] sm:$0xff] %v3718_v53  ;;  %5703 = vst [vmem:[#allocation12_spill] sm:$0xff] %v3721_v55  ;;  %970 = vperm.xlu1 %3243, %v3698_v43   ;;  %1233 = vperm.xlu0 %3244, %v3698_v43  }
 0x18f   : > { %v3726_v59 = vpop.permute.xlu1 %738  ;;  %v3728_v61 = vpop.permute.xlu0 %1540 }
 0x190   : > { %5704 = vst [vmem:[#allocation13_spill] sm:$0xff] %v3726_v59  ;;  %5705 = vst [vmem:[#allocation14_spill] sm:$0xff] %v3728_v61  ;;  %1034 = vperm.xlu1 %3243, %v3708_v49   ;;  %1297 = vperm.xlu0 %3244, %v3708_v49   ;;  %v5732_v61 = vmov 3  }
 0x194   : > { %3245 = vset.pattern.permute.xlu1 %v5658_v36  ;;  %v3736_v3 = vpop.permute.xlu1 %1213  ;;  %3247 = vset.pattern.permute.xlu0 %v5654_v31  ;;  %v3739_v4 = vpop.permute.xlu0 %648 }
 0x195   : > { %5707 = vst [vmem:[#allocation16_spill] sm:$0xff] %v3736_v3  ;;  %1496 = vperm.xlu1 %3245, %v3698_v43   ;;  %982 = vperm.xlu0 %3247, %v3732_v63  }
 0x198   : > { %v3745_v7 = vpop.permute.xlu1 %1277 }
 0x199   : > { %5709 = vst [vmem:[#allocation18_spill] sm:$0xff] %v3745_v7  ;;  %3246 = vset.pattern.permute.xlu1 %v5660_v16  ;;  %1046 = vperm.xlu0 %3247, %v3743_v5   ;;  %v3749_v13 = vpop.permute.xlu0 %1006 }
 0x19a   : > { %5710 = vst [vmem:[#allocation19_spill] sm:$0xff] %v3749_v13  ;;  %698 = vperm.xlu1 %3246, %v3732_v63  }
 0x19d   : > { %v3753_v20 = vpop.permute.xlu1 %728  ;;  %3249 = vset.pattern.permute.xlu0 %v5658_v36 }
 0x19e   : > { %5711 = vst [vmem:[#allocation20_spill] sm:$0xff] %v3753_v20  ;;  %778 = vperm.xlu1 %3246, %v3743_v5   ;;  %1508 = vperm.xlu0 %3249, %v3732_v63   ;;  %v3758_v38 = vpop.permute.xlu0 %1205  ;;  %v5720_v20 = vmov 2  }
 0x1a2   : > { %3248 = vset.pattern.permute.xlu1 %v5656_v30  ;;  %v3764_v56 = vpop.permute.xlu1 %942  ;;  %3251 = vset.pattern.permute.xlu0 %v5654_v31  ;;  %v3140_v31 = vpop.f32.mrf.mxu1 }
 0x1a3   : > { %1245 = vperm.xlu1 %3248, %v3732_v63   ;;  %974 = vperm.xlu0 %3251, %v3760_v41   ;;  %v3769_v57 = vpop.permute.xlu0 %1532 }
 0x1a4   : > { %5712 = vst [vmem:[#allocation21_spill] sm:$0xff] %v3769_v57  ;;  %v3788_v57 = vmax.f32 %v506_v34, 0.0 }
 0x1a7   : > { %1309 = vperm.xlu1 %3248, %v3743_v5   ;;  %v3774_v15 = vpop.permute.xlu1 %1269  ;;  %1038 = vperm.xlu0 %3251, %v3771_v62  }
 0x1a8   : > { %5714 = vst [vmem:[#allocation23_spill] sm:$0xff] %v3774_v15  ;;  %v3777_v18 = vpop.permute.xlu0 %673  ;;  %v570_v15 = vadd.f32 %v3140_v31, %v3503_v21 }
 0x1a9   : > { %5715 = vst [vmem:[#allocation24_spill] sm:$0xff] %v3777_v18 }
 0x1aa   : > { %v3793_v1 = vmax.f32 %v570_v15, 0.0 }
 0x1ab   : > { %3250 = vset.pattern.permute.xlu1 %v5660_v16  ;;  %3253 = vset.pattern.permute.xlu0 %v5658_v36 }
 0x1ac   : > { %688 = vperm.xlu1 %3250, %v3760_v41   ;;  %v3783_v44 = vpop.permute.xlu1 %1468  ;;  %1500 = vperm.xlu0 %3253, %v3760_v41   ;;  %v3786_v30 = vpop.permute.xlu0 %753  ;;  %5717 = vst [vmem:[#allocation26_spill] sm:$0xff] %v3793_v1 }
 0x1ad   : > { %5716 = vst [vmem:[#allocation25_spill] sm:$0xff] %v3786_v30  ;;  %v497_v30 = vpop.f32.mrf.mxu0 }
 0x1ae   : > { %v498_v7 = vadd.f32 %v3503_v21, %v497_v30 }
 0x1b0   : > { %768 = vperm.xlu1 %3250, %v3771_v62   ;;  %3254 = vset.pattern.permute.xlu0 %v5660_v16  ;;  %v3822_v18 = vmax.f32 %v498_v7, 0.0 }
 0x1b1   : > { %v3795_v13 = vpop.permute.xlu1 %962  ;;  %713 = vperm.xlu0 %3254, %v3788_v57   ;;  %v3798_v36 = vpop.permute.xlu0 %1225 }
 0x1b2   : > { %5718 = vst [vmem:[#allocation27_spill] sm:$0xff] %v3795_v13  ;;  %5719 = vst [vmem:[#allocation28_spill] sm:$0xff] %v3798_v36  ;;  %v5725_v36 = vmov 1   ;;  %v561_v13 = vpop.f32.mrf.mxu1 }
 0x1b4   : > { %3252 = vset.pattern.permute.xlu1 %v5720_v20  ;;  %v3141_v59 = vpop.f32.mrf.mxu1 }
 0x1b5   : > { %1237 = vperm.xlu1 %3252, %v3760_v41   ;;  %v3802_v34 = vpop.permute.xlu1 %1026  ;;  %793 = vperm.xlu0 %3254, %v3793_v1   ;;  %v3805_v31 = vpop.permute.xlu0 %1289 }
 0x1b6   : > { %5721 = vst [vmem:[#allocation29_spill] sm:$0xff] %v3802_v34  ;;  %5722 = vst [vmem:[#allocation30_spill] sm:$0xff] %v3805_v31 }
 0x1b9   : > { %1301 = vperm.xlu1 %3252, %v3771_v62   ;;  %3256 = vset.pattern.permute.xlu0 %v5720_v20 }
 0x1ba   : > { %v3809_v15 = vpop.permute.xlu1 %1488  ;;  %1257 = vperm.xlu0 %3256, %v3788_v57   ;;  %v3812_v16 = vpop.permute.xlu0 %663 }
 0x1bb   : > { %5723 = vst [vmem:[#allocation31_spill] sm:$0xff] %v3809_v15  ;;  %5724 = vst [vmem:[#allocation32_spill] sm:$0xff] %v3812_v16  ;;  %v562_v15 = vadd.f32 %v3503_v21, %v561_v13  ;;  %v5728_v16 = vmov 0  }
 0x1bd   : > { %3255 = vset.pattern.permute.xlu1 %v5725_v36 }
 0x1be   : > { %994 = vperm.xlu1 %3255, %v3788_v57   ;;  %v3817_v34 = vpop.permute.xlu1 %1552  ;;  %1321 = vperm.xlu0 %3256, %v3793_v1   ;;  %v3820_v31 = vpop.permute.xlu0 %743 }
 0x1bf   : > { %5726 = vst [vmem:[#allocation33_spill] sm:$0xff] %v3817_v34  ;;  %5727 = vst [vmem:[#allocation34_spill] sm:$0xff] %v3820_v31  ;;  %v3832_v34 = vmax.f32 %v562_v15, 0.0 }
 0x1c1   : > { %5731 = vst [vmem:[#allocation37_spill] sm:$0xff] %v3832_v34 }
 0x1c2   : > { %1058 = vperm.xlu1 %3255, %v3793_v1   ;;  %3258 = vset.pattern.permute.xlu0 %v5728_v16 }
 0x1c3   : > { %v3827_v30 = vpop.permute.xlu1 %954  ;;  %703 = vperm.xlu0 %3258, %v3822_v18   ;;  %v3830_v3 = vpop.permute.xlu0 %1217 }
 0x1c4   : > { %5729 = vst [vmem:[#allocation35_spill] sm:$0xff] %v3827_v30  ;;  %5730 = vst [vmem:[#allocation36_spill] sm:$0xff] %v3830_v3  ;;  %v3125_v3 = vpop.f32.mrf.mxu0 }
 0x1c5   : > { %v509_v30 = vadd.f32 %v3125_v3, %v3503_v21 }
 0x1c6   : > { %3257 = vset.pattern.permute.xlu1 %v5732_v61 }
 0x1c7   : > { %1520 = vperm.xlu1 %3257, %v3788_v57   ;;  %v3836_v7 = vpop.permute.xlu1 %1018  ;;  %783 = vperm.xlu0 %3258, %v3832_v34   ;;  %v3839_v13 = vpop.permute.xlu0 %1281  ;;  %v3856_v55 = vmax.f32 %v509_v30, 0.0 }
 0x1c8   : > { %5733 = vst [vmem:[#allocation38_spill] sm:$0xff] %v3836_v7  ;;  %5734 = vst [vmem:[#allocation39_spill] sm:$0xff] %v3839_v13 }
 0x1c9   : > { %5739 = vst [vmem:[#allocation44_spill] sm:$0xff] %v3856_v55 }
 0x1cb   : > { %3259 = vset.pattern.permute.xlu1 %v5725_v36  ;;  %3260 = vset.pattern.permute.xlu0 %v5720_v20 }
 0x1cc   : > { %986 = vperm.xlu1 %3259, %v3822_v18   ;;  %v3844_v31 = vpop.permute.xlu1 %1480  ;;  %1249 = vperm.xlu0 %3260, %v3822_v18   ;;  %v3847_v15 = vpop.permute.xlu0 %966 }
 0x1cd   : > { %5735 = vst [vmem:[#allocation40_spill] sm:$0xff] %v3844_v31  ;;  %5736 = vst [vmem:[#allocation41_spill] sm:$0xff] %v3847_v15  ;;  %v573_v31 = vadd.f32 %v3141_v59, %v3503_v21  ;;  %v500_v59 = vpop.f32.mrf.mxu0 }
 0x1ce   : > { %v501_v53 = vadd.f32 %v3503_v21, %v500_v59 }
 0x1cf   : > { %v3867_v15 = vmax.f32 %v573_v31, 0.0 }
 0x1d0   : > { %1050 = vperm.xlu1 %3259, %v3832_v34   ;;  %v3851_v7 = vpop.permute.xlu1 %1544  ;;  %1313 = vperm.xlu0 %3260, %v3832_v34   ;;  %v3854_v13 = vpop.permute.xlu0 %1030 }
 0x1d1   : > { %5737 = vst [vmem:[#allocation42_spill] sm:$0xff] %v3851_v7  ;;  %5738 = vst [vmem:[#allocation43_spill] sm:$0xff] %v3854_v13 }
 0x1d2   : > { %5742 = vst [vmem:[#allocation47_spill] sm:$0xff] %v3867_v15 }
 0x1d4   : > { %3261 = vset.pattern.permute.xlu1 %v5732_v61  ;;  %3263 = vset.pattern.permute.xlu0 %v5725_v36 }
 0x1d5   : > { %1512 = vperm.xlu1 %3261, %v3822_v18   ;;  %v3862_v3 = vpop.permute.xlu1 %678  ;;  %998 = vperm.xlu0 %3263, %v3856_v55   ;;  %v3865_v7 = vpop.permute.xlu0 %1492 }
 0x1d6   : > { %5740 = vst [vmem:[#allocation45_spill] sm:$0xff] %v3862_v3  ;;  %5741 = vst [vmem:[#allocation46_spill] sm:$0xff] %v3865_v7  ;;  %v564_v3 = vpop.f32.mrf.mxu1 }
 0x1d7   : > { %v565_v51 = vadd.f32 %v3503_v21, %v564_v3 }
 0x1d9   : > { %3262 = vset.pattern.permute.xlu1 %v5728_v16  ;;  %v3870_v30 = vpop.permute.xlu1 %758  ;;  %1062 = vperm.xlu0 %3263, %v3867_v15  }
 0x1da   : > { %5743 = vst [vmem:[#allocation48_spill] sm:$0xff] %v3870_v30  ;;  %718 = vperm.xlu1 %3262, %v3856_v55   ;;  %v3874_v13 = vpop.permute.xlu0 %958  ;;  %v3884_v30 = vmax.f32 %v501_v53, 0.0 }
 0x1db   : > { %5744 = vst [vmem:[#allocation49_spill] sm:$0xff] %v3874_v13 }
 0x1dc   : > { %5747 = vst [vmem:[#allocation52_spill] sm:$0xff] %v3884_v30 }
 0x1dd   : > { %3265 = vset.pattern.permute.xlu0 %v5732_v61 }
 0x1de   : > { %798 = vperm.xlu1 %3262, %v3867_v15   ;;  %v3879_v31 = vpop.permute.xlu1 %1229  ;;  %1524 = vperm.xlu0 %3265, %v3856_v55   ;;  %v3882_v7 = vpop.permute.xlu0 %1022 }
 0x1df   : > { %5745 = vst [vmem:[#allocation50_spill] sm:$0xff] %v3879_v31  ;;  %5746 = vst [vmem:[#allocation51_spill] sm:$0xff] %v3882_v7  ;;  %v3895_v31 = vmax.f32 %v565_v51, 0.0 }
 0x1e1   : > { %5749 = vst [vmem:[#allocation54_spill] sm:$0xff] %v3895_v31 }
 0x1e2   : > { %3264 = vset.pattern.permute.xlu1 %v5720_v20  ;;  %v3888_v13 = vpop.permute.xlu1 %1293  ;;  %3267 = vset.pattern.permute.xlu0 %v5725_v36 }
 0x1e3   : > { %5748 = vst [vmem:[#allocation53_spill] sm:$0xff] %v3888_v13  ;;  %1261 = vperm.xlu1 %3264, %v3856_v55   ;;  %990 = vperm.xlu0 %3267, %v3884_v30   ;;  %v3893_v59 = vpop.permute.xlu0 %1484 }
 0x1e7   : > { %1325 = vperm.xlu1 %3264, %v3867_v15   ;;  %v3898_v53 = vpop.permute.xlu1 %668  ;;  %1054 = vperm.xlu0 %3267, %v3895_v31   ;;  %v3901_v21 = vpop.permute.xlu0 %1548 }
 0x1e8   : > { %5750 = vst [vmem:[#allocation55_spill] sm:$0xff] %v3901_v21 }
 0x1eb   : > { %3266 = vset.pattern.permute.xlu1 %v5728_v16  ;;  %v3904_v3 = vpop.permute.xlu1 %748  ;;  %3269 = vset.pattern.permute.xlu0 %v5732_v61 }
 0x1ec   : > { %5751 = vst [vmem:[#allocation56_spill] sm:$0xff] %v3904_v3  ;;  %708 = vperm.xlu1 %3266, %v3884_v30   ;;  %1516 = vperm.xlu0 %3269, %v3884_v30   ;;  %v3909_v36 = vpop.permute.xlu0 %693 }
 0x1f0   : > { %788 = vperm.xlu1 %3266, %v3895_v31   ;;  %v3912_v51 = vpop.permute.xlu1 %1221  ;;  %1556 = vperm.xlu0 %3269, %v3625_v2   ;;  %v3915_v13 = vpop.permute.xlu0 %773 }
 0x1f1   : > { %5752 = vst [vmem:[#allocation57_spill] sm:$0xff] %v3915_v13 }
 0x1f4   : > { %3268 = vset.pattern.permute.xlu1 %v5720_v20  ;;  %v3918_v16 = vpop.permute.xlu1 %1285  ;;  %1564 = vperm.xlu0 %3269, %v3771_v62  }
 0x1f5   : > { %5753 = vst [vmem:[#allocation58_spill] sm:$0xff] %v3918_v16  ;;  %1253 = vperm.xlu1 %3268, %v3884_v30   ;;  %v3922_v21 = vpop.permute.xlu0 %1241 }
 0x1f6   : > { %5754 = vst [vmem:[#allocation59_spill] sm:$0xff] %v3922_v21 }
 0x1f8   : > { %1572 = vperm.xlu0 %3269, %v3743_v5  }
 0x1f9   : > { %1317 = vperm.xlu1 %3268, %v3895_v31   ;;  %v3926_v7 = vpop.permute.xlu1 %978  ;;  %v3928_v3 = vpop.permute.xlu0 %1305 }
 0x1fa   : > { %5755 = vst [vmem:[#allocation60_spill] sm:$0xff] %v3926_v7  ;;  %5756 = vst [vmem:[#allocation61_spill] sm:$0xff] %v3928_v3  ;;  %v3367_v7 = vmov 4  }
 0x1fc   : > { %1580 = vperm.xlu0 %3269, %v3895_v31  }
 0x1fd   : > { %3270 = vset.pattern.permute.xlu1 %v5732_v61  ;;  %v3932_v20 = vpop.permute.xlu1 %1042 }
 0x1fe   : > { %5757 = vst [vmem:[#allocation62_spill] sm:$0xff] %v3932_v20  ;;  %1560 = vperm.xlu1 %3270, %v3708_v49   ;;  %v3935_v13 = vpop.permute.xlu0 %683 }
 0x1ff   : > { %5758 = vst [vmem:[#allocation63_spill] sm:$0xff] %v3935_v13 }
 0x200   : > { %1588 = vperm.xlu0 %3269, %v3867_v15  }
 0x202   : > { %1568 = vperm.xlu1 %3270, %v3673_v24   ;;  %v3939_v16 = vpop.permute.xlu1 %1504  ;;  %v3941_v21 = vpop.permute.xlu0 %763 }
 0x203   : > { %5759 = vst [vmem:[#allocation64_spill] sm:$0xff] %v3939_v16  ;;  %5760 = vst [vmem:[#allocation65_spill] sm:$0xff] %v3941_v21 }
 0x204   : > { %3272 = vset.pattern.permute.xlu0 %v3367_v7 }
 0x205   : > { %1731 = vperm.xlu0 %3272, %v3560_v46  }
 0x206   : > { %1576 = vperm.xlu1 %3270, %v3832_v34  }
 0x207   : > { %v3945_v61 = vpop.permute.xlu1 %970  ;;  %v3947_v20 = vpop.permute.xlu0 %1233 }
 0x208   : > { %5761 = vst [vmem:[#allocation66_spill] sm:$0xff] %v3945_v61  ;;  %5762 = vst [vmem:[#allocation67_spill] sm:$0xff] %v3947_v20 }
 0x209   : > { %1743 = vperm.xlu0 %3272, %v3600_v58  }
 0x20a   : > { %1584 = vperm.xlu1 %3270, %v3793_v1  }
 0x20b   : > { %v3951_v3 = vpop.permute.xlu1 %1034  ;;  %v3953_v13 = vpop.permute.xlu0 %1297 }
 0x20c   : > { %5763 = vst [vmem:[#allocation68_spill] sm:$0xff] %v3951_v3  ;;  %5764 = vst [vmem:[#allocation69_spill] sm:$0xff] %v3953_v13 }
 0x20d   : > { %1751 = vperm.xlu0 %3272, %v3581_v52  }
 0x20e   : > { %3271 = vset.pattern.permute.xlu1 %v3367_v7 }
 0x20f   : > { %1727 = vperm.xlu1 %3271, %v3518_v33  }
 0x210   : > { %v3957_v21 = vpop.permute.xlu1 %1496  ;;  %v3959_v16 = vpop.permute.xlu0 %982 }
 0x211   : > { %5765 = vst [vmem:[#allocation70_spill] sm:$0xff] %v3957_v21  ;;  %5766 = vst [vmem:[#allocation71_spill] sm:$0xff] %v3959_v16  ;;  %1759 = vperm.xlu0 %3272, %v3698_v43  }
 0x213   : > { %1735 = vperm.xlu1 %3271, %v3507_v26  }
 0x214   : > { %v3963_v20 = vpop.permute.xlu0 %1046 }
 0x215   : > { %5767 = vst [vmem:[#allocation72_spill] sm:$0xff] %v3963_v20  ;;  %v3965_v61 = vpop.permute.xlu1 %698  ;;  %1767 = vperm.xlu0 %3272, %v3664_v19  }
 0x216   : > { %5768 = vst [vmem:[#allocation73_spill] sm:$0xff] %v3965_v61 }
 0x217   : > { %1739 = vperm.xlu1 %3271, %v3541_v40  }
 0x219   : > { %v3969_v13 = vpop.permute.xlu1 %778  ;;  %1775 = vperm.xlu0 %3272, %v3822_v18   ;;  %v3972_v7 = vpop.permute.xlu0 %1508 }
 0x21a   : > { %5769 = vst [vmem:[#allocation74_spill] sm:$0xff] %v3969_v13  ;;  %5770 = vst [vmem:[#allocation75_spill] sm:$0xff] %v3972_v7 }
 0x21b   : > { %1747 = vperm.xlu1 %3271, %v3634_v6  }
 0x21d   : > { %1783 = vperm.xlu0 %3272, %v3788_v57  }
 0x21e   : > { %v3976_v3 = vpop.permute.xlu1 %1245  ;;  %v3978_v16 = vpop.permute.xlu0 %974 }
 0x21f   : > { %5771 = vst [vmem:[#allocation76_spill] sm:$0xff] %v3976_v3  ;;  %1755 = vperm.xlu1 %3271, %v3618_v0  }
 0x221   : > { %1791 = vperm.xlu0 %3272, %v3524_v35  }
 0x222   : > { %v3982_v20 = vpop.permute.xlu1 %1309  ;;  %v3984_v61 = vpop.permute.xlu0 %1038 }
 0x223   : > { %5772 = vst [vmem:[#allocation77_spill] sm:$0xff] %v3982_v20  ;;  %5773 = vst [vmem:[#allocation78_spill] sm:$0xff] %v3984_v61  ;;  %1763 = vperm.xlu1 %3271, %v3760_v41  }
 0x225   : > { %1799 = vperm.xlu0 %3272, %v3509_v27  }
 0x227   : > { %1771 = vperm.xlu1 %3271, %v3732_v63   ;;  %v3989_v13 = vpop.permute.xlu1 %688  ;;  %v3991_v7 = vpop.permute.xlu0 %1500 }
 0x228   : > { %5774 = vst [vmem:[#allocation79_spill] sm:$0xff] %v3989_v13  ;;  %5775 = vst [vmem:[#allocation80_spill] sm:$0xff] %v3991_v7 }
 0x229   : > { %1807 = vperm.xlu0 %3272, %v3607_v60  }
 0x22b   : > { %1779 = vperm.xlu1 %3271, %v3884_v30   ;;  %v3995_v3 = vpop.permute.xlu1 %768 }
 0x22c   : > { %5776 = vst [vmem:[#allocation81_spill] sm:$0xff] %v3995_v3  ;;  %v3997_v21 = vpop.permute.xlu0 %713 }
 0x22d   : > { %5777 = vst [vmem:[#allocation82_spill] sm:$0xff] %v3997_v21  ;;  %1815 = vperm.xlu0 %3272, %v3587_v54  }
 0x22f   : > { %1787 = vperm.xlu1 %3271, %v3856_v55  }
 0x230   : > { %v4001_v61 = vpop.permute.xlu1 %1237  ;;  %v4003_v20 = vpop.permute.xlu0 %793 }
 0x231   : > { %5778 = vst [vmem:[#allocation83_spill] sm:$0xff] %v4001_v61  ;;  %5779 = vst [vmem:[#allocation84_spill] sm:$0xff] %v4003_v20  ;;  %1823 = vperm.xlu0 %3272, %v3708_v49  }
 0x233   : > { %1795 = vperm.xlu1 %3271, %v3567_v48  }
 0x234   : > { %v4007_v7 = vpop.permute.xlu1 %1301 }
 0x235   : > { %5780 = vst [vmem:[#allocation85_spill] sm:$0xff] %v4007_v7  ;;  %1831 = vperm.xlu0 %3272, %v3673_v24   ;;  %v4010_v13 = vpop.permute.xlu0 %1257  ;;  %v3368_v7 = vmov 5  }
 0x236   : > { %5781 = vst [vmem:[#allocation86_spill] sm:$0xff] %v4010_v13 }
 0x237   : > { %1803 = vperm.xlu1 %3271, %v3548_v42  }
 0x239   : > { %v4013_v3 = vpop.permute.xlu1 %994  ;;  %1839 = vperm.xlu0 %3272, %v3832_v34   ;;  %v4016_v21 = vpop.permute.xlu0 %1321 }
 0x23a   : > { %5782 = vst [vmem:[#allocation87_spill] sm:$0xff] %v4013_v3  ;;  %5783 = vst [vmem:[#allocation88_spill] sm:$0xff] %v4016_v21 }
 0x23b   : > { %1811 = vperm.xlu1 %3271, %v3644_v10  }
 0x23d   : > { %v4019_v20 = vpop.permute.xlu1 %1058  ;;  %1847 = vperm.xlu0 %3272, %v3793_v1  }
 0x23e   : > { %5784 = vst [vmem:[#allocation89_spill] sm:$0xff] %v4019_v20  ;;  %v4022_v61 = vpop.permute.xlu0 %703 }
 0x23f   : > { %5785 = vst [vmem:[#allocation90_spill] sm:$0xff] %v4022_v61  ;;  %1819 = vperm.xlu1 %3271, %v3625_v2  }
 0x241   : > { %3273 = vset.pattern.permute.xlu0 %v3368_v7 }
 0x242   : > { %v4025_v13 = vpop.permute.xlu1 %1520  ;;  %1990 = vperm.xlu0 %3273, %v3518_v33   ;;  %v4028_v3 = vpop.permute.xlu0 %783 }
 0x243   : > { %5786 = vst [vmem:[#allocation91_spill] sm:$0xff] %v4025_v13  ;;  %5787 = vst [vmem:[#allocation92_spill] sm:$0xff] %v4028_v3  ;;  %1827 = vperm.xlu1 %3271, %v3771_v62  }
 0x246   : > { %2002 = vperm.xlu0 %3273, %v3541_v40  }
 0x247   : > { %1835 = vperm.xlu1 %3271, %v3743_v5   ;;  %v4033_v20 = vpop.permute.xlu1 %986  ;;  %v4035_v21 = vpop.permute.xlu0 %1249 }
 0x248   : > { %5788 = vst [vmem:[#allocation93_spill] sm:$0xff] %v4033_v20  ;;  %5789 = vst [vmem:[#allocation94_spill] sm:$0xff] %v4035_v21 }
 0x24a   : > { %2010 = vperm.xlu0 %3273, %v3634_v6  }
 0x24b   : > { %1843 = vperm.xlu1 %3271, %v3895_v31   ;;  %v4039_v61 = vpop.permute.xlu1 %1050  ;;  %v4041_v13 = vpop.permute.xlu0 %1313 }
 0x24c   : > { %5790 = vst [vmem:[#allocation95_spill] sm:$0xff] %v4039_v61  ;;  %5791 = vst [vmem:[#allocation96_spill] sm:$0xff] %v4041_v13 }
 0x24e   : > { %2018 = vperm.xlu0 %3273, %v3618_v0  }
 0x24f   : > { %1851 = vperm.xlu1 %3271, %v3867_v15  }
 0x250   : > { %v4045_v3 = vpop.permute.xlu1 %1512  ;;  %v4047_v40 = vpop.permute.xlu0 %998 }
 0x251   : > { %5792 = vst [vmem:[#allocation97_spill] sm:$0xff] %v4045_v3  ;;  %5793 = vst [vmem:[#allocation98_spill] sm:$0xff] %v4047_v40  ;;  %v2891_v3 = vld [vmem:[%s5651_s3 + $0x210] sm:$0xff] }
 0x252   : > { %2026 = vperm.xlu0 %3273, %v3760_v41  }
 0x253   : > { %3274 = vset.pattern.permute.xlu1 %v3368_v7 }
 0x254   : > { %1994 = vperm.xlu1 %3274, %v3560_v46   ;;  %v4051_v21 = vpop.permute.xlu0 %1062 }
 0x255   : > { %5794 = vst [vmem:[#allocation99_spill] sm:$0xff] %v4051_v21  ;;  %v4053_v20 = vpop.permute.xlu1 %718 }
 0x256   : > { %5795 = vst [vmem:[#allocation100_spill] sm:$0xff] %v4053_v20  ;;  %2034 = vperm.xlu0 %3273, %v3732_v63  }
 0x258   : > { %1998 = vperm.xlu1 %3274, %v3507_v26  }
 0x259   : > { %v4057_v13 = vpop.permute.xlu1 %798  ;;  %v4059_v61 = vpop.permute.xlu0 %1524 }
 0x25a   : > { %5796 = vst [vmem:[#allocation101_spill] sm:$0xff] %v4057_v13  ;;  %5797 = vst [vmem:[#allocation102_spill] sm:$0xff] %v4059_v61  ;;  %2042 = vperm.xlu0 %3273, %v3884_v30   ;;  %v609_v30 = vld [vmem:[%s5651_s3] sm:$0xff] }
 0x25c   : > { %2006 = vperm.xlu1 %3274, %v3600_v58  }
 0x25e   : > { %v4063_v40 = vpop.permute.xlu1 %1261  ;;  %2050 = vperm.xlu0 %3273, %v3856_v55   ;;  %v4066_v7 = vpop.permute.xlu0 %990 }
 0x25f   : > { %5798 = vst [vmem:[#allocation103_spill] sm:$0xff] %v4063_v40  ;;  %5799 = vst [vmem:[#allocation104_spill] sm:$0xff] %v4066_v7  ;;  %v2890_v7 = vld [vmem:[%s5651_s3 + $0x208] sm:$0xff] }
 0x260   : > { %2014 = vperm.xlu1 %3274, %v3581_v52  }
 0x262   : > { %v4069_v21 = vpop.permute.xlu1 %1325  ;;  %2058 = vperm.xlu0 %3273, %v3567_v48   ;;  %v4072_v20 = vpop.permute.xlu0 %1054 }
 0x263   : > { %5800 = vst [vmem:[#allocation105_spill] sm:$0xff] %v4069_v21  ;;  %5801 = vst [vmem:[#allocation106_spill] sm:$0xff] %v4072_v20  ;;  %v611_v20 = vld [vmem:[%s5651_s3 + $0x10] sm:$0xff] }
 0x264   : > { %2022 = vperm.xlu1 %3274, %v3698_v43  }
 0x266   : > { %2066 = vperm.xlu0 %3273, %v3548_v42  }
 0x267   : > { %v4076_v13 = vpop.permute.xlu1 %708  ;;  %v4078_v61 = vpop.permute.xlu0 %1516 }
 0x268   : > { %5802 = vst [vmem:[#allocation107_spill] sm:$0xff] %v4078_v61  ;;  %2030 = vperm.xlu1 %3274, %v3664_v19  }
 0x26a   : > { %2074 = vperm.xlu0 %3273, %v3644_v10   ;;  %v2875_v10 = vld [vmem:[%s5651_s3 + $0x190] sm:$0xff] }
 0x26b   : > { %v4082_v40 = vpop.permute.xlu1 %788  ;;  %v4084_v55 = vpop.permute.xlu0 %1556  ;;  %v1083_v63 = vmul.f32 %v2875_v10, %v3656_v14  ;;  %v2939_v10 = vld [vmem:[%s5651_s3 + $0x390] sm:$0xff]  ;;  %v2905_v14 = vld [vmem:[%s5651_s3 + $0x280] sm:$0xff] }
 0x26c   : > { %5803 = vst [vmem:[#allocation108_spill] sm:$0xff] %v4082_v40  ;;  %5804 = vst [vmem:[#allocation109_spill] sm:$0xff] %v4084_v55  ;;  %2038 = vperm.xlu1 %3274, %v3822_v18   ;;  %v627_v40 = vld [vmem:[%s5651_s3 + $0x90] sm:$0xff] }
 0x26d   : > { %v2859_v55 = vld [vmem:[%s5651_s3 + $0x110] sm:$0xff]  ;;  %v819_v61 = vmul.f32 %v3642_v9, %v627_v40  ;;  %v625_v40 = vld [vmem:[%s5651_s3 + $0x80] sm:$0xff] }
 0x26e   : > { %2082 = vperm.xlu0 %3273, %v3625_v2   ;;  %v803_v2 = vmul.f32 %v3640_v8, %v611_v20  ;;  %v1067_v20 = vmul.f32 %v2859_v55, %v3649_v11  ;;  %v2923_v9 = vld [vmem:[%s5651_s3 + $0x310] sm:$0xff]  ;;  %v2858_v11 = vld [vmem:[%s5651_s3 + $0x108] sm:$0xff] }
 0x26f   : > { %v4088_v21 = vpop.permute.xlu0 %1564 }
 0x270   : > { %5805 = vst [vmem:[#allocation110_spill] sm:$0xff] %v4088_v21  ;;  %2046 = vperm.xlu1 %3274, %v3788_v57   ;;  %v4094_v42 = vpop.permute.xlu1 %1253  ;;  %v2907_v21 = vld [vmem:[%s5651_s3 + $0x290] sm:$0xff]  ;;  %v4142_v55 = vsel %vm833_vm2, %v803_v2, 0.0  ;;  %v4158_v2 = vsel %vm833_vm2, %v819_v61, 0.0 }
 0x271   : > { %5806 = vst [vmem:[#allocation111_spill] sm:$0xff] %v4094_v42  ;;  %v2921_v42 = vld [vmem:[%s5651_s3 + $0x300] sm:$0xff] }
 0x272   : > { %2090 = vperm.xlu0 %3273, %v3771_v62   ;;  %v1346_v62 = vmul.f32 %v2907_v21, %v3651_v12  ;;  %v2922_v12 = vld [vmem:[%s5651_s3 + $0x308] sm:$0xff]  ;;  %v801_v21 = vmul.f32 %v3659_v17, %v609_v30  ;;  %v817_v17 = vmul.f32 %v3669_v23, %v625_v40  ;;  %v1066_v23 = vmul.f32 %v2858_v11, %v3764_v56  ;;  %v2860_v56 = vld [vmem:[%s5651_s3 + $0x118] sm:$0xff] }
 0x273   : > { %v4110_v48 = vpop.permute.xlu0 %1572  ;;  %v4184_v40 = vsel %vm833_vm2, %v1083_v63, 0.0 }
 0x274   : > { %5807 = vst [vmem:[#allocation112_spill] sm:$0xff] %v4110_v48  ;;  %2054 = vperm.xlu1 %3274, %v3524_v35   ;;  %v4120_v8 = vpop.permute.xlu1 %1317  ;;  %v2857_v48 = vld [vmem:[%s5651_s3 + $0x100] sm:$0xff]  ;;  %v4174_v61 = vsel %vm833_vm2, %v1346_v62, 0.0  ;;  %5812 = vst [vmem:[#allocation117_spill] sm:$0xff] %v4184_v40  ;;  %v1591_v62 = vmul.f32 %v2921_v42, %v3694_v39  ;;  %v4208_v11 = vsel %vm833_vm2, %v817_v17, 0.0 }
 0x275   : > { %5808 = vst [vmem:[#allocation113_spill] sm:$0xff] %v4120_v8  ;;  %v1330_v8 = vmul.f32 %v2891_v3, %v3667_v22  ;;  %v1593_v22 = vmul.f32 %v2923_v9, %v3676_v25  ;;  %v1065_v30 = vmul.f32 %v2857_v48, %v3678_v28  ;;  %v610_v3 = vld [vmem:[%s5651_s3 + $0x8] sm:$0xff]  ;;  %5810 = vst [vmem:[#allocation115_spill] sm:$0xff] %v4174_v61  ;;  %v2873_v48 = vld [vmem:[%s5651_s3 + $0x180] sm:$0xff] }
 0x276   : > { %2098 = vperm.xlu0 %3273, %v3743_v5   ;;  %v1592_v25 = vmul.f32 %v2922_v12, %v3783_v44  ;;  %v1609_v9 = vmul.f32 %v2939_v10, %v3683_v29  ;;  %v2889_v61 = vld [vmem:[%s5651_s3 + $0x200] sm:$0xff]  ;;  %v834_v44 = vsel %vm833_vm2, %v801_v21, 0.0  ;;  %v802_v42 = vmul.f32 %v3739_v4, %v610_v3  ;;  %v2876_v10 = vld [vmem:[%s5651_s3 + $0x198] sm:$0xff] }
 0x277   : > { %v4155_v5 = vpop.permute.xlu0 %1580  ;;  %v4198_v63 = vsel %vm833_vm2, %v1330_v8, 0.0  ;;  %v2937_v29 = vld [vmem:[%s5651_s3 + $0x380] sm:$0xff]  ;;  %v1626_v12 = vsel %vm833_vm2, %v1593_v22, 0.0  ;;  %v1097_v21 = vsel %vm833_vm2, %v1065_v30, 0.0  ;;  %v1081_v8 = vmul.f32 %v2873_v48, %v3690_v37  ;;  %v5816_v48 = vld [vmem:[#allocation10_spill] sm:$0xff] }
 0x278   : > { %5809 = vst [vmem:[#allocation114_spill] sm:$0xff] %v4155_v5  ;;  %2062 = vperm.xlu1 %3274, %v3509_v27   ;;  %v4171_v5 = vsel %vm833_vm2, %v1067_v20, 0.0  ;;  %v1344_v20 = vmul.f32 %v2905_v14, %v3685_v32  ;;  %v1329_v32 = vmul.f32 %v2890_v7, %v3758_v38  ;;  %v1328_v4 = vmul.f32 %v2889_v61, %v3701_v45  ;;  %v612_v7 = vld [vmem:[%s5651_s3 + $0x18] sm:$0xff]  ;;  %v613_v40 = vld [vmem:[%s5651_s3 + $0x20] sm:$0xff] }
 0x279   : > { %v4181_v28 = vpop.permute.xlu1 %1560  ;;  %v1068_v38 = vmul.f32 %v2860_v56, %v3705_v47  ;;  %v2924_v14 = vld [vmem:[%s5651_s3 + $0x318] sm:$0xff]  ;;  %v1098_v37 = vsel %vm833_vm2, %v1066_v23, 0.0  ;;  %v1624_v17 = vsel %vm833_vm2, %v1592_v25, 0.0  ;;  %v4230_v30 = vsel %vm833_vm2, %v1609_v9, 0.0 }
 0x27a   : > { %5811 = vst [vmem:[#allocation116_spill] sm:$0xff] %v4181_v28  ;;  %2106 = vperm.xlu0 %3273, %v3895_v31   ;;  %5815 = vst [vmem:[#allocation120_spill] sm:$0xff] %v4230_v30  ;;  %v4233_v45 = vsel %vm833_vm2, %v1344_v20, 0.0  ;;  %v1623_v47 = vsel %vm833_vm2, %v1591_v62, 0.0  ;;  %v1607_v3 = vmul.f32 %v2937_v29, %v3711_v50  ;;  %v628_v61 = vld [vmem:[%s5651_s3 + $0x98] sm:$0xff]  ;;  %v1084_v23 = vmul.f32 %v2876_v10, %v5816_v48  ;;  %v2861_v10 = vld [vmem:[%s5651_s3 + $0x120] sm:$0xff] }
 0x27b   : > { %v4205_v39 = vpop.permute.xlu0 %1588  ;;  %v2940_v25 = vld [vmem:[%s5651_s3 + $0x398] sm:$0xff]  ;;  %v835_v20 = vsel %vm833_vm2, %v802_v42, 0.0  ;;  %v1361_v50 = vsel %vm833_vm2, %v1329_v32, 0.0  ;;  %v1099_v31 = vadd.f32 %v1098_v37, %v1097_v21  ;;  %v2925_v48 = vld [vmem:[%s5651_s3 + $0x320] sm:$0xff]  ;;  %v4262_v42 = vsel %vm833_vm2, %v1081_v8, 0.0  ;;  %v2862_v8 = vld [vmem:[%s5651_s3 + $0x128] sm:$0xff] }
 0x27c   : > { %5813 = vst [vmem:[#allocation118_spill] sm:$0xff] %v4205_v39  ;;  %2070 = vperm.xlu1 %3274, %v3607_v60   ;;  %v2892_v9 = vld [vmem:[%s5651_s3 + $0x218] sm:$0xff]  ;;  %v1360_v32 = vsel %vm833_vm2, %v1328_v4, 0.0  ;;  %v1102_v21 = vsel %vm833_vm2, %v1068_v38, 0.0  ;;  %v836_v28 = vadd.f32 %v835_v20, %v834_v44  ;;  %v2926_v4 = vld [vmem:[%s5651_s3 + $0x328] sm:$0xff]  ;;  %v5686_v38 = vmov 7  }
 0x27d   : > { %v4227_v22 = vpop.permute.xlu1 %1568  ;;  %v5817_v62 = vld [vmem:[#allocation11_spill] sm:$0xff]  ;;  %v5818_v29 = vld [vmem:[#allocation12_spill] sm:$0xff]  ;;  %v1362_v30 = vadd.f32 %v1361_v50, %v1360_v32  ;;  %v4285_v44 = vsel %vm833_vm2, %v1084_v23, 0.0  ;;  %v614_v23 = vld [vmem:[%s5651_s3 + $0x28] sm:$0xff] }
 0x27e   : > { %5814 = vst [vmem:[#allocation119_spill] sm:$0xff] %v4227_v22  ;;  %2114 = vperm.xlu0 %3273, %v3867_v15   ;;  %v804_v56 = vmul.f32 %v5817_v62, %v612_v7  ;;  %v1594_v39 = vmul.f32 %v2924_v14, %v5818_v29  ;;  %v1625_v15 = vadd.f32 %v1624_v17, %v1623_v47  ;;  %v5819_v7 = vld [vmem:[#allocation13_spill] sm:$0xff]  ;;  %v5821_v17 = vld [vmem:[#allocation14_spill] sm:$0xff]  ;;  %v5822_v62 = vld [vmem:[#allocation16_spill] sm:$0xff] }
 0x27f   : > { %v820_v14 = vmul.f32 %v5819_v7, %v628_v61  ;;  %v1610_v47 = vmul.f32 %v2940_v25, %v5821_v17  ;;  %v1331_v29 = vmul.f32 %v2892_v9, %v5822_v62  ;;  %v4282_v61 = vsel %vm833_vm2, %v1607_v3, 0.0  ;;  %5824 = vst [vmem:[#allocation12_spill] sm:$0xff] %v4285_v44  ;;  %v5825_v25 = vld [vmem:[#allocation35_spill] sm:$0xff]  ;;  %v5826_v20 = vld [vmem:[#allocation40_spill] sm:$0xff] }
 0x280   : > { %2078 = vperm.xlu1 %3274, %v3587_v54   ;;  %v4259_v22 = vpop.permute.xlu0 %1731  ;;  %5823 = vst [vmem:[#allocation11_spill] sm:$0xff] %v4282_v61  ;;  %v1069_v9 = vmul.f32 %v2861_v10, %v5825_v25  ;;  %v1595_v50 = vmul.f32 %v2925_v48, %v5826_v20  ;;  %v839_v32 = vsel %vm833_vm2, %v804_v56, 0.0  ;;  %v1628_v7 = vsel %vm833_vm2, %v1594_v39, 0.0  ;;  %v615_v3 = vld [vmem:[%s5651_s3 + $0x30] sm:$0xff]  ;;  %v2893_v61 = vld [vmem:[%s5651_s3 + $0x220] sm:$0xff] }
 0x281   : > { %v4267_v37 = vpop.permute.xlu1 %1576  ;;  %v1101_v17 = vadd.f32 %v4171_v5, %v1099_v31  ;;  %v1627_v62 = vadd.f32 %v1626_v12, %v1625_v15  ;;  %v4303_v48 = vsel %vm833_vm2, %v820_v14, 0.0  ;;  %v2863_v5 = vld [vmem:[%s5651_s3 + $0x130] sm:$0xff]  ;;  %v5827_v15 = vld [vmem:[#allocation32_spill] sm:$0xff]  ;;  %v5828_v12 = vld [vmem:[#allocation49_spill] sm:$0xff]  ;;  %v1596_v25 = vmul.f32 %v2926_v4, %v3893_v59 }
 0x282   : > { %5820 = vst [vmem:[#allocation10_spill] sm:$0xff] %v4267_v37  ;;  %3277 = vset.pattern.permute.xlu0 %v5686_v38  ;;  %v2895_v31 = vld [vmem:[%s5651_s3 + $0x230] sm:$0xff]  ;;  %v805_v39 = vmul.f32 %v5827_v15, %v613_v40  ;;  %v1070_v56 = vmul.f32 %v2862_v8, %v5828_v12  ;;  %v4317_v38 = vsel %vm833_vm2, %v1610_v47, 0.0  ;;  %v1365_v14 = vsel %vm833_vm2, %v1331_v29, 0.0  ;;  %v5831_v40 = vld [vmem:[#allocation24_spill] sm:$0xff] }
 0x283   : > { %2520 = vperm.xlu0 %3277, %v3560_v46   ;;  %5830 = vst [vmem:[#allocation14_spill] sm:$0xff] %v4317_v38  ;;  %v838_v37 = vadd.f32 %v4142_v55, %v836_v28  ;;  %v1364_v44 = vadd.f32 %v4198_v63, %v1362_v30  ;;  %v807_v15 = vmul.f32 %v5831_v40, %v615_v3  ;;  %v2927_v59 = vld [vmem:[%s5651_s3 + $0x330] sm:$0xff]  ;;  %v1104_v8 = vsel %vm833_vm2, %v1069_v9, 0.0  ;;  %v5833_v63 = vld [vmem:[#allocation28_spill] sm:$0xff]  ;;  %v2894_v3 = vld [vmem:[%s5651_s3 + $0x228] sm:$0xff] }
 0x284   : > { %2086 = vperm.xlu1 %3274, %v3708_v49   ;;  %v4300_v10 = vpop.permute.xlu0 %1743  ;;  %v1630_v47 = vsel %vm833_vm2, %v1595_v50, 0.0  ;;  %v806_v29 = vmul.f32 %v3898_v53, %v614_v23  ;;  %v5832_v55 = vld [vmem:[#allocation27_spill] sm:$0xff]  ;;  %v1334_v30 = vmul.f32 %v2895_v31, %v5833_v63  ;;  %v1103_v4 = vadd.f32 %v1102_v21, %v1101_v17  ;;  %v2953_v53 = vld [vmem:[%s5651_s3 + $0x400] sm:$0xff]  ;;  %v2954_v63 = vld [vmem:[%s5651_s3 + $0x408] sm:$0xff] }
 0x285   : > { %v4314_v20 = vpop.permute.xlu1 %1584  ;;  %v1071_v28 = vmul.f32 %v2863_v5, %v5832_v55  ;;  %v1629_v12 = vadd.f32 %v1628_v7, %v1627_v62  ;;  %v841_v9 = vsel %vm833_vm2, %v805_v39, 0.0  ;;  %v5834_v50 = vld [vmem:[#allocation36_spill] sm:$0xff]  ;;  %v1106_v5 = vsel %vm833_vm2, %v1070_v56, 0.0  ;;  %v5835_v7 = vld [vmem:[#allocation31_spill] sm:$0xff] }
 0x286   : > { %5829 = vst [vmem:[#allocation13_spill] sm:$0xff] %v4314_v20  ;;  %v1332_v23 = vmul.f32 %v2893_v61, %v5834_v50  ;;  %v1632_v21 = vsel %vm833_vm2, %v1596_v25, 0.0  ;;  %v1597_v17 = vmul.f32 %v2927_v59, %v5835_v7  ;;  %v840_v62 = vadd.f32 %v839_v32, %v838_v37  ;;  %v2864_v39 = vld [vmem:[%s5651_s3 + $0x138] sm:$0xff]  ;;  %v5837_v50 = vld [vmem:[#allocation45_spill] sm:$0xff]  ;;  %v5838_v7 = vld [vmem:[#allocation46_spill] sm:$0xff] }
 0x287   : > { %2532 = vperm.xlu0 %3277, %v3600_v58   ;;  %v1105_v31 = vadd.f32 %v1104_v8, %v1103_v4  ;;  %v1631_v55 = vadd.f32 %v1630_v47, %v1629_v12  ;;  %v1366_v38 = vadd.f32 %v1365_v14, %v1364_v44  ;;  %v616_v61 = vld [vmem:[%s5651_s3 + $0x38] sm:$0xff]  ;;  %v843_v56 = vsel %vm833_vm2, %v806_v29, 0.0 }
 0x288   : > { %2094 = vperm.xlu1 %3274, %v3673_v24   ;;  %v4339_v40 = vpop.permute.xlu0 %1751  ;;  %v1333_v37 = vmul.f32 %v2894_v3, %v3912_v51  ;;  %v845_v25 = vsel %vm833_vm2, %v807_v15, 0.0  ;;  %v842_v59 = vadd.f32 %v841_v9, %v840_v62  ;;  %v2928_v44 = vld [vmem:[%s5651_s3 + $0x338] sm:$0xff]  ;;  %v2955_v51 = vld [vmem:[%s5651_s3 + $0x410] sm:$0xff]  ;;  %v1371_v29 = vsel %vm833_vm2, %v1334_v30, 0.0 }
 0x289   : > { %v1107_v14 = vadd.f32 %v1106_v5, %v1105_v31  ;;  %v1633_v8 = vadd.f32 %v1632_v21, %v1631_v55  ;;  %v1367_v15 = vsel %vm833_vm2, %v1332_v23, 0.0  ;;  %v2896_v4 = vld [vmem:[%s5651_s3 + $0x238] sm:$0xff]  ;;  %v1855_v12 = vmul.f32 %v2954_v63, %v4259_v22  ;;  %v5839_v63 = vld [vmem:[#allocation50_spill] sm:$0xff] }
 0x28a   : > { %v1728_v20 = vpop.permute.xlu1 %1727  ;;  %v1634_v3 = vsel %vm833_vm2, %v1597_v17, 0.0  ;;  %v808_v5 = vmul.f32 %v5837_v50, %v616_v61  ;;  %v844_v21 = vadd.f32 %v843_v56, %v842_v59  ;;  %v1598_v23 = vmul.f32 %v2928_v44, %v5838_v7  ;;  %v2957_v56 = vld [vmem:[%s5651_s3 + $0x420] sm:$0xff]  ;;  %v2959_v7 = vld [vmem:[%s5651_s3 + $0x430] sm:$0xff] }
 0x28b   : > { %v1854_v32 = vmul.f32 %v2953_v53, %v1728_v20  ;;  %2540 = vperm.xlu0 %3277, %v3581_v52   ;;  %v1108_v20 = vsel %vm833_vm2, %v1071_v28, 0.0  ;;  %v5836_v53 = vld [vmem:[#allocation41_spill] sm:$0xff]  ;;  %v619_v28 = vld [vmem:[%s5651_s3 + $0x50] sm:$0xff]  ;;  %v1369_v62 = vsel %vm833_vm2, %v1333_v37, 0.0  ;;  %v1368_v22 = vadd.f32 %v1367_v15, %v1366_v38  ;;  %v2956_v37 = vld [vmem:[%s5651_s3 + $0x418] sm:$0xff] }
 0x28c   : > { %2102 = vperm.xlu1 %3274, %v3832_v34   ;;  %v4366_v47 = vpop.permute.xlu0 %1759  ;;  %v1072_v9 = vmul.f32 %v2864_v39, %v5836_v53  ;;  %v1109_v17 = vadd.f32 %v1108_v20, %v1107_v14  ;;  %v1335_v39 = vmul.f32 %v2896_v4, %v5839_v63  ;;  %v1635_v61 = vadd.f32 %v1634_v3, %v1633_v8  ;;  %v2899_v38 = vld [vmem:[%s5651_s3 + $0x250] sm:$0xff]  ;;  %v617_v15 = vld [vmem:[%s5651_s3 + $0x40] sm:$0xff] }
 0x28d   : > { %v1886_v31 = vsel %vm833_vm2, %v1854_v32, 0.0  ;;  %v811_v32 = vmul.f32 %v3909_v36, %v619_v28  ;;  %v1887_v44 = vsel %vm833_vm2, %v1855_v12, 0.0  ;;  %v1370_v20 = vadd.f32 %v1369_v62, %v1368_v22  ;;  %v2865_v12 = vld [vmem:[%s5651_s3 + $0x140] sm:$0xff]  ;;  %v5841_v22 = vld [vmem:[#allocation63_spill] sm:$0xff] }
 0x28e   : > { %v1736_v30 = vpop.permute.xlu1 %1735  ;;  %v1110_v8 = vsel %vm833_vm2, %v1072_v9, 0.0  ;;  %v1888_v4 = vadd.f32 %v1887_v44, %v1886_v31  ;;  %v847_v36 = vsel %vm833_vm2, %v808_v5, 0.0  ;;  %v1636_v53 = vsel %vm833_vm2, %v1598_v23, 0.0  ;;  %v5840_v9 = vld [vmem:[#allocation59_spill] sm:$0xff]  ;;  %v2958_v31 = vld [vmem:[%s5651_s3 + $0x428] sm:$0xff] }
 0x28f   : > { %v1856_v55 = vmul.f32 %v2955_v51, %v1736_v30  ;;  %2548 = vperm.xlu0 %3277, %v3698_v43   ;;  %v846_v51 = vadd.f32 %v845_v25, %v844_v21  ;;  %v1858_v50 = vmul.f32 %v2957_v56, %v4300_v10  ;;  %v1373_v25 = vsel %vm833_vm2, %v1335_v39, 0.0  ;;  %v2867_v30 = vld [vmem:[%s5651_s3 + $0x150] sm:$0xff]  ;;  %v2897_v39 = vld [vmem:[%s5651_s3 + $0x240] sm:$0xff] }
 0x290   : > { %2110 = vperm.xlu1 %3274, %v3793_v1   ;;  %v4393_v59 = vpop.permute.xlu0 %1767  ;;  %v1338_v21 = vmul.f32 %v2899_v38, %v5840_v9  ;;  %v1111_v5 = vadd.f32 %v1110_v8, %v1109_v17  ;;  %v5688_v62 = vmov 6   ;;  %v809_v63 = vmul.f32 %v5841_v22, %v617_v15  ;;  %v2931_v17 = vld [vmem:[%s5651_s3 + $0x350] sm:$0xff]  ;;  %v2866_v8 = vld [vmem:[%s5651_s3 + $0x148] sm:$0xff] }
 0x291   : > { %v1889_v14 = vsel %vm833_vm2, %v1856_v55, 0.0  ;;  %v4430_v55 = vsel %vm833_vm2, %v811_v32, 0.0  ;;  %v4439_v56 = vadd.f32 %v1636_v53, %v1635_v61  ;;  %v1372_v38 = vadd.f32 %v1371_v29, %v1370_v20  ;;  %v5842_v32 = vld [vmem:[#allocation66_spill] sm:$0xff]  ;;  %v5843_v61 = vld [vmem:[#allocation60_spill] sm:$0xff]  ;;  %v5851_v1 = vld [vmem:[#allocation71_spill] sm:$0xff] }
 0x292   : > { %v1740_v3 = vpop.permute.xlu1 %1739  ;;  %v1890_v23 = vadd.f32 %v1889_v14, %v1888_v4  ;;  %v848_v44 = vadd.f32 %v847_v36, %v846_v51  ;;  %v1073_v14 = vmul.f32 %v2865_v12, %v5842_v32  ;;  %v618_v15 = vld [vmem:[%s5651_s3 + $0x48] sm:$0xff]  ;;  %v1075_v53 = vmul.f32 %v2867_v30, %v5843_v61  ;;  %v5844_v12 = vld [vmem:[#allocation64_spill] sm:$0xff] }
 0x293   : > { %v1857_v28 = vmul.f32 %v2956_v37, %v1740_v3  ;;  %2556 = vperm.xlu0 %3277, %v3664_v19   ;;  %v1893_v29 = vsel %vm833_vm2, %v1858_v50, 0.0  ;;  %v1860_v51 = vmul.f32 %v2959_v7, %v4339_v40  ;;  %v4458_v36 = vsel %vm833_vm2, %v1338_v21, 0.0  ;;  %v2961_v30 = vld [vmem:[%s5651_s3 + $0x440] sm:$0xff]  ;;  %v2960_v40 = vld [vmem:[%s5651_s3 + $0x438] sm:$0xff] }
 0x294   : > { %3275 = vset.pattern.permute.xlu1 %v5688_v62  ;;  %v4424_v10 = vpop.permute.xlu0 %1775  ;;  %v1601_v9 = vmul.f32 %v2931_v17, %v5844_v12  ;;  %v849_v50 = vsel %vm833_vm2, %v809_v63, 0.0  ;;  %v1074_v21 = vmul.f32 %v2866_v8, %v3978_v16  ;;  %v5846_v7 = vld [vmem:[#allocation79_spill] sm:$0xff]  ;;  %v2930_v63 = vld [vmem:[%s5651_s3 + $0x348] sm:$0xff] }
 0x295   : > { %v1891_v37 = vsel %vm833_vm2, %v1857_v28, 0.0  ;;  %2253 = vperm.xlu1 %3275, %v3518_v33   ;;  %v2929_v28 = vld [vmem:[%s5651_s3 + $0x340] sm:$0xff]  ;;  %v2898_v16 = vld [vmem:[%s5651_s3 + $0x248] sm:$0xff]  ;;  %v1897_v8 = vsel %vm833_vm2, %v1860_v51, 0.0 }
 0x296   : > { %v1892_v4 = vadd.f32 %v1891_v37, %v1890_v23  ;;  %v1748_v3 = vpop.permute.xlu1 %1747  ;;  %v5845_v23 = vld [vmem:[#allocation67_spill] sm:$0xff] }
 0x297   : > { %v1859_v20 = vmul.f32 %v2958_v31, %v1748_v3  ;;  %2564 = vperm.xlu0 %3277, %v3822_v18   ;;  %v1336_v22 = vmul.f32 %v2897_v39, %v5845_v23  ;;  %v810_v31 = vmul.f32 %v5846_v7, %v618_v15  ;;  %v1112_v39 = vsel %vm833_vm2, %v1073_v14, 0.0  ;;  %v620_v7 = vld [vmem:[%s5651_s3 + $0x58] sm:$0xff] }
 0x298   : > { %v1894_v37 = vadd.f32 %v1893_v29, %v1892_v4  ;;  %v4465_v32 = vpop.permute.xlu0 %1783  ;;  %v1374_v3 = vadd.f32 %v1373_v25, %v1372_v38  ;;  %v5847_v4 = vld [vmem:[#allocation70_spill] sm:$0xff]  ;;  %v1116_v23 = vsel %vm833_vm2, %v1075_v53, 0.0  ;;  %v1862_v15 = vmul.f32 %v2961_v30, %v4366_v47 }
 0x299   : > { %v1895_v17 = vsel %vm833_vm2, %v1859_v20, 0.0  ;;  %2261 = vperm.xlu1 %3275, %v3507_v26   ;;  %v1599_v61 = vmul.f32 %v2929_v28, %v5847_v4  ;;  %v850_v25 = vadd.f32 %v849_v50, %v848_v44  ;;  %v4488_v38 = vsel %vm833_vm2, %v1601_v9, 0.0  ;;  %v2963_v28 = vld [vmem:[%s5651_s3 + $0x450] sm:$0xff]  ;;  %v2962_v47 = vld [vmem:[%s5651_s3 + $0x448] sm:$0xff]  ;;  %v2868_v44 = vld [vmem:[%s5651_s3 + $0x158] sm:$0xff] }
 0x29a   : > { %v1896_v29 = vadd.f32 %v1895_v17, %v1894_v37  ;;  %v1756_v12 = vpop.permute.xlu1 %1755  ;;  %v1375_v53 = vsel %vm833_vm2, %v1336_v22, 0.0  ;;  %v1113_v51 = vadd.f32 %v1112_v39, %v1111_v5  ;;  %v1114_v9 = vsel %vm833_vm2, %v1074_v21, 0.0  ;;  %v2932_v5 = vld [vmem:[%s5651_s3 + $0x358] sm:$0xff] }
 0x29b   : > { %v1861_v14 = vmul.f32 %v2960_v40, %v1756_v12  ;;  %2572 = vperm.xlu0 %3277, %v3788_v57   ;;  %v851_v22 = vsel %vm833_vm2, %v810_v31, 0.0  ;;  %v5848_v40 = vld [vmem:[#allocation5_spill] sm:$0xff]  ;;  %v1638_v50 = vsel %vm833_vm2, %v1599_v61, 0.0  ;;  %v5849_v17 = vld [vmem:[#allocation80_spill] sm:$0xff]  ;;  %v5850_v4 = vld [vmem:[#allocation83_spill] sm:$0xff]  ;;  %v1376_v12 = vadd.f32 %v1375_v53, %v1374_v3 }
 0x29c   : > { %v1898_v20 = vadd.f32 %v1897_v8, %v1896_v29  ;;  %v4494_v37 = vpop.permute.xlu0 %1791  ;;  %v1600_v39 = vmul.f32 %v2930_v63, %v5849_v17  ;;  %v1337_v21 = vmul.f32 %v2898_v16, %v5850_v4  ;;  %v2900_v8 = vld [vmem:[%s5651_s3 + $0x258] sm:$0xff]  ;;  %v1901_v61 = vsel %vm833_vm2, %v1862_v15, 0.0  ;;  %v621_v16 = vld [vmem:[%s5651_s3 + $0x60] sm:$0xff] }
 0x29d   : > { %v1899_v30 = vsel %vm833_vm2, %v1861_v14, 0.0  ;;  %2265 = vperm.xlu1 %3275, %v5848_v40   ;;  %v1864_v14 = vmul.f32 %v2963_v28, %v4393_v59  ;;  %v1076_v34 = vmul.f32 %v2868_v44, %v5851_v1  ;;  %v1115_v40 = vadd.f32 %v1114_v9, %v1113_v51  ;;  %v2965_v3 = vld [vmem:[%s5651_s3 + $0x460] sm:$0xff]  ;;  %v2964_v59 = vld [vmem:[%s5651_s3 + $0x458] sm:$0xff] }
 0x29e   : > { %v1900_v29 = vadd.f32 %v1899_v30, %v1898_v20  ;;  %v1764_v31 = vpop.permute.xlu1 %1763  ;;  %v852_v63 = vadd.f32 %v851_v22, %v850_v25  ;;  %v1639_v15 = vadd.f32 %v1638_v50, %v4439_v56  ;;  %v5852_v1 = vld [vmem:[#allocation73_spill] sm:$0xff]  ;;  %v5853_v25 = vld [vmem:[#allocation75_spill] sm:$0xff]  ;;  %v5854_v44 = vld [vmem:[#allocation76_spill] sm:$0xff]  ;;  %v1640_v22 = vsel %vm833_vm2, %v1600_v39, 0.0 }
 0x29f   : > { %v1863_v62 = vmul.f32 %v2962_v47, %v1764_v31  ;;  %2580 = vperm.xlu0 %3277, %v3524_v35   ;;  %v812_v28 = vmul.f32 %v5852_v1, %v620_v7  ;;  %v1602_v47 = vmul.f32 %v2932_v5, %v5853_v25  ;;  %v1339_v9 = vmul.f32 %v2900_v8, %v5854_v44  ;;  %v622_v56 = vld [vmem:[%s5651_s3 + $0x68] sm:$0xff]  ;;  %v2967_v8 = vld [vmem:[%s5651_s3 + $0x470] sm:$0xff] }
 0x2a0   : > { %v1902_v53 = vadd.f32 %v1901_v61, %v1900_v29  ;;  %v4528_v20 = vpop.permute.xlu0 %1799  ;;  %v1377_v30 = vsel %vm833_vm2, %v1337_v21, 0.0  ;;  %v5855_v29 = vld [vmem:[#allocation90_spill] sm:$0xff]  ;;  %v1905_v50 = vsel %vm833_vm2, %v1864_v14, 0.0  ;;  %v1118_v5 = vsel %vm833_vm2, %v1076_v34, 0.0 }
 0x2a1   : > { %v1903_v51 = vsel %vm833_vm2, %v1863_v62, 0.0  ;;  %2273 = vperm.xlu1 %3275, %v3634_v6   ;;  %v813_v31 = vmul.f32 %v5855_v29, %v621_v16  ;;  %v1866_v62 = vmul.f32 %v2965_v3, %v4424_v10  ;;  %v1117_v39 = vadd.f32 %v1116_v23, %v1115_v40  ;;  %v2966_v14 = vld [vmem:[%s5651_s3 + $0x468] sm:$0xff]  ;;  %v623_v34 = vld [vmem:[%s5651_s3 + $0x70] sm:$0xff] }
 0x2a2   : > { %v1904_v17 = vadd.f32 %v1903_v51, %v1902_v53  ;;  %v1772_v4 = vpop.permute.xlu1 %1771  ;;  %v854_v21 = vadd.f32 %v4430_v55, %v852_v63  ;;  %v855_v10 = vsel %vm833_vm2, %v812_v28, 0.0  ;;  %v1641_v3 = vadd.f32 %v1640_v22, %v1639_v15  ;;  %v2869_v53 = vld [vmem:[%s5651_s3 + $0x160] sm:$0xff]  ;;  %v5856_v44 = vld [vmem:[#allocation82_spill] sm:$0xff] }
 0x2a3   : > { %v1865_v7 = vmul.f32 %v2964_v59, %v1772_v4  ;;  %2588 = vperm.xlu0 %3277, %v3509_v27   ;;  %v1378_v23 = vadd.f32 %v1377_v30, %v1376_v12  ;;  %v4565_v40 = vsel %vm833_vm2, %v1602_v47, 0.0  ;;  %v1381_v63 = vsel %vm833_vm2, %v1339_v9, 0.0  ;;  %v2901_v12 = vld [vmem:[%s5651_s3 + $0x260] sm:$0xff] }
 0x2a4   : > { %v1906_v61 = vadd.f32 %v1905_v50, %v1904_v17  ;;  %v4553_v16 = vpop.permute.xlu0 %1807  ;;  %v814_v59 = vmul.f32 %v4076_v13, %v622_v56  ;;  %v857_v28 = vsel %vm833_vm2, %v813_v31, 0.0  ;;  %v1909_v25 = vsel %vm833_vm2, %v1866_v62, 0.0  ;;  %v2870_v13 = vld [vmem:[%s5651_s3 + $0x168] sm:$0xff]  ;;  %v2969_v17 = vld [vmem:[%s5651_s3 + $0x480] sm:$0xff]  ;;  %v2903_v50 = vld [vmem:[%s5651_s3 + $0x270] sm:$0xff] }
 0x2a5   : > { %v1907_v55 = vsel %vm833_vm2, %v1865_v7, 0.0  ;;  %2281 = vperm.xlu1 %3275, %v3618_v0   ;;  %v1868_v47 = vmul.f32 %v2967_v8, %v4465_v32  ;;  %v815_v9 = vmul.f32 %v5856_v44, %v623_v34  ;;  %v856_v22 = vadd.f32 %v855_v10, %v854_v21  ;;  %v2968_v32 = vld [vmem:[%s5651_s3 + $0x478] sm:$0xff]  ;;  %v5857_v62 = vld [vmem:[#allocation93_spill] sm:$0xff]  ;;  %v5858_v8 = vld [vmem:[#allocation94_spill] sm:$0xff] }
 0x2a6   : > { %v1908_v15 = vadd.f32 %v1907_v55, %v1906_v61  ;;  %v1780_v1 = vpop.permute.xlu1 %1779  ;;  %v1119_v30 = vadd.f32 %v1118_v5, %v1117_v39  ;;  %v1643_v31 = vadd.f32 %v4488_v38, %v1641_v3  ;;  %v1380_v56 = vadd.f32 %v4458_v36, %v1378_v23  ;;  %v2902_v5 = vld [vmem:[%s5651_s3 + $0x268] sm:$0xff]  ;;  %v2871_v10 = vld [vmem:[%s5651_s3 + $0x170] sm:$0xff]  ;;  %v2933_v3 = vld [vmem:[%s5651_s3 + $0x360] sm:$0xff] }
 0x2a7   : > { %v1867_v51 = vmul.f32 %v2966_v14, %v1780_v1  ;;  %2596 = vperm.xlu0 %3277, %v3607_v60   ;;  %v1077_v7 = vmul.f32 %v2869_v53, %v5857_v62  ;;  %v858_v21 = vadd.f32 %v857_v28, %v856_v22  ;;  %v1340_v61 = vmul.f32 %v2901_v12, %v5858_v8  ;;  %v5859_v34 = vld [vmem:[#allocation104_spill] sm:$0xff]  ;;  %v5860_v1 = vld [vmem:[#allocation86_spill] sm:$0xff]  ;;  %v5861_v12 = vld [vmem:[#allocation111_spill] sm:$0xff] }
 0x2a8   : > { %v1910_v4 = vadd.f32 %v1909_v25, %v1908_v15  ;;  %v4586_v29 = vpop.permute.xlu0 %1815  ;;  %v859_v38 = vsel %vm833_vm2, %v814_v59, 0.0  ;;  %v1078_v23 = vmul.f32 %v2870_v13, %v5859_v34  ;;  %v1913_v55 = vsel %vm833_vm2, %v1868_v47, 0.0  ;;  %v5865_v34 = vld [vmem:[#allocation100_spill] sm:$0xff] }
 0x2a9   : > { %v1911_v39 = vsel %vm833_vm2, %v1867_v51, 0.0  ;;  %2289 = vperm.xlu1 %3275, %v3760_v41   ;;  %v1870_v53 = vmul.f32 %v2969_v17, %v4494_v37  ;;  %v861_v59 = vsel %vm833_vm2, %v815_v9, 0.0  ;;  %v1342_v28 = vmul.f32 %v2903_v50, %v5860_v1  ;;  %v2971_v51 = vld [vmem:[%s5651_s3 + $0x490] sm:$0xff]  ;;  %v2970_v37 = vld [vmem:[%s5651_s3 + $0x488] sm:$0xff]  ;;  %v624_v9 = vld [vmem:[%s5651_s3 + $0x78] sm:$0xff] }
 0x2aa   : > { %v1912_v36 = vadd.f32 %v1911_v39, %v1910_v4  ;;  %v1788_v14 = vpop.permute.xlu1 %1787  ;;  %v1341_v25 = vmul.f32 %v2902_v5, %v5861_v12  ;;  %v1120_v47 = vsel %vm833_vm2, %v1077_v7, 0.0  ;;  %v1382_v13 = vadd.f32 %v1381_v63, %v1380_v56  ;;  %v5863_v50 = vld [vmem:[#allocation87_spill] sm:$0xff]  ;;  %v5864_v39 = vld [vmem:[#allocation97_spill] sm:$0xff] }
 0x2ab   : > { %v1869_v15 = vmul.f32 %v2968_v32, %v1788_v14  ;;  %2604 = vperm.xlu0 %3277, %v3587_v54   ;;  %v860_v17 = vadd.f32 %v859_v38, %v858_v21  ;;  %v5862_v32 = vld [vmem:[#allocation15_spill] sm:$0xff]  ;;  %v1079_v62 = vmul.f32 %v2871_v10, %v5863_v50  ;;  %v1383_v5 = vsel %vm833_vm2, %v1340_v61, 0.0  ;;  %v2934_v63 = vld [vmem:[%s5651_s3 + $0x368] sm:$0xff] }
 0x2ac   : > { %v1914_v44 = vadd.f32 %v1913_v55, %v1912_v36  ;;  %v4620_v22 = vpop.permute.xlu0 %1823  ;;  %v1603_v8 = vmul.f32 %v2933_v3, %v5864_v39  ;;  %v1122_v7 = vsel %vm833_vm2, %v1078_v23, 0.0  ;;  %v1917_v56 = vsel %vm833_vm2, %v1870_v53, 0.0  ;;  %v2973_v23 = vld [vmem:[%s5651_s3 + $0x4a0] sm:$0xff]  ;;  %v2972_v53 = vld [vmem:[%s5651_s3 + $0x498] sm:$0xff] }
 0x2ad   : > { %v1915_v4 = vsel %vm833_vm2, %v1869_v15, 0.0  ;;  %2297 = vperm.xlu1 %3275, %v5862_v32   ;;  %v1872_v21 = vmul.f32 %v2971_v51, %v4528_v20  ;;  %v1121_v10 = vadd.f32 %v1120_v47, %v1119_v30  ;;  %v816_v61 = vmul.f32 %v5865_v34, %v624_v9  ;;  %v5866_v51 = vld [vmem:[#allocation52_spill] sm:$0xff]  ;;  %v5867_v47 = vld [vmem:[#allocation107_spill] sm:$0xff] }
 0x2ae   : > { %v1916_v36 = vadd.f32 %v1915_v4, %v1914_v44  ;;  %v1796_v14 = vpop.permute.xlu1 %1795  ;;  %v1385_v3 = vsel %vm833_vm2, %v1341_v25, 0.0  ;;  %v1384_v20 = vadd.f32 %v1383_v5, %v1382_v13  ;;  %v1645_v1 = vadd.f32 %v4565_v40, %v1643_v31  ;;  %v2872_v44 = vld [vmem:[%s5651_s3 + $0x178] sm:$0xff] }
 0x2af   : > { %v1871_v38 = vmul.f32 %v2970_v37, %v1796_v14  ;;  %2612 = vperm.xlu0 %3277, %v3708_v49   ;;  %v862_v12 = vadd.f32 %v861_v59, %v860_v17  ;;  %v1646_v25 = vsel %vm833_vm2, %v1603_v8, 0.0  ;;  %v1123_v37 = vadd.f32 %v1122_v7, %v1121_v10  ;;  %v2904_v40 = vld [vmem:[%s5651_s3 + $0x278] sm:$0xff] }
 0x2b0   : > { %v1918_v55 = vadd.f32 %v1917_v56, %v1916_v36  ;;  %v4646_v15 = vpop.permute.xlu0 %1831  ;;  %v1604_v9 = vmul.f32 %v2934_v63, %v5867_v47  ;;  %v1386_v31 = vadd.f32 %v1385_v3, %v1384_v20  ;;  %v1921_v59 = vsel %vm833_vm2, %v1872_v21, 0.0  ;;  %v2975_v36 = vld [vmem:[%s5651_s3 + $0x4b0] sm:$0xff]  ;;  %v2908_v63 = vld [vmem:[%s5651_s3 + $0x298] sm:$0xff]  ;;  %v2874_v47 = vld [vmem:[%s5651_s3 + $0x188] sm:$0xff] }
 0x2b1   : > { %v1919_v30 = vsel %vm833_vm2, %v1871_v38, 0.0  ;;  %2305 = vperm.xlu1 %3275, %v5866_v51   ;;  %v1874_v13 = vmul.f32 %v2973_v23, %v4553_v16  ;;  %v1387_v5 = vsel %vm833_vm2, %v1342_v28, 0.0  ;;  %v1124_v39 = vsel %vm833_vm2, %v1079_v62, 0.0  ;;  %v2974_v16 = vld [vmem:[%s5651_s3 + $0x4a8] sm:$0xff]  ;;  %v2935_v62 = vld [vmem:[%s5651_s3 + $0x370] sm:$0xff] }
 0x2b2   : > { %v1920_v4 = vadd.f32 %v1919_v30, %v1918_v55  ;;  %v1804_v50 = vpop.permute.xlu1 %1803  ;;  %v863_v8 = vsel %vm833_vm2, %v816_v61, 0.0  ;;  %v626_v28 = vld [vmem:[%s5651_s3 + $0x88] sm:$0xff]  ;;  %v1647_v56 = vadd.f32 %v1646_v25, %v1645_v1  ;;  %v5869_v61 = vld [vmem:[#allocation44_spill] sm:$0xff]  ;;  %v5870_v3 = vld [vmem:[#allocation103_spill] sm:$0xff]  ;;  %v1125_v55 = vadd.f32 %v1124_v39, %v1123_v37 }
 0x2b3   : > { %v1873_v17 = vmul.f32 %v2972_v53, %v1804_v50  ;;  %2620 = vperm.xlu0 %3277, %v3673_v24   ;;  %v5868_v21 = vld [vmem:[#allocation98_spill] sm:$0xff]  ;;  %v864_v10 = vadd.f32 %v863_v8, %v862_v12  ;;  %v1343_v23 = vmul.f32 %v2904_v40, %v5870_v3  ;;  %v1648_v53 = vsel %vm833_vm2, %v1604_v9, 0.0  ;;  %v5873_v40 = vld [vmem:[#allocation20_spill] sm:$0xff] }
 0x2b4   : > { %v1922_v14 = vadd.f32 %v1921_v59, %v1920_v4  ;;  %v4671_v7 = vpop.permute.xlu0 %1839  ;;  %v1080_v38 = vmul.f32 %v2872_v44, %v5868_v21  ;;  %v1388_v4 = vadd.f32 %v1387_v5, %v1386_v31  ;;  %v1925_v1 = vsel %vm833_vm2, %v1874_v13, 0.0  ;;  %v5872_v50 = vld [vmem:[#allocation18_spill] sm:$0xff]  ;;  %v2977_v39 = vld [vmem:[%s5651_s3 + $0x4c0] sm:$0xff]  ;;  %v2936_v5 = vld [vmem:[%s5651_s3 + $0x378] sm:$0xff] }
 0x2b5   : > { %v1923_v34 = vsel %vm833_vm2, %v1873_v17, 0.0  ;;  %2313 = vperm.xlu1 %3275, %v5869_v61   ;;  %v1876_v12 = vmul.f32 %v2975_v36, %v4586_v29  ;;  %v5871_v44 = vmov 6   ;;  %v1347_v59 = vmul.f32 %v2908_v63, %v5872_v50  ;;  %v5874_v17 = vld [vmem:[#allocation91_spill] sm:$0xff] }
 0x2b6   : > { %v1924_v20 = vadd.f32 %v1923_v34, %v1922_v14  ;;  %v1812_v30 = vpop.permute.xlu1 %1811  ;;  %v818_v37 = vmul.f32 %v5873_v40, %v626_v28  ;;  %v1605_v9 = vmul.f32 %v2935_v62, %v5874_v17  ;;  %v2976_v29 = vld [vmem:[%s5651_s3 + $0x4b8] sm:$0xff]  ;;  %v1126_v13 = vsel %vm833_vm2, %v1080_v38, 0.0  ;;  %v2906_v38 = vld [vmem:[%s5651_s3 + $0x288] sm:$0xff] }
 0x2b7   : > { %v1875_v25 = vmul.f32 %v2974_v16, %v1812_v30  ;;  %3278 = vset.pattern.permute.xlu0 %v5871_v44  ;;  %v866_v36 = vadd.f32 %v4208_v11, %v864_v10  ;;  %v1649_v14 = vadd.f32 %v1648_v53, %v1647_v56  ;;  %v5875_v63 = vld [vmem:[#allocation7_spill] sm:$0xff]  ;;  %v1389_v62 = vsel %vm833_vm2, %v1343_v23, 0.0 }
 0x2b8   : > { %v1926_v8 = vadd.f32 %v1925_v1, %v1924_v20  ;;  %2257 = vperm.xlu0 %3278, %v3560_v46   ;;  %v4703_v31 = vpop.permute.xlu0 %1847  ;;  %v5876_v46 = vld [vmem:[#allocation19_spill] sm:$0xff]  ;;  %v1127_v21 = vadd.f32 %v1126_v13, %v1125_v55  ;;  %v1390_v20 = vadd.f32 %v1389_v62, %v1388_v4  ;;  %v1929_v30 = vsel %vm833_vm2, %v1876_v12, 0.0  ;;  %v2978_v4 = vld [vmem:[%s5651_s3 + $0x4c8] sm:$0xff] }
 0x2b9   : > { %v1927_v16 = vsel %vm833_vm2, %v1875_v25, 0.0  ;;  %2321 = vperm.xlu1 %3275, %v5875_v63   ;;  %v1082_v28 = vmul.f32 %v2874_v47, %v5876_v46  ;;  %v1878_v11 = vmul.f32 %v2977_v39, %v4620_v22  ;;  %v867_v10 = vsel %vm833_vm2, %v818_v37, 0.0  ;;  %v5877_v47 = vld [vmem:[#allocation102_spill] sm:$0xff]  ;;  %v5880_v62 = vld [vmem:[#allocation21_spill] sm:$0xff] }
 0x2ba   : > { %v1928_v34 = vadd.f32 %v1927_v16, %v1926_v8  ;;  %v1820_v3 = vpop.permute.xlu1 %1819  ;;  %v1650_v53 = vsel %vm833_vm2, %v1605_v9, 0.0  ;;  %v1606_v1 = vmul.f32 %v2936_v5, %v5877_v47  ;;  %v2979_v23 = vld [vmem:[%s5651_s3 + $0x4d0] sm:$0xff]  ;;  %v4733_v22 = vsel %vm833_vm2, %v1347_v59, 0.0  ;;  %v2938_v12 = vld [vmem:[%s5651_s3 + $0x388] sm:$0xff] }
 0x2bb   : > { %v1877_v56 = vmul.f32 %v2976_v29, %v1820_v3  ;;  %v631_v25 = vld [vmem:[%s5651_s3 + $0xb0] sm:$0xff]  ;;  %v868_v50 = vadd.f32 %v867_v10, %v866_v36  ;;  %v1651_v40 = vadd.f32 %v1650_v53, %v1649_v14  ;;  %v1130_v9 = vsel %vm833_vm2, %v1082_v28, 0.0  ;;  %v5881_v3 = vld [vmem:[#allocation25_spill] sm:$0xff] }
 0x2bc   : > { %v1930_v55 = vadd.f32 %v1929_v30, %v1928_v34  ;;  %2269 = vperm.xlu0 %3278, %v3600_v58   ;;  %v5878_v58 = vld [vmem:[#allocation6_spill] sm:$0xff]  ;;  %v5879_v59 = vld [vmem:[#allocation23_spill] sm:$0xff]  ;;  %v1129_v29 = vadd.f32 %v4262_v42, %v1127_v21  ;;  %v1392_v14 = vadd.f32 %v4233_v45, %v1390_v20  ;;  %v1933_v16 = vsel %vm833_vm2, %v1878_v11, 0.0  ;;  %v2981_v42 = vld [vmem:[%s5651_s3 + $0x4e0] sm:$0xff] }
 0x2bd   : > { %v1931_v37 = vsel %vm833_vm2, %v1877_v56, 0.0  ;;  %2329 = vperm.xlu1 %3275, %v5878_v58   ;;  %v4743_v17 = vpop.permute.xlu0 %1990  ;;  %v1345_v39 = vmul.f32 %v2906_v38, %v5879_v59  ;;  %v2879_v8 = vld [vmem:[%s5651_s3 + $0x1b0] sm:$0xff]  ;;  %v1880_v46 = vmul.f32 %v2979_v23, %v4646_v15  ;;  %v1608_v34 = vmul.f32 %v2938_v12, %v5880_v62  ;;  %v2980_v45 = vld [vmem:[%s5651_s3 + $0x4d8] sm:$0xff]  ;;  %v5882_v20 = vld [vmem:[#allocation29_spill] sm:$0xff] }
 0x2be   : > { %v1932_v13 = vadd.f32 %v1931_v37, %v1930_v55  ;;  %v1828_v5 = vpop.permute.xlu1 %1827  ;;  %v2911_v36 = vld [vmem:[%s5651_s3 + $0x2b0] sm:$0xff]  ;;  %v823_v38 = vmul.f32 %v5881_v3, %v631_v25  ;;  %v1652_v30 = vsel %vm833_vm2, %v1606_v1, 0.0  ;;  %v1087_v15 = vmul.f32 %v2879_v8, %v5882_v20  ;;  %v629_v11 = vld [vmem:[%s5651_s3 + $0xa0] sm:$0xff] }
 0x2bf   : > { %v1879_v28 = vmul.f32 %v2978_v4, %v1828_v5  ;;  %v870_v56 = vadd.f32 %v4158_v2, %v868_v50  ;;  %v1653_v10 = vadd.f32 %v1652_v30, %v1651_v40  ;;  %v5883_v47 = vld [vmem:[#allocation9_spill] sm:$0xff]  ;;  %v5884_v23 = vld [vmem:[#allocation30_spill] sm:$0xff]  ;;  %v1131_v4 = vadd.f32 %v1130_v9, %v1129_v29 }
 0x2c0   : > { %v1934_v21 = vadd.f32 %v1933_v16, %v1932_v13  ;;  %2277 = vperm.xlu0 %3278, %v3581_v52   ;;  %v1393_v52 = vsel %vm833_vm2, %v1345_v39, 0.0  ;;  %v1350_v55 = vmul.f32 %v2911_v36, %v5884_v23  ;;  %v2943_v37 = vld [vmem:[%s5651_s3 + $0x3b0] sm:$0xff]  ;;  %v1937_v2 = vsel %vm833_vm2, %v1880_v46, 0.0  ;;  %v2982_v36 = vld [vmem:[%s5651_s3 + $0x4e8] sm:$0xff] }
 0x2c1   : > { %v1935_v53 = vsel %vm833_vm2, %v1879_v28, 0.0  ;;  %2337 = vperm.xlu1 %3275, %v5883_v47   ;;  %v4774_v1 = vpop.permute.xlu0 %2002  ;;  %v1394_v59 = vadd.f32 %v1393_v52, %v1392_v14  ;;  %v1882_v50 = vmul.f32 %v2981_v42, %v4671_v7  ;;  %v1656_v8 = vsel %vm833_vm2, %v1608_v34, 0.0  ;;  %v5885_v39 = vld [vmem:[#allocation34_spill] sm:$0xff]  ;;  %v2877_v14 = vld [vmem:[%s5651_s3 + $0x1a0] sm:$0xff]  ;;  %v5886_v28 = vld [vmem:[#allocation11_spill] sm:$0xff] }
 0x2c2   : > { %v1936_v12 = vadd.f32 %v1935_v53, %v1934_v21  ;;  %v1836_v25 = vpop.permute.xlu1 %1835  ;;  %v4785_v13 = vsel %vm833_vm2, %v823_v38, 0.0  ;;  %v821_v5 = vmul.f32 %v5885_v39, %v629_v11  ;;  %v2983_v9 = vld [vmem:[%s5651_s3 + $0x4f0] sm:$0xff]  ;;  %v4796_v7 = vsel %vm833_vm2, %v1087_v15, 0.0  ;;  %v630_v16 = vld [vmem:[%s5651_s3 + $0xa8] sm:$0xff]  ;;  %v5887_v34 = vld [vmem:[#allocation8_spill] sm:$0xff] }
 0x2c3   : > { %v1881_v40 = vmul.f32 %v2980_v45, %v1836_v25  ;;  %v872_v46 = vadd.f32 %v4303_v48, %v870_v56  ;;  %v1655_v62 = vadd.f32 %v5886_v28, %v1653_v10  ;;  %v4811_v38 = vsel %vm833_vm2, %v1350_v55, 0.0  ;;  %v5888_v30 = vld [vmem:[#allocation33_spill] sm:$0xff]  ;;  %v2880_v56 = vld [vmem:[%s5651_s3 + $0x1b8] sm:$0xff] }
 0x2c4   : > { %v1938_v29 = vadd.f32 %v1937_v2, %v1936_v12  ;;  %2285 = vperm.xlu0 %3278, %v3698_v43   ;;  %v1613_v42 = vmul.f32 %v2943_v37, %v5888_v30  ;;  %v2909_v21 = vld [vmem:[%s5651_s3 + $0x2a0] sm:$0xff]  ;;  %v5890_v10 = vld [vmem:[#allocation115_spill] sm:$0xff]  ;;  %v1941_v52 = vsel %vm833_vm2, %v1882_v50, 0.0  ;;  %v1884_v23 = vmul.f32 %v2983_v9, %v4703_v31  ;;  %v2878_v31 = vld [vmem:[%s5651_s3 + $0x1a8] sm:$0xff] }
 0x2c5   : > { %v1939_v43 = vsel %vm833_vm2, %v1881_v40, 0.0  ;;  %2345 = vperm.xlu1 %3275, %v5887_v34   ;;  %v4808_v3 = vpop.permute.xlu0 %2010  ;;  %v5889_v45 = vld [vmem:[#allocation117_spill] sm:$0xff]  ;;  %v1396_v53 = vadd.f32 %v5890_v10, %v1394_v59  ;;  %v873_v12 = vsel %vm833_vm2, %v821_v5, 0.0  ;;  %v632_v37 = vld [vmem:[%s5651_s3 + $0xb8] sm:$0xff]  ;;  %v1657_v9 = vadd.f32 %v1656_v8, %v1655_v62 }
 0x2c6   : > { %v1133_v20 = vadd.f32 %v5889_v45, %v1131_v4  ;;  %v1940_v48 = vadd.f32 %v1939_v43, %v1938_v29  ;;  %v1844_v15 = vpop.permute.xlu1 %1843  ;;  %v2941_v11 = vld [vmem:[%s5651_s3 + $0x3a0] sm:$0xff]  ;;  %v5891_v4 = vld [vmem:[#allocation38_spill] sm:$0xff]  ;;  %v5893_v29 = vld [vmem:[#allocation39_spill] sm:$0xff]  ;;  %v874_v50 = vadd.f32 %v873_v12, %v872_v46  ;;  %v4843_v28 = vsel %vm833_vm2, %v1613_v42, 0.0 }
 0x2c7   : > { %v1883_v55 = vmul.f32 %v2982_v36, %v1844_v15  ;;  %v1085_v25 = vmul.f32 %v2877_v14, %v5891_v4  ;;  %v5892_v2 = vld [vmem:[#allocation56_spill] sm:$0xff]  ;;  %v1348_v59 = vmul.f32 %v2909_v21, %v5893_v29  ;;  %v5894_v36 = vld [vmem:[#allocation22_spill] sm:$0xff]  ;;  %v1945_v10 = vsel %vm833_vm2, %v1884_v23, 0.0 }
 0x2c8   : > { %v822_v40 = vmul.f32 %v5892_v2, %v630_v16  ;;  %v1942_v39 = vadd.f32 %v1941_v52, %v1940_v48  ;;  %2293 = vperm.xlu0 %3278, %v3664_v19   ;;  %v5895_v16 = vld [vmem:[#allocation42_spill] sm:$0xff]  ;;  %v5896_v19 = vld [vmem:[#allocation43_spill] sm:$0xff]  ;;  %v5897_v8 = vld [vmem:[#allocation48_spill] sm:$0xff] }
 0x2c9   : > { %v1943_v5 = vsel %vm833_vm2, %v1883_v55, 0.0  ;;  %2353 = vperm.xlu1 %3275, %v5894_v36   ;;  %v4840_v14 = vpop.permute.xlu0 %2018  ;;  %v1611_v43 = vmul.f32 %v2941_v11, %v5895_v16  ;;  %v1088_v30 = vmul.f32 %v2880_v56, %v5896_v19  ;;  %v2912_v21 = vld [vmem:[%s5651_s3 + $0x2b8] sm:$0xff]  ;;  %v824_v62 = vmul.f32 %v5897_v8, %v632_v37  ;;  %v2942_v48 = vld [vmem:[%s5651_s3 + $0x3a8] sm:$0xff]  ;;  %v635_v37 = vld [vmem:[%s5651_s3 + $0xd0] sm:$0xff] }
 0x2ca   : > { %v1944_v45 = vadd.f32 %v1943_v5, %v1942_v39  ;;  %v4850_v46 = vpop.permute.xlu1 %1851  ;;  %v2910_v42 = vld [vmem:[%s5651_s3 + $0x2a8] sm:$0xff]  ;;  %v5898_v15 = vld [vmem:[#allocation12_spill] sm:$0xff]  ;;  %v1398_v56 = vadd.f32 %v4733_v22, %v1396_v53  ;;  %v1136_v52 = vsel %vm833_vm2, %v1085_v25, 0.0  ;;  %v5899_v55 = vld [vmem:[#allocation51_spill] sm:$0xff]  ;;  %v875_v4 = vsel %vm833_vm2, %v822_v40, 0.0 }
 0x2cb   : > { %v1135_v11 = vadd.f32 %v5898_v15, %v1133_v20  ;;  %v1086_v12 = vmul.f32 %v2878_v31, %v5899_v55  ;;  %v1399_v20 = vsel %vm833_vm2, %v1348_v59, 0.0  ;;  %v5900_v39 = vld [vmem:[#allocation53_spill] sm:$0xff]  ;;  %v2915_v53 = vld [vmem:[%s5651_s3 + $0x2d0] sm:$0xff]  ;;  %v876_v23 = vadd.f32 %v875_v4, %v874_v50  ;;  %v5901_v25 = vld [vmem:[#allocation120_spill] sm:$0xff] }
 0x2cc   : > { %v4868_v2 = vadd.f32 %v1945_v10, %v1944_v45  ;;  %2301 = vperm.xlu0 %3278, %v3822_v18   ;;  %v1351_v22 = vmul.f32 %v2912_v21, %v5900_v39  ;;  %v1659_v29 = vadd.f32 %v5901_v25, %v1657_v9  ;;  %v2985_v40 = vld [vmem:[%s5651_s3 + $0x500] sm:$0xff]  ;;  %v2986_v18 = vld [vmem:[%s5651_s3 + $0x508] sm:$0xff]  ;;  %v1662_v59 = vsel %vm833_vm2, %v1611_v43, 0.0  ;;  %v5903_v50 = vld [vmem:[#allocation55_spill] sm:$0xff] }
 0x2cd   : > { %v5902_v31 = vld [vmem:[#allocation17_spill] sm:$0xff]  ;;  %v4881_v5 = vpop.permute.xlu0 %2026  ;;  %v4888_v16 = vsel %vm833_vm2, %v1088_v30, 0.0  ;;  %v1612_v19 = vmul.f32 %v2942_v48, %v5903_v50  ;;  %v5904_v9 = vld [vmem:[#allocation58_spill] sm:$0xff]  ;;  %v879_v8 = vsel %vm833_vm2, %v824_v62, 0.0  ;;  %v1137_v43 = vadd.f32 %v1136_v52, %v1135_v11 }
 0x2ce   : > { %2361 = vperm.xlu1 %3275, %v5902_v31   ;;  %v1349_v21 = vmul.f32 %v2910_v42, %v5904_v9  ;;  %v2883_v45 = vld [vmem:[%s5651_s3 + $0x1d0] sm:$0xff]  ;;  %v5905_v15 = vld [vmem:[#allocation57_spill] sm:$0xff]  ;;  %v1400_v4 = vadd.f32 %v1399_v20, %v1398_v56  ;;  %v1138_v39 = vsel %vm833_vm2, %v1086_v12, 0.0  ;;  %v2117_v50 = vmul.f32 %v2985_v40, %v4743_v17  ;;  %v2988_v20 = vld [vmem:[%s5651_s3 + $0x518] sm:$0xff] }
 0x2cf   : > { %v827_v10 = vmul.f32 %v5905_v15, %v635_v37  ;;  %v633_v55 = vld [vmem:[%s5651_s3 + $0xc0] sm:$0xff]  ;;  %v1995_v30 = vpop.permute.xlu1 %1994  ;;  %v4908_v37 = vsel %vm833_vm2, %v1351_v22, 0.0  ;;  %v5907_v9 = vld [vmem:[#allocation62_spill] sm:$0xff]  ;;  %v878_v56 = vadd.f32 %v4785_v13, %v876_v23  ;;  %v1664_v17 = vsel %vm833_vm2, %v1612_v19, 0.0  ;;  %v2884_v19 = vld [vmem:[%s5651_s3 + $0x1d8] sm:$0xff] }
 0x2d0   : > { %v5906_v48 = vld [vmem:[#allocation61_spill] sm:$0xff]  ;;  %v2118_v62 = vmul.f32 %v2986_v18, %v1995_v30  ;;  %2309 = vperm.xlu0 %3278, %v3788_v57   ;;  %v1091_v11 = vmul.f32 %v2883_v45, %v5907_v9  ;;  %v5908_v52 = vld [vmem:[#allocation14_spill] sm:$0xff]  ;;  %v1401_v22 = vsel %vm833_vm2, %v1349_v21, 0.0  ;;  %v5911_v18 = vld [vmem:[#allocation68_spill] sm:$0xff]  ;;  %v1139_v21 = vadd.f32 %v1138_v39, %v1137_v43 }
 0x2d1   : > { %v1354_v25 = vmul.f32 %v2915_v53, %v5906_v48  ;;  %v2881_v42 = vld [vmem:[%s5651_s3 + $0x1c0] sm:$0xff]  ;;  %v1661_v12 = vadd.f32 %v5908_v52, %v1659_v29  ;;  %v5909_v53 = vmov 7   ;;  %v4917_v15 = vpop.permute.xlu0 %2034  ;;  %v2987_v57 = vld [vmem:[%s5651_s3 + $0x510] sm:$0xff]  ;;  %v4928_v29 = vsel %vm833_vm2, %v827_v10, 0.0  ;;  %v634_v52 = vld [vmem:[%s5651_s3 + $0xc8] sm:$0xff] }
 0x2d2   : > { %3276 = vset.pattern.permute.xlu1 %v5909_v53  ;;  %v5910_v40 = vld [vmem:[#allocation65_spill] sm:$0xff]  ;;  %v2150_v23 = vsel %vm833_vm2, %v2118_v62, 0.0  ;;  %v1089_v45 = vmul.f32 %v2881_v42, %v5911_v18  ;;  %v1402_v48 = vadd.f32 %v1401_v22, %v1400_v4  ;;  %v2120_v10 = vmul.f32 %v2988_v20, %v4774_v1 }
 0x2d3   : > { %v825_v13 = vmul.f32 %v5910_v40, %v633_v55  ;;  %2516 = vperm.xlu1 %3276, %v3518_v33   ;;  %v2913_v30 = vld [vmem:[%s5651_s3 + $0x2c0] sm:$0xff]  ;;  %v1999_v55 = vpop.permute.xlu1 %1998  ;;  %v4938_v62 = vsel %vm833_vm2, %v1354_v25, 0.0  ;;  %v2149_v33 = vsel %vm833_vm2, %v2117_v50, 0.0  ;;  %v4944_v42 = vsel %vm833_vm2, %v1091_v11, 0.0  ;;  %v2990_v39 = vld [vmem:[%s5651_s3 + $0x528] sm:$0xff] }
 0x2d4   : > { %v2119_v9 = vmul.f32 %v2987_v57, %v1999_v55  ;;  %2317 = vperm.xlu0 %3278, %v3524_v35   ;;  %v880_v43 = vadd.f32 %v879_v8, %v878_v56  ;;  %v1663_v4 = vadd.f32 %v1662_v59, %v1661_v12  ;;  %v2151_v25 = vadd.f32 %v2150_v23, %v2149_v33  ;;  %v2989_v35 = vld [vmem:[%s5651_s3 + $0x520] sm:$0xff]  ;;  %v636_v59 = vld [vmem:[%s5651_s3 + $0xd8] sm:$0xff] }
 0x2d5   : > { %v4952_v50 = vpop.permute.xlu0 %2042  ;;  %v881_v1 = vsel %vm833_vm2, %v825_v13, 0.0  ;;  %v5912_v11 = vld [vmem:[#allocation69_spill] sm:$0xff]  ;;  %v5913_v57 = vld [vmem:[#allocation72_spill] sm:$0xff]  ;;  %v1144_v56 = vsel %vm833_vm2, %v1089_v45, 0.0  ;;  %v1141_v40 = vadd.f32 %v4796_v7, %v1139_v21  ;;  %v1404_v13 = vadd.f32 %v4811_v38, %v1402_v48 }
 0x2d6   : > { %v1352_v20 = vmul.f32 %v2913_v30, %v5912_v11  ;;  %v1092_v22 = vmul.f32 %v2884_v19, %v5913_v57  ;;  %v2152_v8 = vsel %vm833_vm2, %v2119_v9, 0.0  ;;  %v2916_v12 = vld [vmem:[%s5651_s3 + $0x2d8] sm:$0xff]  ;;  %v5914_v30 = vld [vmem:[#allocation81_spill] sm:$0xff]  ;;  %v2122_v45 = vmul.f32 %v2990_v39, %v4808_v3  ;;  %v5915_v9 = vld [vmem:[#allocation74_spill] sm:$0xff] }
 0x2d7   : > { %2524 = vperm.xlu1 %3276, %v3507_v26   ;;  %v2153_v23 = vadd.f32 %v2152_v8, %v2151_v25  ;;  %v2007_v18 = vpop.permute.xlu1 %2006  ;;  %v826_v19 = vmul.f32 %v5914_v30, %v634_v52  ;;  %v2944_v55 = vld [vmem:[%s5651_s3 + $0x3b8] sm:$0xff]  ;;  %v2154_v26 = vsel %vm833_vm2, %v2120_v10, 0.0  ;;  %v828_v11 = vmul.f32 %v5915_v9, %v636_v59  ;;  %v2991_v10 = vld [vmem:[%s5651_s3 + $0x530] sm:$0xff]  ;;  %v5920_v9 = vld [vmem:[#allocation85_spill] sm:$0xff] }
 0x2d8   : > { %v2121_v33 = vmul.f32 %v2989_v35, %v2007_v18  ;;  %2325 = vperm.xlu0 %3278, %v3509_v27   ;;  %v882_v7 = vadd.f32 %v881_v1, %v880_v43  ;;  %v1665_v21 = vadd.f32 %v1664_v17, %v1663_v4  ;;  %v2992_v38 = vld [vmem:[%s5651_s3 + $0x538] sm:$0xff]  ;;  %v1407_v3 = vsel %vm833_vm2, %v1352_v20, 0.0  ;;  %v5916_v27 = vld [vmem:[#allocation77_spill] sm:$0xff] }
 0x2d9   : > { %v2155_v48 = vadd.f32 %v2154_v26, %v2153_v23  ;;  %v4982_v52 = vpop.permute.xlu0 %2050  ;;  %v4989_v39 = vsel %vm833_vm2, %v1092_v22, 0.0  ;;  %v1355_v25 = vmul.f32 %v2916_v12, %v5916_v27  ;;  %v5917_v43 = vld [vmem:[#allocation5_spill] sm:$0xff]  ;;  %v1143_v1 = vadd.f32 %v4888_v16, %v1141_v40 }
 0x2da   : > { %v2156_v17 = vsel %vm833_vm2, %v2121_v33, 0.0  ;;  %v2882_v4 = vld [vmem:[%s5651_s3 + $0x1c8] sm:$0xff]  ;;  %v1406_v22 = vadd.f32 %v4908_v37, %v1404_v13  ;;  %v883_v12 = vsel %vm833_vm2, %v826_v19, 0.0  ;;  %v2158_v23 = vsel %vm833_vm2, %v2122_v45, 0.0  ;;  %v2945_v37 = vld [vmem:[%s5651_s3 + $0x3c0] sm:$0xff]  ;;  %v639_v45 = vld [vmem:[%s5651_s3 + $0xf0] sm:$0xff] }
 0x2db   : > { %2528 = vperm.xlu1 %3276, %v5917_v43   ;;  %v2914_v35 = vld [vmem:[%s5651_s3 + $0x2c8] sm:$0xff]  ;;  %v2157_v59 = vadd.f32 %v2156_v17, %v2155_v48  ;;  %v2015_v8 = vpop.permute.xlu1 %2014  ;;  %v2124_v18 = vmul.f32 %v2992_v38, %v4840_v14  ;;  %v887_v26 = vsel %vm833_vm2, %v828_v11, 0.0  ;;  %v884_v33 = vadd.f32 %v883_v12, %v882_v7  ;;  %v5921_v43 = vld [vmem:[#allocation116_spill] sm:$0xff]  ;;  %v2995_v12 = vld [vmem:[%s5651_s3 + $0x550] sm:$0xff] }
 0x2dc   : > { %v5918_v20 = vld [vmem:[#allocation109_spill] sm:$0xff]  ;;  %v2123_v30 = vmul.f32 %v2991_v10, %v2015_v8  ;;  %2333 = vperm.xlu0 %3278, %v3607_v60   ;;  %v1667_v16 = vadd.f32 %v4843_v28, %v1665_v21  ;;  %v5021_v14 = vsel %vm833_vm2, %v1355_v25, 0.0  ;;  %v1353_v11 = vmul.f32 %v2914_v35, %v5920_v9 }
 0x2dd   : > { %v1614_v57 = vmul.f32 %v2944_v55, %v5918_v20  ;;  %v2994_v40 = vld [vmem:[%s5651_s3 + $0x548] sm:$0xff]  ;;  %v2159_v13 = vadd.f32 %v2158_v23, %v2157_v59  ;;  %v5015_v19 = vpop.permute.xlu0 %2058  ;;  %v2993_v60 = vld [vmem:[%s5651_s3 + $0x540] sm:$0xff]  ;;  %v1145_v38 = vadd.f32 %v1144_v56, %v1143_v1  ;;  %v1408_v10 = vadd.f32 %v1407_v3, %v1406_v22 }
 0x2de   : > { %v5919_v55 = vld [vmem:[#allocation78_spill] sm:$0xff]  ;;  %v2160_v7 = vsel %vm833_vm2, %v2123_v30, 0.0  ;;  %v637_v21 = vld [vmem:[%s5651_s3 + $0xe0] sm:$0xff]  ;;  %v2162_v35 = vsel %vm833_vm2, %v2124_v18, 0.0  ;;  %v886_v1 = vadd.f32 %v4928_v29, %v884_v33 }
 0x2df   : > { %v1090_v28 = vmul.f32 %v2882_v4, %v5919_v55  ;;  %2536 = vperm.xlu1 %3276, %v3634_v6   ;;  %v1668_v48 = vsel %vm833_vm2, %v1614_v57, 0.0  ;;  %v2161_v27 = vadd.f32 %v2160_v7, %v2159_v13  ;;  %v2023_v25 = vpop.permute.xlu1 %2022  ;;  %v2946_v17 = vld [vmem:[%s5651_s3 + $0x3c8] sm:$0xff]  ;;  %v1615_v4 = vmul.f32 %v2945_v37, %v5921_v43  ;;  %v5922_v59 = vld [vmem:[#allocation84_spill] sm:$0xff] }
 0x2e0   : > { %v2126_v6 = vmul.f32 %v2994_v40, %v4881_v5  ;;  %v2125_v20 = vmul.f32 %v2993_v60, %v2023_v25  ;;  %2341 = vperm.xlu0 %3278, %v3587_v54   ;;  %v831_v56 = vmul.f32 %v5922_v59, %v639_v45  ;;  %v1669_v3 = vadd.f32 %v1668_v48, %v1667_v16  ;;  %v2996_v57 = vld [vmem:[%s5651_s3 + $0x558] sm:$0xff]  ;;  %v2885_v30 = vld [vmem:[%s5651_s3 + $0x1e0] sm:$0xff]  ;;  %v638_v16 = vld [vmem:[%s5651_s3 + $0xe8] sm:$0xff] }
 0x2e1   : > { %v2163_v22 = vadd.f32 %v2162_v35, %v2161_v27  ;;  %v5046_v8 = vpop.permute.xlu0 %2066  ;;  %v1146_v5 = vsel %vm833_vm2, %v1090_v28, 0.0  ;;  %v1409_v54 = vsel %vm833_vm2, %v1353_v11, 0.0  ;;  %v5923_v23 = vld [vmem:[#allocation92_spill] sm:$0xff]  ;;  %v5924_v37 = vld [vmem:[#allocation110_spill] sm:$0xff]  ;;  %v1670_v28 = vsel %vm833_vm2, %v1615_v4, 0.0  ;;  %v5925_v25 = vld [vmem:[#allocation95_spill] sm:$0xff] }
 0x2e2   : > { %v829_v18 = vmul.f32 %v5923_v23, %v637_v21  ;;  %v2164_v29 = vsel %vm833_vm2, %v2125_v20, 0.0  ;;  %v1147_v33 = vadd.f32 %v1146_v5, %v1145_v38  ;;  %v1616_v40 = vmul.f32 %v2946_v17, %v5924_v37  ;;  %v2947_v38 = vld [vmem:[%s5651_s3 + $0x3d0] sm:$0xff]  ;;  %v2998_v48 = vld [vmem:[%s5651_s3 + $0x568] sm:$0xff]  ;;  %v2917_v17 = vld [vmem:[%s5651_s3 + $0x2e0] sm:$0xff] }
 0x2e3   : > { %2544 = vperm.xlu1 %3276, %v3618_v0   ;;  %v1410_v13 = vadd.f32 %v1409_v54, %v1408_v10  ;;  %v2165_v60 = vadd.f32 %v2164_v29, %v2163_v22  ;;  %v2031_v55 = vpop.permute.xlu1 %2030  ;;  %v2166_v45 = vsel %vm833_vm2, %v2126_v6, 0.0  ;;  %v2128_v0 = vmul.f32 %v2996_v57, %v4917_v15  ;;  %v5926_v43 = vld [vmem:[#allocation108_spill] sm:$0xff]  ;;  %v2919_v6 = vld [vmem:[%s5651_s3 + $0x2f0] sm:$0xff] }
 0x2e4   : > { %v2127_v9 = vmul.f32 %v2995_v12, %v2031_v55  ;;  %2349 = vperm.xlu0 %3278, %v3708_v49   ;;  %v5068_v11 = vsel %vm833_vm2, %v831_v56, 0.0  ;;  %v888_v7 = vadd.f32 %v887_v26, %v886_v1  ;;  %v1671_v21 = vadd.f32 %v1670_v28, %v1669_v3  ;;  %v2997_v49 = vld [vmem:[%s5651_s3 + $0x560] sm:$0xff]  ;;  %v2948_v57 = vld [vmem:[%s5651_s3 + $0x3d8] sm:$0xff]  ;;  %v2886_v55 = vld [vmem:[%s5651_s3 + $0x1e8] sm:$0xff] }
 0x2e5   : > { %v2167_v10 = vadd.f32 %v2166_v45, %v2165_v60  ;;  %v5076_v27 = vpop.permute.xlu0 %2074  ;;  %v889_v15 = vsel %vm833_vm2, %v829_v18, 0.0  ;;  %v1093_v26 = vmul.f32 %v2885_v30, %v5925_v25  ;;  %v830_v4 = vmul.f32 %v5926_v43, %v638_v16  ;;  %v5927_v22 = vld [vmem:[#allocation119_spill] sm:$0xff]  ;;  %v5929_v37 = vld [vmem:[#allocation88_spill] sm:$0xff] }
 0x2e6   : > { %v2168_v35 = vsel %vm833_vm2, %v2127_v9, 0.0  ;;  %v1149_v20 = vadd.f32 %v4944_v42, %v1147_v33  ;;  %v1672_v59 = vsel %vm833_vm2, %v1616_v40, 0.0  ;;  %v1412_v56 = vadd.f32 %v4938_v62, %v1410_v13  ;;  %v5928_v42 = vld [vmem:[#allocation96_spill] sm:$0xff]  ;;  %v2999_v16 = vld [vmem:[%s5651_s3 + $0x570] sm:$0xff]  ;;  %v2918_v9 = vld [vmem:[%s5651_s3 + $0x2e8] sm:$0xff] }
 0x2e7   : > { %2552 = vperm.xlu1 %3276, %v3760_v41   ;;  %v2169_v1 = vadd.f32 %v2168_v35, %v2167_v10  ;;  %v2039_v3 = vpop.permute.xlu1 %2038  ;;  %v1617_v12 = vmul.f32 %v2947_v38, %v5927_v22  ;;  %v2170_v41 = vsel %vm833_vm2, %v2128_v0, 0.0  ;;  %v2130_v5 = vmul.f32 %v2998_v48, %v4952_v50  ;;  %v3000_v62 = vld [vmem:[%s5651_s3 + $0x578] sm:$0xff]  ;;  %v2887_v35 = vld [vmem:[%s5651_s3 + $0x1f0] sm:$0xff] }
 0x2e8   : > { %v2129_v54 = vmul.f32 %v2997_v49, %v2039_v3  ;;  %2357 = vperm.xlu0 %3278, %v3673_v24   ;;  %v1356_v23 = vmul.f32 %v2917_v17, %v5928_v42  ;;  %v890_v18 = vadd.f32 %v889_v15, %v888_v7  ;;  %v1673_v29 = vadd.f32 %v1672_v59, %v1671_v21  ;;  %v640_v60 = vld [vmem:[%s5651_s3 + $0xf8] sm:$0xff]  ;;  %v5931_v15 = vld [vmem:[#allocation37_spill] sm:$0xff]  ;;  %v5933_v59 = vld [vmem:[#allocation106_spill] sm:$0xff] }
 0x2e9   : > { %v2171_v30 = vadd.f32 %v2170_v41, %v2169_v1  ;;  %v5106_v33 = vpop.permute.xlu0 %2082  ;;  %v5112_v50 = vmul.f32 %v2919_v6, %v5929_v37  ;;  %v1152_v24 = vsel %vm833_vm2, %v1093_v26, 0.0  ;;  %v891_v40 = vsel %vm833_vm2, %v830_v4, 0.0  ;;  %v5930_v45 = vld [vmem:[#allocation112_spill] sm:$0xff]  ;;  %v5932_v6 = vld [vmem:[#allocation101_spill] sm:$0xff] }
 0x2ea   : > { %v2172_v13 = vsel %vm833_vm2, %v2129_v54, 0.0  ;;  %v1151_v28 = vadd.f32 %v4989_v39, %v1149_v20  ;;  %v1618_v0 = vmul.f32 %v2948_v57, %v5930_v45  ;;  %v1414_v7 = vadd.f32 %v5021_v14, %v1412_v56  ;;  %v2949_v17 = vld [vmem:[%s5651_s3 + $0x3e0] sm:$0xff]  ;;  %v3002_v14 = vld [vmem:[%s5651_s3 + $0x588] sm:$0xff] }
 0x2eb   : > { %2560 = vperm.xlu1 %3276, %v5862_v32   ;;  %v2173_v21 = vadd.f32 %v2172_v13, %v2171_v30  ;;  %v2047_v32 = vpop.permute.xlu1 %2046  ;;  %v1674_v38 = vsel %vm833_vm2, %v1617_v12, 0.0  ;;  %v2174_v48 = vsel %vm833_vm2, %v2130_v5, 0.0  ;;  %v2132_v10 = vmul.f32 %v3000_v62, %v4982_v52  ;;  %v3001_v52 = vld [vmem:[%s5651_s3 + $0x580] sm:$0xff]  ;;  %v2950_v42 = vld [vmem:[%s5651_s3 + $0x3e8] sm:$0xff]  ;;  %v3004_v13 = vld [vmem:[%s5651_s3 + $0x598] sm:$0xff] }
 0x2ec   : > { %v2131_v49 = vmul.f32 %v2999_v16, %v2047_v32  ;;  %2365 = vperm.xlu0 %3278, %v5931_v15   ;;  %v1415_v39 = vsel %vm833_vm2, %v1356_v23, 0.0  ;;  %v892_v25 = vadd.f32 %v891_v40, %v890_v18  ;;  %v1675_v26 = vadd.f32 %v1674_v38, %v1673_v29  ;;  %v5934_v1 = vld [vmem:[#allocation113_spill] sm:$0xff]  ;;  %v5935_v23 = vld [vmem:[#allocation10_spill] sm:$0xff] }
 0x2ed   : > { %v2175_v43 = vadd.f32 %v2174_v48, %v2173_v21  ;;  %v5141_v4 = vpop.permute.xlu0 %2090  ;;  %v832_v20 = vmul.f32 %v5932_v6, %v640_v60  ;;  %v1094_v56 = vmul.f32 %v2886_v55, %v5933_v59  ;;  %v1357_v3 = vmul.f32 %v2918_v9, %v5934_v1  ;;  %v5936_v16 = vld [vmem:[#allocation54_spill] sm:$0xff]  ;;  %v2888_v9 = vld [vmem:[%s5651_s3 + $0x1f8] sm:$0xff]  ;;  %v5940_v1 = vld [vmem:[#allocation105_spill] sm:$0xff] }
 0x2ee   : > { %v2176_v57 = vsel %vm833_vm2, %v2131_v49, 0.0  ;;  %v1153_v22 = vadd.f32 %v1152_v24, %v1151_v28  ;;  %v1676_v12 = vsel %vm833_vm2, %v1618_v0, 0.0  ;;  %v1416_v41 = vadd.f32 %v1415_v39, %v1414_v7  ;;  %v3003_v28 = vld [vmem:[%s5651_s3 + $0x590] sm:$0xff]  ;;  %v2920_v7 = vld [vmem:[%s5651_s3 + $0x2f8] sm:$0xff] }
 0x2ef   : > { %2568 = vperm.xlu1 %3276, %v5866_v51   ;;  %v2177_v5 = vadd.f32 %v2176_v57, %v2175_v43  ;;  %v2055_v54 = vpop.permute.xlu1 %2054  ;;  %v1619_v18 = vmul.f32 %v2949_v17, %v5935_v23  ;;  %v2178_v29 = vsel %vm833_vm2, %v2132_v10, 0.0  ;;  %v2134_v62 = vmul.f32 %v3002_v14, %v5015_v19  ;;  %v5937_v51 = vld [vmem:[#allocation89_spill] sm:$0xff]  ;;  %v5938_v38 = vld [vmem:[#allocation114_spill] sm:$0xff]  ;;  %v5939_v59 = vld [vmem:[#allocation99_spill] sm:$0xff] }
 0x2f0   : > { %v2133_v30 = vmul.f32 %v3001_v52, %v2055_v54  ;;  %2369 = vperm.xlu0 %3278, %v5936_v16   ;;  %v1095_v37 = vmul.f32 %v2887_v35, %v5937_v51  ;;  %v894_v24 = vadd.f32 %v5068_v11, %v892_v25  ;;  %v1677_v40 = vadd.f32 %v1676_v12, %v1675_v26  ;;  %v2951_v52 = vld [vmem:[%s5651_s3 + $0x3f0] sm:$0xff]  ;;  %v3006_v35 = vld [vmem:[%s5651_s3 + $0x5a8] sm:$0xff]  ;;  %v2952_v23 = vld [vmem:[%s5651_s3 + $0x3f8] sm:$0xff] }
 0x2f1   : > { %v2179_v60 = vadd.f32 %v2178_v29, %v2177_v5  ;;  %v5167_v55 = vpop.permute.xlu0 %2098  ;;  %v895_v19 = vsel %vm833_vm2, %v832_v20, 0.0  ;;  %v1154_v45 = vsel %vm833_vm2, %v1094_v56, 0.0  ;;  %v1417_v0 = vsel %vm833_vm2, %v1357_v3, 0.0  ;;  %v3005_v20 = vld [vmem:[%s5651_s3 + $0x5a0] sm:$0xff]  ;;  %v2984_v5 = vld [vmem:[%s5651_s3 + $0x4f8] sm:$0xff] }
 0x2f2   : > { %v2180_v11 = vsel %vm833_vm2, %v2133_v30, 0.0  ;;  %v1155_v21 = vadd.f32 %v1154_v45, %v1153_v22  ;;  %v1418_v32 = vadd.f32 %v1417_v0, %v1416_v41  ;;  %v1620_v48 = vmul.f32 %v2950_v42, %v5938_v38 }
 0x2f3   : > { %2576 = vperm.xlu1 %3276, %v5869_v61   ;;  %v2181_v10 = vadd.f32 %v2180_v11, %v2179_v60  ;;  %v2063_v49 = vpop.permute.xlu1 %2062  ;;  %v1678_v39 = vsel %vm833_vm2, %v1619_v18, 0.0  ;;  %v2182_v25 = vsel %vm833_vm2, %v2134_v62, 0.0  ;;  %v2136_v61 = vmul.f32 %v3004_v13, %v5046_v8  ;;  %v5941_v18 = vld [vmem:[#allocation13_spill] sm:$0xff]  ;;  %v3007_v60 = vld [vmem:[%s5651_s3 + $0x5b0] sm:$0xff] }
 0x2f4   : > { %v2135_v26 = vmul.f32 %v3003_v28, %v2063_v49  ;;  %3280 = vset.pattern.permute.xlu0 %v5909_v53  ;;  %v1419_v17 = vsel %vm833_vm2, %v5112_v50, 0.0  ;;  %v896_v14 = vadd.f32 %v895_v19, %v894_v24  ;;  %v1679_v43 = vadd.f32 %v1678_v39, %v1677_v40  ;;  %v5942_v40 = vld [vmem:[#allocation47_spill] sm:$0xff] }
 0x2f5   : > { %v2183_v6 = vadd.f32 %v2182_v25, %v2181_v10  ;;  %2632 = vperm.xlu0 %3280, %v5936_v16   ;;  %v5197_v8 = vpop.permute.xlu0 %2106  ;;  %v1156_v50 = vsel %vm833_vm2, %v1095_v37, 0.0  ;;  %v1096_v56 = vmul.f32 %v2888_v9, %v5939_v59  ;;  %v1359_v3 = vmul.f32 %v2920_v7, %v5940_v1  ;;  %v3008_v37 = vld [vmem:[%s5651_s3 + $0x5b8] sm:$0xff]  ;;  %v5943_v9 = vld [vmem:[#allocation118_spill] sm:$0xff] }
 0x2f6   : > { %v2184_v57 = vsel %vm833_vm2, %v2135_v26, 0.0  ;;  %v1157_v22 = vadd.f32 %v1156_v50, %v1155_v21  ;;  %v1420_v12 = vadd.f32 %v1419_v17, %v1418_v32  ;;  %v1680_v41 = vsel %vm833_vm2, %v1620_v48, 0.0 }
 0x2f7   : > { %2584 = vperm.xlu1 %3276, %v5875_v63   ;;  %v2185_v54 = vadd.f32 %v2184_v57, %v2183_v6  ;;  %v2071_v42 = vpop.permute.xlu1 %2070  ;;  %v1621_v29 = vmul.f32 %v2951_v52, %v5941_v18  ;;  %v2186_v62 = vsel %vm833_vm2, %v2136_v61, 0.0  ;;  %v2138_v63 = vmul.f32 %v3006_v35, %v5076_v27  ;;  %v3009_v61 = vld [vmem:[%s5651_s3 + $0x5c0] sm:$0xff] }
 0x2f8   : > { %v2137_v30 = vmul.f32 %v3005_v20, %v2071_v42  ;;  %v897_v16 = vrot.slane %v896_v14, 4  ;;  %v1681_v51 = vadd.f32 %v1680_v41, %v1679_v43  ;;  %v1158_v28 = vsel %vm833_vm2, %v1096_v56, 0.0 }
 0x2f9   : > { %v2187_v24 = vadd.f32 %v2186_v62, %v2185_v54  ;;  %2640 = vperm.xlu0 %3280, %v5942_v40   ;;  %v5221_v13 = vpop.permute.xlu0 %2114  ;;  %v1421_v27 = vsel %vm833_vm2, %v1359_v3, 0.0  ;;  %v1885_v19 = vmul.f32 %v2984_v5, %v4850_v46  ;;  %v1159_v0 = vadd.f32 %v1158_v28, %v1157_v22  ;;  %v3010_v46 = vld [vmem:[%s5651_s3 + $0x5c8] sm:$0xff]  ;;  %v3011_v22 = vld [vmem:[%s5651_s3 + $0x5d0] sm:$0xff] }
 0x2fa   : > { %v2188_v45 = vsel %vm833_vm2, %v2137_v30, 0.0  ;;  %v1422_v11 = vadd.f32 %v1421_v27, %v1420_v12  ;;  %v1622_v7 = vmul.f32 %v2952_v23, %v5943_v9  ;;  %v1682_v38 = vsel %vm833_vm2, %v1621_v29, 0.0  ;;  %v3014_v30 = vld [vmem:[%s5651_s3 + $0x5e8] sm:$0xff] }
 0x2fb   : > { %2592 = vperm.xlu1 %3276, %v5878_v58   ;;  %v2189_v21 = vadd.f32 %v2188_v45, %v2187_v24  ;;  %v2079_v32 = vpop.permute.xlu1 %2078  ;;  %v2190_v48 = vsel %vm833_vm2, %v2138_v63, 0.0  ;;  %v2140_v10 = vmul.f32 %v3008_v37, %v5106_v33  ;;  %v898_v39 = vadd.f32 %v897_v16, %v896_v14 }
 0x2fc   : > { %v2139_v49 = vmul.f32 %v3007_v60, %v2079_v32  ;;  %v1683_v25 = vadd.f32 %v1682_v38, %v1681_v51  ;;  %v1947_v26 = vsel %vm833_vm2, %v1885_v19, 0.0  ;;  %v1160_v33 = vrot.slane %v1159_v0, 4 }
 0x2fd   : > { %v2191_v58 = vadd.f32 %v2190_v48, %v2189_v21  ;;  %v1423_v14 = vrot.slane %v1422_v11, 4  ;;  %v1684_v6 = vsel %vm833_vm2, %v1622_v7, 0.0  ;;  %v2194_v20 = vsel %vm833_vm2, %v2140_v10, 0.0  ;;  %v3016_v7 = vld [vmem:[%s5651_s3 + $0x5f8] sm:$0xff] }
 0x2fe   : > { %v2192_v17 = vsel %vm833_vm2, %v2139_v49, 0.0  ;;  %v5244_v43 = vpop.permute.xlu0 %2520  ;;  %v2142_v50 = vmul.f32 %v3010_v46, %v5141_v4  ;;  %v899_v56 = vrot.slane %v898_v39, 2  ;;  %v1685_v1 = vadd.f32 %v1684_v6, %v1683_v25 }
 0x2ff   : > { %2600 = vperm.xlu1 %3276, %v5883_v47   ;;  %v2193_v52 = vadd.f32 %v2192_v17, %v2191_v58  ;;  %v2087_v35 = vpop.permute.xlu1 %2086  ;;  %v1948_v3 = vadd.f32 %v1947_v26, %v4868_v2  ;;  %v3012_v47 = vld [vmem:[%s5651_s3 + $0x5d8] sm:$0xff]  ;;  %v1161_v4 = vadd.f32 %v1160_v33, %v1159_v0  ;;  %v1424_v5 = vadd.f32 %v1423_v14, %v1422_v11  ;;  %v608_v33 = vld [vmem:[%s5652_s4] sm:$0x1] }
 0x300   : > { %v2141_v59 = vmul.f32 %v3009_v61, %v2087_v35  ;;  %v2198_v2 = vsel %vm833_vm2, %v2142_v50, 0.0  ;;  %v2144_v23 = vmul.f32 %v3012_v47, %v5167_v55  ;;  %v900_v29 = vadd.f32 %v899_v56, %v898_v39 }
 0x301   : > { %v2195_v57 = vadd.f32 %v2194_v20, %v2193_v52  ;;  %v1686_v62 = vrot.slane %v1685_v1, 4  ;;  %v1949_v63 = vrot.slane %v1948_v3, 4  ;;  %v1162_v55 = vrot.slane %v1161_v4, 2 }
 0x302   : > { %v2196_v12 = vsel %vm833_vm2, %v2141_v59, 0.0  ;;  %v5258_v41 = vpop.permute.xlu0 %2532  ;;  %v1425_v24 = vrot.slane %v1424_v5, 2  ;;  %v2202_v27 = vsel %vm833_vm2, %v2144_v23, 0.0  ;;  %v2146_v19 = vmul.f32 %v3014_v30, %v5197_v8 }
 0x303   : > { %2608 = vperm.xlu1 %3276, %v5887_v34   ;;  %v2197_v54 = vadd.f32 %v2196_v12, %v2195_v57  ;;  %v2095_v42 = vpop.permute.xlu1 %2094  ;;  %v3013_v34 = vld [vmem:[%s5651_s3 + $0x5e0] sm:$0xff]  ;;  %v901_v0 = vrot.slane %v900_v29, 1  ;;  %v1687_v11 = vadd.f32 %v1686_v62, %v1685_v1  ;;  %v1950_v9 = vadd.f32 %v1949_v63, %v1948_v3 }
 0x304   : > { %v2143_v18 = vmul.f32 %v3011_v22, %v2095_v42  ;;  %v1163_v8 = vadd.f32 %v1162_v55, %v1161_v4  ;;  %v1426_v48 = vadd.f32 %v1425_v24, %v1424_v5  ;;  %v2206_v39 = vsel %vm833_vm2, %v2146_v19, 0.0 }
 0x305   : > { %v2199_v16 = vadd.f32 %v2198_v2, %v2197_v54  ;;  %v2148_v25 = vmul.f32 %v3016_v7, %v5221_v13  ;;  %v902_v58 = vadd.f32 %v901_v0, %v900_v29  ;;  %v1688_v61 = vrot.slane %v1687_v11, 2  ;;  %v3017_v7 = vld [vmem:[%s5651_s3 + $0x600] sm:$0xff] }
 0x306   : > { %v2200_v51 = vsel %vm833_vm2, %v2143_v18, 0.0  ;;  %v5270_v37 = vpop.permute.xlu0 %2540  ;;  %v1951_v26 = vrot.slane %v1950_v9, 2  ;;  %v1164_v52 = vrot.slane %v1163_v8, 1  ;;  %v1427_v35 = vrot.slane %v1426_v48, 1 }
 0x307   : > { %2616 = vperm.xlu1 %3276, %v5894_v36   ;;  %v2201_v60 = vadd.f32 %v2200_v51, %v2199_v16  ;;  %v2103_v28 = vpop.permute.xlu1 %2102  ;;  %v3015_v36 = vld [vmem:[%s5651_s3 + $0x5f0] sm:$0xff]  ;;  %v2210_v13 = vsel %vm833_vm2, %v2148_v25, 0.0  ;;  %v903_v50 = vadd.f32 %v902_v58, %v608_v33  ;;  %v1689_v59 = vadd.f32 %v1688_v61, %v1687_v11 }
 0x308   : > { %v2145_v45 = vmul.f32 %v3013_v34, %v2103_v28  ;;  %v1952_v56 = vadd.f32 %v1951_v26, %v1950_v9  ;;  %v1165_v47 = vadd.f32 %v1164_v52, %v1163_v8  ;;  %v1428_v57 = vadd.f32 %v1427_v35, %v1426_v48  ;;  %v3020_v48 = vld [vmem:[%s5651_s3 + $0x618] sm:$0xff] }
 0x309   : > { %v2203_v21 = vadd.f32 %v2202_v27, %v2201_v60  ;;  %v1690_v4 = vrot.slane %v1689_v59, 1 }
 0x30a   : > { %v2204_v32 = vsel %vm833_vm2, %v2145_v45, 0.0  ;;  %v5282_v38 = vpop.permute.xlu0 %2548  ;;  %v1166_v5 = vadd.f32 %v1165_v47, %v903_v50  ;;  %v1953_v54 = vrot.slane %v1952_v56, 1 }
 0x30b   : > { %2624 = vperm.xlu1 %3276, %v5902_v31   ;;  %v2205_v10 = vadd.f32 %v2204_v32, %v2203_v21  ;;  %v2111_v49 = vpop.permute.xlu1 %2110  ;;  %v3018_v32 = vld [vmem:[%s5651_s3 + $0x608] sm:$0xff] }
 0x30c   : > { %v2147_v46 = vmul.f32 %v3015_v36, %v2111_v49  ;;  %v1429_v23 = vadd.f32 %v1428_v57, %v1166_v5  ;;  %v1954_v62 = vadd.f32 %v1953_v54, %v1952_v56  ;;  %v3019_v36 = vld [vmem:[%s5651_s3 + $0x610] sm:$0xff]  ;;  %v3024_v56 = vld [vmem:[%s5651_s3 + $0x638] sm:$0xff] }
 0x30d   : > { %v2207_v17 = vadd.f32 %v2206_v39, %v2205_v10 }
 0x30e   : > { %v2208_v31 = vsel %vm833_vm2, %v2147_v46, 0.0  ;;  %v5291_v14 = vpop.permute.xlu0 %2556  ;;  %v3021_v46 = vld [vmem:[%s5651_s3 + $0x620] sm:$0xff] }
 0x30f   : > { %2628 = vperm.xlu1 %3276, %v5931_v15   ;;  %v2209_v6 = vadd.f32 %v2208_v31, %v2207_v17  ;;  %v5944_v15 = vld [vmem:[#allocation26_spill] sm:$0xff] }
 0x310   : > { %v2254_v20 = vpop.permute.xlu1 %2253  ;;  %v3022_v17 = vld [vmem:[%s5651_s3 + $0x628] sm:$0xff] }
 0x311   : > { %v2211_v1 = vadd.f32 %v2210_v13, %v2209_v6  ;;  %v2380_v8 = vmul.f32 %v3017_v7, %v2254_v20  ;;  %v3023_v20 = vld [vmem:[%s5651_s3 + $0x630] sm:$0xff] }
 0x312   : > { %v5295_v3 = vpop.permute.xlu0 %2564 }
 0x313   : > { %3279 = vset.pattern.permute.xlu1 %v5871_v44  ;;  %v2212_v22 = vrot.slane %v2211_v1, 4  ;;  %v1691_v44 = vadd.f32 %v1690_v4, %v1689_v59  ;;  %v2412_v58 = vsel %vm833_vm2, %v2380_v8, 0.0  ;;  %v3025_v4 = vld [vmem:[%s5651_s3 + $0x640] sm:$0xff] }
 0x314   : > { %2373 = vperm.xlu1 %3279, %v5944_v15   ;;  %v2262_v12 = vpop.permute.xlu1 %2261 }
 0x315   : > { %v2213_v42 = vadd.f32 %v2212_v22, %v2211_v1  ;;  %v1692_v16 = vadd.f32 %v1691_v44, %v1429_v23  ;;  %v2382_v49 = vmul.f32 %v3019_v36, %v2262_v12 }
 0x316   : > { %v5298_v2 = vpop.permute.xlu0 %2572 }
 0x317   : > { %v2214_v18 = vrot.slane %v2213_v42, 2  ;;  %v1955_v55 = vadd.f32 %v1954_v62, %v1692_v16  ;;  %v2415_v52 = vsel %vm833_vm2, %v2382_v49, 0.0  ;;  %v3027_v16 = vld [vmem:[%s5651_s3 + $0x650] sm:$0xff] }
 0x318   : > { %2377 = vperm.xlu1 %3279, %v5942_v40   ;;  %v2266_v29 = vpop.permute.xlu1 %2265 }
 0x319   : > { %v2215_v63 = vadd.f32 %v2214_v18, %v2213_v42  ;;  %v2383_v61 = vmul.f32 %v3020_v48, %v2266_v29  ;;  %v3026_v42 = vld [vmem:[%s5651_s3 + $0x648] sm:$0xff]  ;;  %v3029_v48 = vld [vmem:[%s5651_s3 + $0x660] sm:$0xff] }
 0x31a   : > { %v5301_v30 = vpop.permute.xlu0 %2580 }
 0x31b   : > { %v2216_v34 = vrot.slane %v2215_v63, 1  ;;  %v2417_v50 = vsel %vm833_vm2, %v2383_v61, 0.0 }
 0x31c   : > { %3281 = vset.pattern.permute.xlu1 %v5909_v53  ;;  %v2274_v51 = vpop.permute.xlu1 %2273 }
 0x31d   : > { %2636 = vperm.xlu1 %3281, %v5944_v15   ;;  %v2217_v24 = vadd.f32 %v2216_v34, %v2215_v63  ;;  %v2385_v59 = vmul.f32 %v3022_v17, %v2274_v51 }
 0x31e   : > { %v5305_v60 = vpop.permute.xlu0 %2588 }
 0x31f   : > { %v5307_v28 = vadd.f32 %v2217_v24, %v1955_v55  ;;  %v2421_v5 = vsel %vm833_vm2, %v2385_v59, 0.0  ;;  %v3028_v55 = vld [vmem:[%s5651_s3 + $0x658] sm:$0xff] }
 0x320   : > { %v2282_v40 = vpop.permute.xlu1 %2281 }
 0x321   : > { %v2387_v54 = vmul.f32 %v3024_v56, %v2282_v40  ;;  %v3050_v56 = vld [vmem:[%s5651_s3 + $0x708] sm:$0xff] }
 0x322   : > { %v5309_v27 = vpop.permute.xlu0 %2596 }
 0x323   : > { %v2425_v34 = vsel %vm833_vm2, %v2387_v54, 0.0 }
 0x324   : > { %v2290_v19 = vpop.permute.xlu1 %2289 }
 0x325   : > { %v2389_v51 = vmul.f32 %v3026_v42, %v2290_v19  ;;  %v3030_v19 = vld [vmem:[%s5651_s3 + $0x668] sm:$0xff]  ;;  %v3051_v42 = vld [vmem:[%s5651_s3 + $0x710] sm:$0xff] }
 0x326   : > { %v5311_v45 = vpop.permute.xlu0 %2604 }
 0x328   : > { %v2298_v0 = vpop.permute.xlu1 %2297 }
 0x329   : > { %v2391_v49 = vmul.f32 %v3028_v55, %v2298_v0 }
 0x32a   : > { %v5313_v11 = vpop.permute.xlu0 %2612 }
 0x32c   : > { %v5315_v9 = vpop.permute.xlu1 %2305 }
 0x32d   : > { %v2393_v0 = vmul.f32 %v3030_v19, %v5315_v9  ;;  %v3033_v9 = vld [vmem:[%s5651_s3 + $0x680] sm:$0xff] }
 0x32e   : > { %v5317_v53 = vpop.permute.xlu0 %2620 }
 0x330   : > { %v5322_v21 = vpop.permute.xlu1 %2313 }
 0x333   : > { %v2258_v10 = vpop.permute.xlu0 %2257 }
 0x334   : > { %v2381_v39 = vmul.f32 %v3018_v32, %v2258_v10  ;;  %v5333_v25 = vpop.permute.xlu1 %2321  ;;  %v2429_v10 = vsel %vm833_vm2, %v2389_v51, 0.0 }
 0x336   : > { %v2413_v26 = vsel %vm833_vm2, %v2381_v39, 0.0 }
 0x337   : > { %v2414_v33 = vadd.f32 %v2413_v26, %v2412_v58  ;;  %v2270_v31 = vpop.permute.xlu0 %2269 }
 0x338   : > { %v2384_v35 = vmul.f32 %v3021_v46, %v2270_v31  ;;  %v5344_v6 = vpop.permute.xlu1 %2329  ;;  %v2433_v31 = vsel %vm833_vm2, %v2391_v49, 0.0 }
 0x339   : > { %v2416_v13 = vadd.f32 %v2415_v52, %v2414_v33  ;;  %v3031_v33 = vld [vmem:[%s5651_s3 + $0x670] sm:$0xff]  ;;  %v3032_v52 = vld [vmem:[%s5651_s3 + $0x678] sm:$0xff] }
 0x33a   : > { %v2419_v57 = vsel %vm833_vm2, %v2384_v35, 0.0 }
 0x33b   : > { %v2418_v1 = vadd.f32 %v2417_v50, %v2416_v13  ;;  %v2278_v47 = vpop.permute.xlu0 %2277 }
 0x33c   : > { %v2386_v22 = vmul.f32 %v3023_v20, %v2278_v47  ;;  %v5354_v15 = vpop.permute.xlu1 %2337  ;;  %v3049_v20 = vld [vmem:[%s5651_s3 + $0x700] sm:$0xff] }
 0x33d   : > { %v2420_v12 = vadd.f32 %v2419_v57, %v2418_v1  ;;  %v2437_v57 = vsel %vm833_vm2, %v2393_v0, 0.0  ;;  %v3038_v0 = vld [vmem:[%s5651_s3 + $0x6a8] sm:$0xff] }
 0x33e   : > { %v2423_v29 = vsel %vm833_vm2, %v2386_v22, 0.0  ;;  %v2395_v22 = vmul.f32 %v3032_v52, %v5322_v21  ;;  %v3035_v21 = vld [vmem:[%s5651_s3 + $0x690] sm:$0xff] }
 0x33f   : > { %v2422_v23 = vadd.f32 %v2421_v5, %v2420_v12  ;;  %v2286_v18 = vpop.permute.xlu0 %2285 }
 0x340   : > { %v2388_v44 = vmul.f32 %v3025_v4, %v2286_v18  ;;  %v5364_v62 = vpop.permute.xlu1 %2345  ;;  %v3034_v4 = vld [vmem:[%s5651_s3 + $0x688] sm:$0xff] }
 0x341   : > { %v2424_v63 = vadd.f32 %v2423_v29, %v2422_v23  ;;  %v2644_v23 = vmul.f32 %v3050_v56, %v5244_v43  ;;  %v3053_v43 = vld [vmem:[%s5651_s3 + $0x720] sm:$0xff] }
 0x342   : > { %v2427_v7 = vsel %vm833_vm2, %v2388_v44, 0.0 }
 0x343   : > { %v2426_v24 = vadd.f32 %v2425_v34, %v2424_v63  ;;  %v2294_v40 = vpop.permute.xlu0 %2293  ;;  %v2397_v34 = vmul.f32 %v3034_v4, %v5333_v25 }
 0x344   : > { %v2390_v36 = vmul.f32 %v3027_v16, %v2294_v40  ;;  %v5374_v32 = vpop.permute.xlu1 %2353  ;;  %v2441_v16 = vsel %vm833_vm2, %v2395_v22, 0.0 }
 0x345   : > { %v2428_v8 = vadd.f32 %v2427_v7, %v2426_v24  ;;  %v3036_v24 = vld [vmem:[%s5651_s3 + $0x698] sm:$0xff] }
 0x346   : > { %v2431_v58 = vsel %vm833_vm2, %v2390_v36, 0.0  ;;  %v3052_v36 = vld [vmem:[%s5651_s3 + $0x718] sm:$0xff] }
 0x347   : > { %v2430_v39 = vadd.f32 %v2429_v10, %v2428_v8  ;;  %v2302_v46 = vpop.permute.xlu0 %2301  ;;  %v2676_v8 = vsel %vm833_vm2, %v2644_v23, 0.0 }
 0x348   : > { %v2392_v61 = vmul.f32 %v3029_v48, %v2302_v46  ;;  %v3037_v46 = vld [vmem:[%s5651_s3 + $0x6a0] sm:$0xff] }
 0x349   : > { %v5384_v26 = vpop.permute.xlu1 %2361  ;;  %v2432_v17 = vadd.f32 %v2431_v58, %v2430_v39  ;;  %v2647_v58 = vmul.f32 %v3053_v43, %v5258_v41  ;;  %v3054_v41 = vld [vmem:[%s5651_s3 + $0x728] sm:$0xff]  ;;  %v3059_v43 = vld [vmem:[%s5651_s3 + $0x750] sm:$0xff] }
 0x34a   : > { %v2435_v50 = vsel %vm833_vm2, %v2392_v61, 0.0  ;;  %v3055_v61 = vld [vmem:[%s5651_s3 + $0x730] sm:$0xff] }
 0x34b   : > { %v2434_v35 = vadd.f32 %v2433_v31, %v2432_v17  ;;  %v2310_v13 = vpop.permute.xlu0 %2309  ;;  %v2445_v17 = vsel %vm833_vm2, %v2397_v34, 0.0  ;;  %v2649_v56 = vmul.f32 %v3055_v61, %v5270_v37  ;;  %v3040_v37 = vld [vmem:[%s5651_s3 + $0x6b8] sm:$0xff]  ;;  %v3043_v61 = vld [vmem:[%s5651_s3 + $0x6d0] sm:$0xff] }
 0x34c   : > { %v2394_v59 = vmul.f32 %v3031_v33, %v2310_v13  ;;  %v2399_v33 = vmul.f32 %v3036_v24, %v5344_v6 }
 0x34d   : > { %v2436_v1 = vadd.f32 %v2435_v50, %v2434_v35 }
 0x34e   : > { %v2517_v47 = vpop.permute.xlu1 %2516  ;;  %v2439_v18 = vsel %vm833_vm2, %v2394_v59, 0.0  ;;  %v2449_v22 = vsel %vm833_vm2, %v2399_v33, 0.0 }
 0x34f   : > { %v2643_v12 = vmul.f32 %v3049_v20, %v2517_v47  ;;  %v2438_v5 = vadd.f32 %v2437_v57, %v2436_v1  ;;  %v2318_v54 = vpop.permute.xlu0 %2317  ;;  %v2682_v57 = vsel %vm833_vm2, %v2647_v58, 0.0 }
 0x350   : > { %v2396_v29 = vmul.f32 %v3033_v9, %v2318_v54  ;;  %v3039_v9 = vld [vmem:[%s5651_s3 + $0x6b0] sm:$0xff] }
 0x351   : > { %v2440_v44 = vadd.f32 %v2439_v18, %v2438_v5  ;;  %v2675_v51 = vsel %vm833_vm2, %v2643_v12, 0.0  ;;  %v2401_v12 = vmul.f32 %v3038_v0, %v5354_v15  ;;  %v3057_v5 = vld [vmem:[%s5651_s3 + $0x740] sm:$0xff]  ;;  %v3056_v18 = vld [vmem:[%s5651_s3 + $0x738] sm:$0xff] }
 0x352   : > { %v2525_v63 = vpop.permute.xlu1 %2524  ;;  %v2443_v25 = vsel %vm833_vm2, %v2396_v29, 0.0  ;;  %v2677_v49 = vadd.f32 %v2676_v8, %v2675_v51  ;;  %v3041_v51 = vld [vmem:[%s5651_s3 + $0x6c0] sm:$0xff] }
 0x353   : > { %v2645_v55 = vmul.f32 %v3051_v42, %v2525_v63  ;;  %v2442_v40 = vadd.f32 %v2441_v16, %v2440_v44  ;;  %v2326_v7 = vpop.permute.xlu0 %2325  ;;  %v2686_v63 = vsel %vm833_vm2, %v2649_v56, 0.0  ;;  %v2453_v24 = vsel %vm833_vm2, %v2401_v12, 0.0 }
 0x354   : > { %v2398_v10 = vmul.f32 %v3035_v21, %v2326_v7 }
 0x355   : > { %v2678_v48 = vsel %vm833_vm2, %v2645_v55, 0.0  ;;  %v2444_v19 = vadd.f32 %v2443_v25, %v2442_v40  ;;  %v2651_v55 = vmul.f32 %v3057_v5, %v5282_v38  ;;  %v2403_v40 = vmul.f32 %v3040_v37, %v5364_v62  ;;  %v3058_v38 = vld [vmem:[%s5651_s3 + $0x748] sm:$0xff] }
 0x356   : > { %v2529_v39 = vpop.permute.xlu1 %2528  ;;  %v2679_v52 = vadd.f32 %v2678_v48, %v2677_v49  ;;  %v2447_v20 = vsel %vm833_vm2, %v2398_v10, 0.0 }
 0x357   : > { %v2646_v31 = vmul.f32 %v3052_v36, %v2529_v39  ;;  %v2446_v35 = vadd.f32 %v2445_v17, %v2444_v19  ;;  %v2334_v13 = vpop.permute.xlu0 %2333  ;;  %v3042_v36 = vld [vmem:[%s5651_s3 + $0x6c8] sm:$0xff]  ;;  %v2653_v39 = vmul.f32 %v3059_v43, %v5291_v14  ;;  %v2690_v17 = vsel %vm833_vm2, %v2651_v55, 0.0  ;;  %v3044_v14 = vld [vmem:[%s5651_s3 + $0x6d8] sm:$0xff] }
 0x358   : > { %v2400_v59 = vmul.f32 %v3037_v46, %v2334_v13  ;;  %v2457_v33 = vsel %vm833_vm2, %v2403_v40, 0.0 }
 0x359   : > { %v2680_v50 = vsel %vm833_vm2, %v2646_v31, 0.0  ;;  %v2448_v6 = vadd.f32 %v2447_v20, %v2446_v35  ;;  %v2405_v31 = vmul.f32 %v3042_v36, %v5374_v32  ;;  %v3060_v20 = vld [vmem:[%s5651_s3 + $0x758] sm:$0xff]  ;;  %v2694_v56 = vsel %vm833_vm2, %v2653_v39, 0.0  ;;  %v3067_v36 = vld [vmem:[%s5651_s3 + $0x790] sm:$0xff] }
 0x35a   : > { %v2681_v1 = vadd.f32 %v2680_v50, %v2679_v52  ;;  %v2537_v47 = vpop.permute.xlu1 %2536  ;;  %v2451_v29 = vsel %vm833_vm2, %v2400_v59, 0.0  ;;  %v3061_v52 = vld [vmem:[%s5651_s3 + $0x760] sm:$0xff] }
 0x35b   : > { %v2648_v4 = vmul.f32 %v3054_v41, %v2537_v47  ;;  %v2450_v54 = vadd.f32 %v2449_v22, %v2448_v6  ;;  %v2342_v23 = vpop.permute.xlu0 %2341  ;;  %v2407_v22 = vmul.f32 %v3044_v14, %v5384_v26  ;;  %v3070_v14 = vld [vmem:[%s5651_s3 + $0x7a8] sm:$0xff] }
 0x35c   : > { %v2683_v42 = vadd.f32 %v2682_v57, %v2681_v1  ;;  %v2402_v44 = vmul.f32 %v3039_v9, %v2342_v23  ;;  %v2655_v9 = vmul.f32 %v3061_v52, %v5295_v3  ;;  %v2461_v57 = vsel %vm833_vm2, %v2405_v31, 0.0 }
 0x35d   : > { %v2684_v15 = vsel %vm833_vm2, %v2648_v4, 0.0  ;;  %v2452_v21 = vadd.f32 %v2451_v29, %v2450_v54  ;;  %v3063_v4 = vld [vmem:[%s5651_s3 + $0x770] sm:$0xff]  ;;  %v3062_v54 = vld [vmem:[%s5651_s3 + $0x768] sm:$0xff] }
 0x35e   : > { %v2685_v16 = vadd.f32 %v2684_v15, %v2683_v42  ;;  %v2545_v34 = vpop.permute.xlu1 %2544  ;;  %v2455_v10 = vsel %vm833_vm2, %v2402_v44, 0.0  ;;  %v2698_v26 = vsel %vm833_vm2, %v2655_v9, 0.0  ;;  %v2657_v15 = vmul.f32 %v3063_v4, %v5298_v2 }
 0x35f   : > { %v2650_v7 = vmul.f32 %v3056_v18, %v2545_v34  ;;  %v2454_v8 = vadd.f32 %v2453_v24, %v2452_v21  ;;  %v2350_v48 = vpop.permute.xlu0 %2349  ;;  %v2465_v44 = vsel %vm833_vm2, %v2407_v22, 0.0  ;;  %v3065_v21 = vld [vmem:[%s5651_s3 + $0x780] sm:$0xff] }
 0x360   : > { %v2687_v25 = vadd.f32 %v2686_v63, %v2685_v16  ;;  %v2404_v19 = vmul.f32 %v3041_v51, %v2350_v48  ;;  %v3064_v51 = vld [vmem:[%s5651_s3 + $0x778] sm:$0xff]  ;;  %v2702_v2 = vsel %vm833_vm2, %v2657_v15, 0.0  ;;  %v2659_v40 = vmul.f32 %v3065_v21, %v5301_v30  ;;  %v3069_v30 = vld [vmem:[%s5651_s3 + $0x7a0] sm:$0xff]  ;;  %v3046_v15 = vld [vmem:[%s5651_s3 + $0x6e8] sm:$0xff] }
 0x361   : > { %v2688_v49 = vsel %vm833_vm2, %v2650_v7, 0.0  ;;  %v2456_v62 = vadd.f32 %v2455_v10, %v2454_v8  ;;  %v2663_v31 = vmul.f32 %v3069_v30, %v5309_v27  ;;  %v3076_v21 = vld [vmem:[%s5651_s3 + $0x7d8] sm:$0xff]  ;;  %v3078_v30 = vld [vmem:[%s5651_s3 + $0x7e8] sm:$0xff] }
 0x362   : > { %v2689_v46 = vadd.f32 %v2688_v49, %v2687_v25  ;;  %v2553_v58 = vpop.permute.xlu1 %2552  ;;  %v2459_v50 = vsel %vm833_vm2, %v2404_v19, 0.0  ;;  %v3066_v25 = vld [vmem:[%s5651_s3 + $0x788] sm:$0xff]  ;;  %v2706_v49 = vsel %vm833_vm2, %v2659_v40, 0.0  ;;  %v2661_v19 = vmul.f32 %v3067_v36, %v5305_v60  ;;  %v3071_v60 = vld [vmem:[%s5651_s3 + $0x7b0] sm:$0xff] }
 0x363   : > { %v2652_v0 = vmul.f32 %v3058_v38, %v2553_v58  ;;  %v2458_v35 = vadd.f32 %v2457_v33, %v2456_v62  ;;  %v2358_v41 = vpop.permute.xlu0 %2357  ;;  %v3047_v40 = vld [vmem:[%s5651_s3 + $0x6f0] sm:$0xff] }
 0x364   : > { %v2691_v13 = vadd.f32 %v2690_v17, %v2689_v46  ;;  %v2406_v59 = vmul.f32 %v3043_v61, %v2358_v41  ;;  %v3068_v46 = vld [vmem:[%s5651_s3 + $0x798] sm:$0xff]  ;;  %v2710_v33 = vsel %vm833_vm2, %v2661_v19, 0.0 }
 0x365   : > { %v2692_v32 = vsel %vm833_vm2, %v2652_v0, 0.0  ;;  %v2460_v6 = vadd.f32 %v2459_v50, %v2458_v35  ;;  %v2665_v50 = vmul.f32 %v3071_v60, %v5311_v45 }
 0x366   : > { %v2693_v1 = vadd.f32 %v2692_v32, %v2691_v13  ;;  %v2561_v47 = vpop.permute.xlu1 %2560  ;;  %v2463_v42 = vsel %vm833_vm2, %v2406_v59, 0.0  ;;  %v3072_v59 = vld [vmem:[%s5651_s3 + $0x7b8] sm:$0xff] }
 0x367   : > { %v2654_v12 = vmul.f32 %v3060_v20, %v2561_v47  ;;  %v2462_v5 = vadd.f32 %v2461_v57, %v2460_v6  ;;  %v2714_v20 = vsel %vm833_vm2, %v2663_v31, 0.0  ;;  %v2718_v47 = vsel %vm833_vm2, %v2665_v50, 0.0  ;;  %v3073_v57 = vld [vmem:[%s5651_s3 + $0x7c0] sm:$0xff] }
 0x368   : > { %v2695_v37 = vadd.f32 %v2694_v56, %v2693_v1 }
 0x369   : > { %v2696_v23 = vsel %vm833_vm2, %v2654_v12, 0.0  ;;  %v2464_v3 = vadd.f32 %v2463_v42, %v2462_v5  ;;  %v3074_v12 = vld [vmem:[%s5651_s3 + $0x7c8] sm:$0xff]  ;;  %v2667_v5 = vmul.f32 %v3073_v57, %v5313_v11 }
 0x36a   : > { %v2697_v18 = vadd.f32 %v2696_v23, %v2695_v37  ;;  %v2569_v29 = vpop.permute.xlu1 %2568  ;;  %v2366_v37 = vpop.permute.xlu0 %2365 }
 0x36b   : > { %v2656_v63 = vmul.f32 %v3062_v54, %v2569_v29  ;;  %v5521_v16 = vadd.f32 %v2465_v44, %v2464_v3  ;;  %v2722_v3 = vsel %vm833_vm2, %v2667_v5, 0.0  ;;  %v3075_v29 = vld [vmem:[%s5651_s3 + $0x7d0] sm:$0xff] }
 0x36c   : > { %v2699_v34 = vadd.f32 %v2698_v26, %v2697_v18  ;;  %v3045_v18 = vld [vmem:[%s5651_s3 + $0x6e0] sm:$0xff] }
 0x36d   : > { %v2700_v55 = vsel %vm833_vm2, %v2656_v63, 0.0  ;;  %v2408_v63 = vmul.f32 %v3045_v18, %v2366_v37 }
 0x36e   : > { %v2701_v43 = vadd.f32 %v2700_v55, %v2699_v34  ;;  %v2577_v24 = vpop.permute.xlu1 %2576  ;;  %v2370_v11 = vpop.permute.xlu0 %2369 }
 0x36f   : > { %v2658_v7 = vmul.f32 %v3064_v51, %v2577_v24  ;;  %v2669_v51 = vmul.f32 %v3075_v29, %v5317_v53  ;;  %v2409_v55 = vmul.f32 %v3046_v15, %v2370_v11  ;;  %v3077_v24 = vld [vmem:[%s5651_s3 + $0x7e0] sm:$0xff] }
 0x370   : > { %v2703_v8 = vadd.f32 %v2702_v2, %v2701_v43 }
 0x371   : > { %v2704_v48 = vsel %vm833_vm2, %v2658_v7, 0.0  ;;  %v2467_v7 = vsel %vm833_vm2, %v2408_v63, 0.0  ;;  %v2726_v36 = vsel %vm833_vm2, %v2669_v51, 0.0  ;;  %v2469_v53 = vsel %vm833_vm2, %v2409_v55, 0.0 }
 0x372   : > { %v2705_v38 = vadd.f32 %v2704_v48, %v2703_v8  ;;  %v2585_v10 = vpop.permute.xlu1 %2584  ;;  %v2468_v8 = vadd.f32 %v2467_v7, %v5521_v16 }
 0x373   : > { %v2660_v39 = vmul.f32 %v3066_v25, %v2585_v10 }
 0x374   : > { %v2707_v62 = vadd.f32 %v2706_v49, %v2705_v38  ;;  %v2633_v38 = vpop.permute.xlu0 %2632  ;;  %v2470_v16 = vadd.f32 %v2469_v53, %v2468_v8 }
 0x375   : > { %v2708_v58 = vsel %vm833_vm2, %v2660_v39, 0.0  ;;  %v3048_v39 = vld [vmem:[%s5651_s3 + $0x6f8] sm:$0xff] }
 0x376   : > { %v2709_v61 = vadd.f32 %v2708_v58, %v2707_v62  ;;  %v2593_v17 = vpop.permute.xlu1 %2592 }
 0x377   : > { %v2662_v0 = vmul.f32 %v3068_v46, %v2593_v17 }
 0x378   : > { %v2711_v52 = vadd.f32 %v2710_v33, %v2709_v61  ;;  %v2672_v33 = vmul.f32 %v3078_v30, %v2633_v38  ;;  %v2641_v60 = vpop.permute.xlu0 %2640 }
 0x379   : > { %v2712_v35 = vsel %vm833_vm2, %v2662_v0, 0.0  ;;  %v3080_v0 = vld [vmem:[%s5651_s3 + $0x7f8] sm:$0xff] }
 0x37a   : > { %v2713_v13 = vadd.f32 %v2712_v35, %v2711_v52  ;;  %v2601_v41 = vpop.permute.xlu1 %2600  ;;  %v3079_v35 = vld [vmem:[%s5651_s3 + $0x7f0] sm:$0xff]  ;;  %v2674_v50 = vmul.f32 %v3080_v0, %v2641_v60 }
 0x37b   : > { %v2664_v32 = vmul.f32 %v3070_v14, %v2601_v41 }
 0x37c   : > { %v2715_v27 = vadd.f32 %v2714_v20, %v2713_v13  ;;  %v2732_v20 = vsel %vm833_vm2, %v2672_v33, 0.0 }
 0x37d   : > { %v2716_v56 = vsel %vm833_vm2, %v2664_v32, 0.0 }
 0x37e   : > { %v2717_v6 = vadd.f32 %v2716_v56, %v2715_v27  ;;  %v2609_v1 = vpop.permute.xlu1 %2608 }
 0x37f   : > { %v2666_v9 = vmul.f32 %v3072_v59, %v2609_v1 }
 0x380   : > { %v2719_v22 = vadd.f32 %v2718_v47, %v2717_v6  ;;  %v2736_v47 = vsel %vm833_vm2, %v2674_v50, 0.0 }
 0x381   : > { %v2720_v45 = vsel %vm833_vm2, %v2666_v9, 0.0 }
 0x382   : > { %v2617_v4 = vpop.permute.xlu1 %2616  ;;  %v2721_v54 = vadd.f32 %v2720_v45, %v2719_v22 }
 0x383   : > { %v2668_v42 = vmul.f32 %v3074_v12, %v2617_v4 }
 0x384   : > { %v2723_v26 = vadd.f32 %v2722_v3, %v2721_v54 }
 0x385   : > { %v2724_v44 = vsel %vm833_vm2, %v2668_v42, 0.0 }
 0x386   : > { %v2625_v23 = vpop.permute.xlu1 %2624  ;;  %v2725_v43 = vadd.f32 %v2724_v44, %v2723_v26 }
 0x387   : > { %v2670_v2 = vmul.f32 %v3076_v21, %v2625_v23 }
 0x388   : > { %v2727_v10 = vadd.f32 %v2726_v36, %v2725_v43 }
 0x389   : > { %v2728_v19 = vsel %vm833_vm2, %v2670_v2, 0.0 }
 0x38a   : > { %v2629_v34 = vpop.permute.xlu1 %2628  ;;  %v2729_v61 = vadd.f32 %v2728_v19, %v2727_v10 }
 0x38b   : > { %v2671_v25 = vmul.f32 %v3077_v24, %v2629_v34 }
 0x38d   : > { %v2730_v46 = vsel %vm833_vm2, %v2671_v25, 0.0 }
 0x38e   : > { %v2731_v52 = vadd.f32 %v2730_v46, %v2729_v61 }
 0x38f   : > { %v2374_v48 = vpop.permute.xlu1 %2373 }
 0x390   : > { %v2410_v49 = vmul.f32 %v3047_v40, %v2374_v48  ;;  %v2733_v59 = vadd.f32 %v2732_v20, %v2731_v52 }
 0x392   : > { %v2471_v62 = vsel %vm833_vm2, %v2410_v49, 0.0 }
 0x393   : > { %v2378_v58 = vpop.permute.xlu1 %2377  ;;  %v2472_v31 = vadd.f32 %v2471_v62, %v2470_v16 }
 0x394   : > { %v2411_v17 = vmul.f32 %v3048_v39, %v2378_v58 }
 0x396   : > { %v2473_v14 = vsel %vm833_vm2, %v2411_v17, 0.0 }
 0x397   : > { %v2474_v13 = vadd.f32 %v2473_v14, %v2472_v31 }
 0x398   : > { %v2637_v41 = vpop.permute.xlu1 %2636 }
 0x399   : > { %v2475_v32 = vrot.slane %v2474_v13, 4  ;;  %v2673_v27 = vmul.f32 %v3079_v35, %v2637_v41 }
 0x39b   : > { %v2476_v56 = vadd.f32 %v2475_v32, %v2474_v13  ;;  %v2734_v6 = vsel %vm833_vm2, %v2673_v27, 0.0 }
 0x39c   : > { %v2735_v1 = vadd.f32 %v2734_v6, %v2733_v59 }
 0x39d   : > { %v2477_v9 = vrot.slane %v2476_v56, 2 }
 0x39e   : > { %v2737_v57 = vadd.f32 %v2736_v47, %v2735_v1 }
 0x39f   : > { %v2478_v22 = vadd.f32 %v2477_v9, %v2476_v56 }
 0x3a0   : > { %v2738_v45 = vrot.slane %v2737_v57, 4 }
 0x3a1   : > { %v2479_v12 = vrot.slane %v2478_v22, 1 }
 0x3a2   : > { %v2739_v4 = vadd.f32 %v2738_v45, %v2737_v57 }
 0x3a3   : > { %v2480_v5 = vadd.f32 %v2479_v12, %v2478_v22 }
 0x3a4   : > { %v2740_v37 = vrot.slane %v2739_v4, 2 }
 0x3a5   : > { %v2481_v54 = vadd.f32 %v2480_v5, %v5307_v28 }
 0x3a6   : > { %v2741_v42 = vadd.f32 %v2740_v37, %v2739_v4 }
 0x3a8   : > { %v2742_v23 = vrot.slane %v2741_v42, 1 }
 0x3aa   : > { %v2743_v3 = vadd.f32 %v2742_v23, %v2741_v42 }
 0x3ac   : > { %v2744_v18 = vadd.f32 %v2743_v3, %v2481_v54 }
 0x3ae   : > { %2746 = vst.msk [vmem:[%s216_s6] sm:$0x1] %vm2745_vm3, %v2744_v18 }
 0x3af   : > { %3314 = shalt.err (!%p3311_p3)
}
 0x3b0   : > { %s3315_s15 = scalar_lea.hbm %s2758_s10, 16  ;;  %s3319_s23 = scalar_lea.hbm %s5653_s5, 32 }
 0x3b1   : > { %p3316_p4 = scmp.ne.s32.totalorder %s2758_s10, %s3315_s15  ;;  %p3320_p9 = scmp.lt.s32.totalorder %s2758_s10, %s5653_s5 }
 0x3b2   : > { %p3321_p10 = scmp.lt.s32.totalorder %s3319_s23, %s3315_s15 }
 0x3b3   : > { %p3317_p7 = pnand %p3316_p4, %p3440_p5 }
 0x3b4   : > { %p3322_p11 = por %p3321_p10, %p3320_p9 }
 0x3b5   : > { %p3318_p8 = pneg %p3317_p7 }
 0x3b7   : > { %p3323_p12 = pnand %p3322_p11, %p3318_p8 }
 0x3b9   : > { %3326 = shalt.err (!%p3323_p12)
}
 0x3ba   : > { %3150 = dma.vmem_to_hbm [thread:$0]  (%p3440_p5), %s2761_s7, 16, %s2758_s10, %s2748_s11  }
 0x3bb PF: > { %p3156_p13 = scmp.ge.s32.totalorder %s3361_s21, 2  ;;  %s2772_s30 = sand.u32 1, %s3349_s18  }
 0x3bc   : > { %s2773_s6 = scalar_lea.sflag [#allocation3], %s2772_s30 }
 0x3bd   : > { %p3153_p0 = pnand %p3156_p13, %p3444_p6 }
 0x3bf   : > { %p3154_p1 = pneg %p3153_p0 }
 0x3c1   : > { %3344 = dma.done.wait (%p3154_p1), %s2773_s6, 16  }
 0x3c2   : > { %3346 = vsyncadd (%p3154_p1), %s2773_s6, 4294967280  ;;  %p15_p2 = scmp.ge.s32.totalorder %s3427_s24, 4   ;;  %s5945_s18 = smov %s3353_s19 }
 0x3c3   : > { %s5946_s19 = smov %s3357_s20  ;;  %s5947_s20 = smov %s3438_s27 }
 0x3c4   : > { %s5948_s21 = smov %s3427_s24  ;;  %17 = sbr.rel (!%p15_p2) target bundleno = 3 (0x3), region = 82 }
 0x3c9   :  { %2777 = vsyncpa [#allocation3], 1 }
 0x3ca   :  { %2779 = vsyncpa [#allocation3 + $0x1], 1 }

</bundles_post_ra>
